<compile_context>
chip_gen: v7x
topology: tpu7x:2x2x1
jax: 0.10.0
libtpu: 0.0.40
codegen_flags: <defaults>
</compile_context>

<pallas_src>
import functools
import numpy as np
import jax
import jax.numpy as jnp
from jax.experimental import pallas as pl
from jax.experimental.pallas import tpu as pltpu


CP = 128  # lane width used for all conv activations (keeps the proven slice+reshape pattern)


def _sigmoid(x):
    # numerically-stable sigmoid routed through the EUP tanh (no inf intermediates)
    return 0.5 * (jnp.tanh(0.5 * x) + 1.0)


# ----------------------------------------------------------------------------
# Constant reduction matrices (built once at trace time; exact in bf16)
# ----------------------------------------------------------------------------
def _pool_matrix(H, W):
    """(HP*WP, H*W) 2x2 average-pool matrix (entries 0.25). Assumes even H, W."""
    HP, WP = H // 2, W // 2
    hw = np.arange(H * W)
    r, c = hw // W, hw % W
    src = (r // 2) * WP + (c // 2)
    return (src[None, :] == np.arange(HP * WP)[:, None]).astype(np.float32) * 0.25


def _freq_mean_matrix(TT, FF):
    """(TT, TT*FF) per-frame frequency-mean matrix (entries 1/FF)."""
    r = np.arange(TT * FF) // FF
    return (r[None, :] == np.arange(TT)[:, None]).astype(np.float32) / float(FF)


def _reduce_slab(T, F):
    """Pack pool1 / pool2 / freq-mean matrices into one bf16 slab (rows stacked)."""
    HP1, WP1 = T // 2, F // 2
    TT, FF = HP1 // 2, WP1 // 2
    p1 = _pool_matrix(T, F)            # (HP1*WP1, T*F)
    p2 = _pool_matrix(HP1, WP1)        # (TT*FF,   HP1*WP1)
    fm = _freq_mean_matrix(TT, FF)     # (TT,      TT*FF)
    rows = p1.shape[0] + p2.shape[0] + fm.shape[0]
    cols = p1.shape[1]
    slab = np.zeros((rows, cols), np.float32)
    r0 = 0
    slab[r0:r0 + p1.shape[0], :p1.shape[1]] = p1; r0 += p1.shape[0]
    slab[r0:r0 + p2.shape[0], :p2.shape[1]] = p2; r0 += p2.shape[0]
    slab[r0:r0 + fm.shape[0], :fm.shape[1]] = fm
    return jnp.asarray(slab, jnp.bfloat16)


# ----------------------------------------------------------------------------
# The single fused kernel (one grid step == one batch element, fully VMEM-resident)
# ----------------------------------------------------------------------------
def _fused_kernel(dims, x_ref, wconv_ref, wred_ref, wdense_ref, bias_ref,
                  out_ref, h1_ref, rse_ref):
    EF, SF, AF = dims["EF"], dims["SF"], dims["AF"]
    RH, SC, AFC, AC = dims["RH"], dims["SC"], dims["AFC"], dims["AC"]
    T = x_ref.shape[1] - 2
    F = x_ref.shape[2] - 2
    HP1, WP1 = T // 2, F // 2
    TT, FF = HP1 // 2, WP1 // 2
    bf16 = jnp.bfloat16

    def conv3x3(read_tap, HH, WW, col0, col1, brow, bwidth):
        """3x3 "same" conv over a haloed VMEM tile: 9 shifted views -> 9 MXU dots (bf16,
        f32 accumulation), then bias + ReLU.  Returns (HH*WW, col1-col0) f32."""
        acc = None
        for t in range(9):
            dh, dw = divmod(t, 3)
            patch = read_tap(dh, dw).reshape(HH * WW, CP).astype(bf16)
            d = jnp.dot(patch, wconv_ref[t, :, col0:col1],
                        preferred_element_type=jnp.float32)
            acc = d if acc is None else acc + d
        return jnp.maximum(acc + bias_ref[brow:brow + 1, 0:bwidth], 0.0)

    # zero the haloed scratches: the 1-wide borders and padded channel lanes must stay 0
    h1_ref[...] = jnp.zeros(h1_ref.shape, jnp.float32)
    rse_ref[...] = jnp.zeros(rse_ref.shape, jnp.float32)

    # -------- encoder stage 1: conv + ReLU + 2x2 avg-pool (pool = constant-matrix MXU dot) ----
    a1 = conv3x3(lambda dh, dw: x_ref[0, dh:dh + T, dw:dw + F, :],
                 T, F, 0, EF, 0, EF)                                         # (T*F, EF)
    p1 = jnp.dot(wred_ref[0:HP1 * WP1, 0:T * F], a1.astype(bf16),
                 preferred_element_type=jnp.float32)                         # (HP1*WP1, EF)
    for i in range(HP1):                      # store pooled rows into the haloed VMEM scratch
        h1_ref[1 + i, 1:1 + WP1, 0:EF] = p1[i * WP1:(i + 1) * WP1, :]

    # -------- encoder stage 2 --------
    a2 = conv3x3(lambda dh, dw: h1_ref[dh:dh + HP1, dw:dw + WP1, :],
                 HP1, WP1, EF, 2 * EF, 1, EF)                                # (HP1*WP1, EF)
    r0 = HP1 * WP1
    p2 = jnp.dot(wred_ref[r0:r0 + TT * FF, 0:HP1 * WP1], a2.astype(bf16),
                 preferred_element_type=jnp.float32)                         # (TT*FF, EF)
    for i in range(TT):
        rse_ref[1 + i, 1:1 + FF, 0:EF] = p2[i * FF:(i + 1) * FF, :]

    # -------- SED + ASC 3x3 convs fused along output channels (N = SF + AF) --------
    a3 = conv3x3(lambda dh, dw: rse_ref[dh:dh + TT, dw:dw + FF, :],
                 TT, FF, 2 * EF, 2 * EF + SF + AF, 2, SF + AF)               # (TT*FF, SF+AF)
    r1 = r0 + TT * FF
    red = jnp.dot(wred_ref[r1:r1 + TT, 0:TT * FF], a3.astype(bf16),
                  preferred_element_type=jnp.float32)                        # (TT, SF+AF)
    sed_feat = red[:, 0:SF]                                                  # per-frame freq-mean
    asc_gavg = jnp.mean(red[:, SF:SF + AF], axis=0, keepdims=True)           # global avg pool

    # -------- SED: GRU (fused gate matmuls) + frame FC + sigmoid + time-mean --------
    w_ih = wdense_ref[0:SF, 0:3 * RH]
    w_hh = wdense_ref[SF:SF + RH, 0:3 * RH]
    fc_w = wdense_ref[SF + RH:SF + 2 * RH, 0:SC]
    xg = jnp.dot(sed_feat.astype(bf16), w_ih,
                 preferred_element_type=jnp.float32) + bias_ref[3:4, 0:3 * RH]   # (TT, 3*RH)
    b_hh = bias_ref[4:5, 0:3 * RH]
    fc_b = bias_ref[5:6, 0:SC]
    h = jnp.zeros((1, RH), jnp.float32)
    esum = jnp.zeros((1, SC), jnp.float32)
    for t in range(TT):                       # TT is small and static -> unrolled recurrence
        hg = jnp.dot(h.astype(bf16), w_hh, preferred_element_type=jnp.float32) + b_hh
        rg = _sigmoid(xg[t:t + 1, 0:RH] + hg[:, 0:RH])
        zg = _sigmoid(xg[t:t + 1, RH:2 * RH] + hg[:, RH:2 * RH])
        ng = jnp.tanh(xg[t:t + 1, 2 * RH:3 * RH] + rg * hg[:, 2 * RH:3 * RH])
        h = (1.0 - zg) * ng + zg * h
        esum = esum + _sigmoid(jnp.dot(h.astype(bf16), fc_w,
                                       preferred_element_type=jnp.float32) + fc_b)
    e_e = esum * (1.0 / TT)                                                  # (1, SC)

    # -------- ASC: FC + ReLU + FC + EXACT softmax (user-visible output) --------
    d0 = SF + 2 * RH
    f1w = wdense_ref[d0:d0 + AF, 0:AFC]
    f2w = wdense_ref[d0 + AF:d0 + AF + AFC, 0:AC]
    dse = wdense_ref[d0 + AF + AFC:d0 + AF + AFC + AC, 0:SC]
    z1 = jnp.maximum(jnp.dot(asc_gavg.astype(bf16), f1w,
                             preferred_element_type=jnp.float32) + bias_ref[6:7, 0:AFC], 0.0)
    logits = jnp.dot(z1.astype(bf16), f2w,
                     preferred_element_type=jnp.float32) + bias_ref[7:8, 0:AC]   # (1, AC)
    ex = jnp.exp(logits - jnp.max(logits, axis=-1, keepdims=True))
    y_s = ex / jnp.sum(ex, axis=-1, keepdims=True)                           # exact divide

    # -------- soft-mask head: sigmoid(y_s @ D_se) * E_e --------
    m_se = _sigmoid(jnp.dot(y_s.astype(bf16), dse, preferred_element_type=jnp.float32))
    y_e = e_e * m_se

    # -------- single lane-dense packed output: rows 0/1/2 = y_e / y_s / E_e --------
    out_ref[0] = jnp.zeros((out_ref.shape[1], out_ref.shape[2]), jnp.float32)
    out_ref[0, 0:1, 0:SC] = y_e
    out_ref[0, 1:2, 0:AC] = y_s
    out_ref[0, 2:3, 0:SC] = e_e


# ----------------------------------------------------------------------------
# Parameters (natural shapes), one-time kernel-layout packing, forward
# ----------------------------------------------------------------------------
def init_params(key, args):
    C, EF = args["channel"], args["encoder_filter"]
    SF, RH, SC = args["sed_filter"], args["sed_rnn_dim"], args["sed_class"]
    AF, AFC, AC = args["asc_filter"], args["asc_fc"], args["asc_class"]
    ks = jax.random.split(key, 9)

    def conv_w(k, cin, cout):
        return jax.random.normal(k, (3, 3, cin, cout), jnp.float32) / jnp.sqrt(9.0 * cin)

    def lin_w(k, fin, fout):
        return jax.random.normal(k, (fin, fout), jnp.float32) / jnp.sqrt(1.0 * fin)

    return {
        "enc_w1": conv_w(ks[0], C, EF), "enc_b1": jnp.zeros((EF,), jnp.float32),
        "enc_w2": conv_w(ks[1], EF, EF), "enc_b2": jnp.zeros((EF,), jnp.float32),
        "sed_cw": conv_w(ks[2], EF, SF), "sed_cb": jnp.zeros((SF,), jnp.float32),
        "gru_w_ih": lin_w(ks[3], SF, 3 * RH), "gru_b_ih": jnp.zeros((3 * RH,), jnp.float32),
        "gru_w_hh": lin_w(ks[4], RH, 3 * RH), "gru_b_hh": jnp.zeros((3 * RH,), jnp.float32),
        "sed_fc_w": lin_w(ks[5], RH, SC), "sed_fc_b": jnp.zeros((SC,), jnp.float32),
        "asc_cw": conv_w(ks[6], EF, AF), "asc_cb": jnp.zeros((AF,), jnp.float32),
        "asc_fc1_w": lin_w(ks[7], AF, AFC), "asc_fc1_b": jnp.zeros((AFC,), jnp.float32),
        "asc_fc2_w": lin_w(ks[8], AFC, AC), "asc_fc2_b": jnp.zeros((AC,), jnp.float32),
        "D_se": jnp.ones((AC, SC), jnp.float32),             # nn.Parameter(torch.ones(...))
    }


def prepare_kernel_params(p, dims):
    """One-time packing of all weights into 3 slabs + 1 bias slab (off the hot path)."""
    C, EF, SF, AF = dims["C"], dims["EF"], dims["SF"], dims["AF"]
    RH, SC, AFC, AC = dims["RH"], dims["SC"], dims["AFC"], dims["AC"]

    def conv9(w):                         # (3,3,cin,cout) -> (9, cin, cout), tap-major
        w = np.asarray(w)
        return w.reshape(9, w.shape[2], w.shape[3])

    # conv slab: K = 128 activation lanes, N columns = [enc1 | enc2 | sed | asc]
    ncols = 2 * EF + SF + AF
    wconv = np.zeros((9, CP, ncols), np.float32)
    wconv[:, :C, 0:EF] = conv9(p["enc_w1"])
    wconv[:, :EF, EF:2 * EF] = conv9(p["enc_w2"])
    wconv[:, :EF, 2 * EF:2 * EF + SF] = conv9(p["sed_cw"])
    wconv[:, :EF, 2 * EF + SF:ncols] = conv9(p["asc_cw"])

    # dense slab (row blocks): gru_w_ih | gru_w_hh | sed_fc_w | asc_fc1_w | asc_fc2_w | D_se
    drows = SF + 2 * RH + AF + AFC + AC
    dcols = max(3 * RH, SC, AFC, AC)
    wdense = np.zeros((drows, dcols), np.float32)
    r = 0
    wdense[r:r + SF, 0:3 * RH] = np.asarray(p["gru_w_ih"]); r += SF
    wdense[r:r + RH, 0:3 * RH] = np.asarray(p["gru_w_hh"]); r += RH
    wdense[r:r + RH, 0:SC] = np.asarray(p["sed_fc_w"]); r += RH
    wdense[r:r + AF, 0:AFC] = np.asarray(p["asc_fc1_w"]); r += AF
    wdense[r:r + AFC, 0:AC] = np.asarray(p["asc_fc2_w"]); r += AFC
    wdense[r:r + AC, 0:SC] = np.asarray(p["D_se"])

    # bias / epilogue slab (f32), one row per consumer, zero-padded columns
    bcols = max(EF, SF + AF, 3 * RH, SC, AFC, AC)
    bias = np.zeros((8, bcols), np.float32)
    bias[0, 0:EF] = np.asarray(p["enc_b1"])
    bias[1, 0:EF] = np.asarray(p["enc_b2"])
    bias[2, 0:SF] = np.asarray(p["sed_cb"])
    bias[2, SF:SF + AF] = np.asarray(p["asc_cb"])
    bias[3, 0:3 * RH] = np.asarray(p["gru_b_ih"])
    bias[4, 0:3 * RH] = np.asarray(p["gru_b_hh"])
    bias[5, 0:SC] = np.asarray(p["sed_fc_b"])
    bias[6, 0:AFC] = np.asarray(p["asc_fc1_b"])
    bias[7, 0:AC] = np.asarray(p["asc_fc2_b"])

    return {
        "wconv": jnp.asarray(wconv, jnp.bfloat16),
        "wdense": jnp.asarray(wdense, jnp.bfloat16),
        "bias": jnp.asarray(bias, jnp.float32),
    }


def sedm_a_forward(kp, x_nchw, dims):
    B, C, T, F = x_nchw.shape
    SC, AC = dims["SC"], dims["AC"]
    HP1, WP1 = T // 2, F // 2
    TT, FF = HP1 // 2, WP1 // 2

    # NCHW -> NHWC, zero halo for the first "same" conv, channel-pad to CP lanes.
    # (128-lane f32 input costs ~0.3 us of extra HBM read at these sizes; keeps a single
    #  proven slice+reshape conv pattern for all three stages.)
    x = jnp.transpose(x_nchw, (0, 2, 3, 1)).astype(jnp.float32)
    x = jnp.pad(x, ((0, 0), (1, 1), (1, 1), (0, CP - C)))

    wred = _reduce_slab(T, F)                         # compile-time constant reduction slab

    kernel = functools.partial(_fused_kernel, dims)
    out = pl.pallas_call(
        kernel,
        grid=(B,),
        in_specs=[
            pl.BlockSpec((1, T + 2, F + 2, CP), lambda b: (b, 0, 0, 0)),
            pl.BlockSpec(kp["wconv"].shape, lambda b: (0, 0, 0)),
            pl.BlockSpec(wred.shape, lambda b: (0, 0)),
            pl.BlockSpec(kp["wdense"].shape, lambda b: (0, 0)),
            pl.BlockSpec(kp["bias"].shape, lambda b: (0, 0)),
        ],
        out_specs=pl.BlockSpec((1, 8, CP), lambda b: (b, 0, 0)),
        out_shape=jax.ShapeDtypeStruct((B, 8, CP), jnp.float32),
        scratch_shapes=[
            pltpu.VMEM((HP1 + 2, WP1 + 2, CP), jnp.float32),   # haloed stage-1 activation
            pltpu.VMEM((TT + 2, FF + 2, CP), jnp.float32),     # haloed R_se activation
        ],
        compiler_params=pltpu.CompilerParams(dimension_semantics=("parallel",)),
    )(x, kp["wconv"], wred, kp["wdense"], kp["bias"])

    y_e_hat = out[:, 0, :SC]
    y_s_hat = out[:, 1, :AC]
    e_e = out[:, 2, :SC]
    return y_e_hat, y_s_hat, e_e


# ----------------------------------------------------------------------------
# Demo
# ----------------------------------------------------------------------------
if __name__ == "__main__":
    args = dict(channel=1, encoder_filter=8, sed_filter=16, sed_rnn_dim=16,
                sed_class=10, asc_filter=16, asc_fc=32, asc_class=4, dropout=0.0)
    dims = dict(C=args["channel"], EF=args["encoder_filter"], SF=args["sed_filter"],
                RH=args["sed_rnn_dim"], SC=args["sed_class"], AF=args["asc_filter"],
                AFC=args["asc_fc"], AC=args["asc_class"])

    key = jax.random.PRNGKey(0)
    kparam, kx = jax.random.split(key)
    params = init_params(kparam, args)
    kp = prepare_kernel_params(params, dims)                        # off the hot path
    x = jax.random.normal(kx, (2, args["channel"], 16, 16), jnp.float32)   # (B, C, T, F)

    fwd = jax.jit(lambda kp_, x_: sedm_a_forward(kp_, x_, dims))
    y_e_hat, y_s_hat, e_e = fwd(kp, x)
    jax.block_until_ready((y_e_hat, y_s_hat, e_e))

    assert y_e_hat.shape == (2, args["sed_class"])
    assert y_s_hat.shape == (2, args["asc_class"])
    assert e_e.shape == (2, args["sed_class"])
    assert bool(jnp.all(jnp.isfinite(y_e_hat)))
    assert bool(jnp.all(jnp.isfinite(y_s_hat)))
    assert bool(jnp.all(jnp.isfinite(e_e)))
    # exact in-kernel softmax -> rows sum to 1 (f32 rounding only)
    assert bool(jnp.allclose(jnp.sum(y_s_hat, axis=-1), 1.0, atol=1e-4))
    # head consistency: y_e_hat == E_e * sigmoid(y_s_hat @ D_se)  (bf16 D_se dot -> loose tol)
    m_ref = jax.nn.sigmoid(jnp.matmul(y_s_hat, params["D_se"], precision="highest"))
    assert bool(jnp.allclose(y_e_hat, e_e * m_ref, atol=1e-2))
    print("KERNEL_OK")
</pallas_src>

<mosaic_0001>
module attributes {stable_mosaic.version = 11 : i64} {
  func.func @_fused_kernel(%arg0: i32, %arg1: memref<1x18x18x128xf32, #tpu.memory_space<vmem>>, %arg2: memref<9x128x48xbf16, #tpu.memory_space<vmem>>, %arg3: memref<84x256xbf16, #tpu.memory_space<vmem>>, %arg4: memref<100x48xbf16, #tpu.memory_space<vmem>>, %arg5: memref<8x48xf32, #tpu.memory_space<vmem>>, %arg6: memref<1x8x128xf32, #tpu.memory_space<vmem>>, %arg7: memref<10x10x128xf32, #tpu.memory_space<vmem>>, %arg8: memref<6x6x128xf32, #tpu.memory_space<vmem>>) attributes {dimension_semantics = [#tpu.dimension_semantics<parallel>], iteration_bounds = array<i64: 2>, scalar_prefetch = 0 : i64, scratch_operands = 2 : i64, tpu.core_type = #tpu.core_type<tc>, window_params = [{transform_indices = @transform_0, window_bounds = array<i64: 1, 18, 18, 128>}, {pipeline_mode = #tpu.pipeline_mode<synchronous>, transform_indices = @transform_1, window_bounds = array<i64: 9, 128, 48>}, {pipeline_mode = #tpu.pipeline_mode<synchronous>, transform_indices = @transform_2, window_bounds = array<i64: 84, 256>}, {pipeline_mode = #tpu.pipeline_mode<synchronous>, transform_indices = @transform_3, window_bounds = array<i64: 100, 48>}, {pipeline_mode = #tpu.pipeline_mode<synchronous>, transform_indices = @transform_4, window_bounds = array<i64: 8, 48>}, {transform_indices = @transform_5, window_bounds = array<i64: 1, 8, 128>}]} {
    %cst = arith.constant 0.000000e+00 : f32
    %0 = vector.broadcast %cst : f32 to vector<10x10x128xf32>
    %c0 = arith.constant 0 : index
    %c0_0 = arith.constant 0 : index
    %c0_1 = arith.constant 0 : index
    %1 = vector.load %arg7[%c0, %c0_0, %c0_1] : memref<10x10x128xf32, #tpu.memory_space<vmem>>, vector<10x10x128xf32>
    tpu.vector_store %arg7[%c0, %c0_0, %c0_1], %0 {strides = array<i32>} : memref<10x10x128xf32, #tpu.memory_space<vmem>>, vector<10x10x128xf32>,
    %cst_2 = arith.constant 0.000000e+00 : f32
    %2 = vector.broadcast %cst_2 : f32 to vector<6x6x128xf32>
    %c0_3 = arith.constant 0 : index
    %c0_4 = arith.constant 0 : index
    %c0_5 = arith.constant 0 : index
    %3 = vector.load %arg8[%c0_3, %c0_4, %c0_5] : memref<6x6x128xf32, #tpu.memory_space<vmem>>, vector<6x6x128xf32>
    tpu.vector_store %arg8[%c0_3, %c0_4, %c0_5], %2 {strides = array<i32>} : memref<6x6x128xf32, #tpu.memory_space<vmem>>, vector<6x6x128xf32>,
    %c0_6 = arith.constant 0 : index
    %c0_7 = arith.constant 0 : index
    %c0_8 = arith.constant 0 : index
    %c0_9 = arith.constant 0 : index
    %4 = vector.load %arg1[%c0_6, %c0_7, %c0_8, %c0_9] : memref<1x18x18x128xf32, #tpu.memory_space<vmem>>, vector<1x16x16x128xf32>
    %5 = vector.shape_cast %4 : vector<1x16x16x128xf32> to vector<16x16x128xf32>
    %6 = vector.shape_cast %5 : vector<16x16x128xf32> to vector<256x128xf32>
    %7 = arith.truncf %6 : vector<256x128xf32> to vector<256x128xbf16>
    %c0_10 = arith.constant 0 : index
    %c0_11 = arith.constant 0 : index
    %c0_12 = arith.constant 0 : index
    %8 = vector.load %arg2[%c0_10, %c0_11, %c0_12] : memref<9x128x48xbf16, #tpu.memory_space<vmem>>, vector<1x128x8xbf16>
    %9 = vector.shape_cast %8 : vector<1x128x8xbf16> to vector<128x8xbf16>
    %cst_13 = arith.constant dense<0.000000e+00> : vector<256x8xf32>
    %10 = tpu.matmul %7, %9, %cst_13 {dimension_numbers = #tpu.dot_dimension_numbers<[1], [0], [0], [1], [0, 0, 1, 1], [], []>} : vector<256x128xbf16>, vector<128x8xbf16>, vector<256x8xf32> -> vector<256x8xf32>
    %c0_14 = arith.constant 0 : index
    %c0_15 = arith.constant 0 : index
    %c1 = arith.constant 1 : index
    %c0_16 = arith.constant 0 : index
    %11 = vector.load %arg1[%c0_14, %c0_15, %c1, %c0_16] : memref<1x18x18x128xf32, #tpu.memory_space<vmem>>, vector<1x16x16x128xf32>
    %12 = vector.shape_cast %11 : vector<1x16x16x128xf32> to vector<16x16x128xf32>
    %13 = vector.shape_cast %12 : vector<16x16x128xf32> to vector<256x128xf32>
    %14 = arith.truncf %13 : vector<256x128xf32> to vector<256x128xbf16>
    %c1_17 = arith.constant 1 : index
    %c0_18 = arith.constant 0 : index
    %c0_19 = arith.constant 0 : index
    %15 = vector.load %arg2[%c1_17, %c0_18, %c0_19] : memref<9x128x48xbf16, #tpu.memory_space<vmem>>, vector<1x128x8xbf16>
    %16 = vector.shape_cast %15 : vector<1x128x8xbf16> to vector<128x8xbf16>
    %cst_20 = arith.constant dense<0.000000e+00> : vector<256x8xf32>
    %17 = tpu.matmul %14, %16, %cst_20 {dimension_numbers = #tpu.dot_dimension_numbers<[1], [0], [0], [1], [0, 0, 1, 1], [], []>} : vector<256x128xbf16>, vector<128x8xbf16>, vector<256x8xf32> -> vector<256x8xf32>
    %18 = arith.addf %10, %17 : vector<256x8xf32>
    %c0_21 = arith.constant 0 : index
    %c0_22 = arith.constant 0 : index
    %c2 = arith.constant 2 : index
    %c0_23 = arith.constant 0 : index
    %19 = vector.load %arg1[%c0_21, %c0_22, %c2, %c0_23] : memref<1x18x18x128xf32, #tpu.memory_space<vmem>>, vector<1x16x16x128xf32>
    %20 = vector.shape_cast %19 : vector<1x16x16x128xf32> to vector<16x16x128xf32>
    %21 = vector.shape_cast %20 : vector<16x16x128xf32> to vector<256x128xf32>
    %22 = arith.truncf %21 : vector<256x128xf32> to vector<256x128xbf16>
    %c2_24 = arith.constant 2 : index
    %c0_25 = arith.constant 0 : index
    %c0_26 = arith.constant 0 : index
    %23 = vector.load %arg2[%c2_24, %c0_25, %c0_26] : memref<9x128x48xbf16, #tpu.memory_space<vmem>>, vector<1x128x8xbf16>
    %24 = vector.shape_cast %23 : vector<1x128x8xbf16> to vector<128x8xbf16>
    %cst_27 = arith.constant dense<0.000000e+00> : vector<256x8xf32>
    %25 = tpu.matmul %22, %24, %cst_27 {dimension_numbers = #tpu.dot_dimension_numbers<[1], [0], [0], [1], [0, 0, 1, 1], [], []>} : vector<256x128xbf16>, vector<128x8xbf16>, vector<256x8xf32> -> vector<256x8xf32>
    %26 = arith.addf %18, %25 : vector<256x8xf32>
    %c0_28 = arith.constant 0 : index
    %c1_29 = arith.constant 1 : index
    %c0_30 = arith.constant 0 : index
    %c0_31 = arith.constant 0 : index
    %27 = vector.load %arg1[%c0_28, %c1_29, %c0_30, %c0_31] : memref<1x18x18x128xf32, #tpu.memory_space<vmem>>, vector<1x16x16x128xf32>
    %28 = vector.shape_cast %27 : vector<1x16x16x128xf32> to vector<16x16x128xf32>
    %29 = vector.shape_cast %28 : vector<16x16x128xf32> to vector<256x128xf32>
    %30 = arith.truncf %29 : vector<256x128xf32> to vector<256x128xbf16>
    %c3 = arith.constant 3 : index
    %c0_32 = arith.constant 0 : index
    %c0_33 = arith.constant 0 : index
    %31 = vector.load %arg2[%c3, %c0_32, %c0_33] : memref<9x128x48xbf16, #tpu.memory_space<vmem>>, vector<1x128x8xbf16>
    %32 = vector.shape_cast %31 : vector<1x128x8xbf16> to vector<128x8xbf16>
    %cst_34 = arith.constant dense<0.000000e+00> : vector<256x8xf32>
    %33 = tpu.matmul %30, %32, %cst_34 {dimension_numbers = #tpu.dot_dimension_numbers<[1], [0], [0], [1], [0, 0, 1, 1], [], []>} : vector<256x128xbf16>, vector<128x8xbf16>, vector<256x8xf32> -> vector<256x8xf32>
    %34 = arith.addf %26, %33 : vector<256x8xf32>
    %c0_35 = arith.constant 0 : index
    %c1_36 = arith.constant 1 : index
    %c1_37 = arith.constant 1 : index
    %c0_38 = arith.constant 0 : index
    %35 = vector.load %arg1[%c0_35, %c1_36, %c1_37, %c0_38] : memref<1x18x18x128xf32, #tpu.memory_space<vmem>>, vector<1x16x16x128xf32>
    %36 = vector.shape_cast %35 : vector<1x16x16x128xf32> to vector<16x16x128xf32>
    %37 = vector.shape_cast %36 : vector<16x16x128xf32> to vector<256x128xf32>
    %38 = arith.truncf %37 : vector<256x128xf32> to vector<256x128xbf16>
    %c4 = arith.constant 4 : index
    %c0_39 = arith.constant 0 : index
    %c0_40 = arith.constant 0 : index
    %39 = vector.load %arg2[%c4, %c0_39, %c0_40] : memref<9x128x48xbf16, #tpu.memory_space<vmem>>, vector<1x128x8xbf16>
    %40 = vector.shape_cast %39 : vector<1x128x8xbf16> to vector<128x8xbf16>
    %cst_41 = arith.constant dense<0.000000e+00> : vector<256x8xf32>
    %41 = tpu.matmul %38, %40, %cst_41 {dimension_numbers = #tpu.dot_dimension_numbers<[1], [0], [0], [1], [0, 0, 1, 1], [], []>} : vector<256x128xbf16>, vector<128x8xbf16>, vector<256x8xf32> -> vector<256x8xf32>
    %42 = arith.addf %34, %41 : vector<256x8xf32>
    %c0_42 = arith.constant 0 : index
    %c1_43 = arith.constant 1 : index
    %c2_44 = arith.constant 2 : index
    %c0_45 = arith.constant 0 : index
    %43 = vector.load %arg1[%c0_42, %c1_43, %c2_44, %c0_45] : memref<1x18x18x128xf32, #tpu.memory_space<vmem>>, vector<1x16x16x128xf32>
    %44 = vector.shape_cast %43 : vector<1x16x16x128xf32> to vector<16x16x128xf32>
    %45 = vector.shape_cast %44 : vector<16x16x128xf32> to vector<256x128xf32>
    %46 = arith.truncf %45 : vector<256x128xf32> to vector<256x128xbf16>
    %c5 = arith.constant 5 : index
    %c0_46 = arith.constant 0 : index
    %c0_47 = arith.constant 0 : index
    %47 = vector.load %arg2[%c5, %c0_46, %c0_47] : memref<9x128x48xbf16, #tpu.memory_space<vmem>>, vector<1x128x8xbf16>
    %48 = vector.shape_cast %47 : vector<1x128x8xbf16> to vector<128x8xbf16>
    %cst_48 = arith.constant dense<0.000000e+00> : vector<256x8xf32>
    %49 = tpu.matmul %46, %48, %cst_48 {dimension_numbers = #tpu.dot_dimension_numbers<[1], [0], [0], [1], [0, 0, 1, 1], [], []>} : vector<256x128xbf16>, vector<128x8xbf16>, vector<256x8xf32> -> vector<256x8xf32>
    %50 = arith.addf %42, %49 : vector<256x8xf32>
    %c0_49 = arith.constant 0 : index
    %c2_50 = arith.constant 2 : index
    %c0_51 = arith.constant 0 : index
    %c0_52 = arith.constant 0 : index
    %51 = vector.load %arg1[%c0_49, %c2_50, %c0_51, %c0_52] : memref<1x18x18x128xf32, #tpu.memory_space<vmem>>, vector<1x16x16x128xf32>
    %52 = vector.shape_cast %51 : vector<1x16x16x128xf32> to vector<16x16x128xf32>
    %53 = vector.shape_cast %52 : vector<16x16x128xf32> to vector<256x128xf32>
    %54 = arith.truncf %53 : vector<256x128xf32> to vector<256x128xbf16>
    %c6 = arith.constant 6 : index
    %c0_53 = arith.constant 0 : index
    %c0_54 = arith.constant 0 : index
    %55 = vector.load %arg2[%c6, %c0_53, %c0_54] : memref<9x128x48xbf16, #tpu.memory_space<vmem>>, vector<1x128x8xbf16>
    %56 = vector.shape_cast %55 : vector<1x128x8xbf16> to vector<128x8xbf16>
    %cst_55 = arith.constant dense<0.000000e+00> : vector<256x8xf32>
    %57 = tpu.matmul %54, %56, %cst_55 {dimension_numbers = #tpu.dot_dimension_numbers<[1], [0], [0], [1], [0, 0, 1, 1], [], []>} : vector<256x128xbf16>, vector<128x8xbf16>, vector<256x8xf32> -> vector<256x8xf32>
    %58 = arith.addf %50, %57 : vector<256x8xf32>
    %c0_56 = arith.constant 0 : index
    %c2_57 = arith.constant 2 : index
    %c1_58 = arith.constant 1 : index
    %c0_59 = arith.constant 0 : index
    %59 = vector.load %arg1[%c0_56, %c2_57, %c1_58, %c0_59] : memref<1x18x18x128xf32, #tpu.memory_space<vmem>>, vector<1x16x16x128xf32>
    %60 = vector.shape_cast %59 : vector<1x16x16x128xf32> to vector<16x16x128xf32>
    %61 = vector.shape_cast %60 : vector<16x16x128xf32> to vector<256x128xf32>
    %62 = arith.truncf %61 : vector<256x128xf32> to vector<256x128xbf16>
    %c7 = arith.constant 7 : index
    %c0_60 = arith.constant 0 : index
    %c0_61 = arith.constant 0 : index
    %63 = vector.load %arg2[%c7, %c0_60, %c0_61] : memref<9x128x48xbf16, #tpu.memory_space<vmem>>, vector<1x128x8xbf16>
    %64 = vector.shape_cast %63 : vector<1x128x8xbf16> to vector<128x8xbf16>
    %cst_62 = arith.constant dense<0.000000e+00> : vector<256x8xf32>
    %65 = tpu.matmul %62, %64, %cst_62 {dimension_numbers = #tpu.dot_dimension_numbers<[1], [0], [0], [1], [0, 0, 1, 1], [], []>} : vector<256x128xbf16>, vector<128x8xbf16>, vector<256x8xf32> -> vector<256x8xf32>
    %66 = arith.addf %58, %65 : vector<256x8xf32>
    %c0_63 = arith.constant 0 : index
    %c2_64 = arith.constant 2 : index
    %c2_65 = arith.constant 2 : index
    %c0_66 = arith.constant 0 : index
    %67 = vector.load %arg1[%c0_63, %c2_64, %c2_65, %c0_66] : memref<1x18x18x128xf32, #tpu.memory_space<vmem>>, vector<1x16x16x128xf32>
    %68 = vector.shape_cast %67 : vector<1x16x16x128xf32> to vector<16x16x128xf32>
    %69 = vector.shape_cast %68 : vector<16x16x128xf32> to vector<256x128xf32>
    %70 = arith.truncf %69 : vector<256x128xf32> to vector<256x128xbf16>
    %c8 = arith.constant 8 : index
    %c0_67 = arith.constant 0 : index
    %c0_68 = arith.constant 0 : index
    %71 = vector.load %arg2[%c8, %c0_67, %c0_68] : memref<9x128x48xbf16, #tpu.memory_space<vmem>>, vector<1x128x8xbf16>
    %72 = vector.shape_cast %71 : vector<1x128x8xbf16> to vector<128x8xbf16>
    %cst_69 = arith.constant dense<0.000000e+00> : vector<256x8xf32>
    %73 = tpu.matmul %70, %72, %cst_69 {dimension_numbers = #tpu.dot_dimension_numbers<[1], [0], [0], [1], [0, 0, 1, 1], [], []>} : vector<256x128xbf16>, vector<128x8xbf16>, vector<256x8xf32> -> vector<256x8xf32>
    %74 = arith.addf %66, %73 : vector<256x8xf32>
    %c0_70 = arith.constant 0 : index
    %c0_71 = arith.constant 0 : index
    %75 = vector.load %arg5[%c0_70, %c0_71] : memref<8x48xf32, #tpu.memory_space<vmem>>, vector<1x8xf32>
    %76 = vector.broadcast %75 : vector<1x8xf32> to vector<256x8xf32>
    %77 = arith.addf %74, %76 : vector<256x8xf32>
    %cst_72 = arith.constant 0.000000e+00 : f32
    %78 = vector.broadcast %cst_72 : f32 to vector<256x8xf32>
    %79 = arith.maximumf %77, %78 : vector<256x8xf32>
    %c0_73 = arith.constant 0 : index
    %c0_74 = arith.constant 0 : index
    %80 = vector.load %arg3[%c0_73, %c0_74] : memref<84x256xbf16, #tpu.memory_space<vmem>>, vector<64x256xbf16>
    %81 = arith.truncf %79 : vector<256x8xf32> to vector<256x8xbf16>
    %cst_75 = arith.constant dense<0.000000e+00> : vector<64x8xf32>
    %82 = tpu.matmul %80, %81, %cst_75 {dimension_numbers = #tpu.dot_dimension_numbers<[1], [0], [0], [1], [0, 0, 1, 1], [], []>} : vector<64x256xbf16>, vector<256x8xbf16>, vector<64x8xf32> -> vector<64x8xf32>
    %83 = vector.extract_strided_slice %82 {offsets = [0, 0], sizes = [8, 8], strides = [1, 1]} : vector<64x8xf32> to vector<8x8xf32>
    %c1_76 = arith.constant 1 : index
    %c1_77 = arith.constant 1 : index
    %c0_78 = arith.constant 0 : index
    %84 = vector.load %arg7[%c1_76, %c1_77, %c0_78] : memref<10x10x128xf32, #tpu.memory_space<vmem>>, vector<1x8x8xf32>
    %85 = vector.shape_cast %84 : vector<1x8x8xf32> to vector<8x8xf32>
    %86 = vector.shape_cast %83 : vector<8x8xf32> to vector<1x8x8xf32>
    tpu.vector_store %arg7[%c1_76, %c1_77, %c0_78], %86 {strides = array<i32>} : memref<10x10x128xf32, #tpu.memory_space<vmem>>, vector<1x8x8xf32>,
    %87 = vector.extract_strided_slice %82 {offsets = [8, 0], sizes = [8, 8], strides = [1, 1]} : vector<64x8xf32> to vector<8x8xf32>
    %c2_79 = arith.constant 2 : index
    %c1_80 = arith.constant 1 : index
    %c0_81 = arith.constant 0 : index
    %88 = vector.load %arg7[%c2_79, %c1_80, %c0_81] : memref<10x10x128xf32, #tpu.memory_space<vmem>>, vector<1x8x8xf32>
    %89 = vector.shape_cast %88 : vector<1x8x8xf32> to vector<8x8xf32>
    %90 = vector.shape_cast %87 : vector<8x8xf32> to vector<1x8x8xf32>
    tpu.vector_store %arg7[%c2_79, %c1_80, %c0_81], %90 {strides = array<i32>} : memref<10x10x128xf32, #tpu.memory_space<vmem>>, vector<1x8x8xf32>,
    %91 = vector.extract_strided_slice %82 {offsets = [16, 0], sizes = [8, 8], strides = [1, 1]} : vector<64x8xf32> to vector<8x8xf32>
    %c3_82 = arith.constant 3 : index
    %c1_83 = arith.constant 1 : index
    %c0_84 = arith.constant 0 : index
    %92 = vector.load %arg7[%c3_82, %c1_83, %c0_84] : memref<10x10x128xf32, #tpu.memory_space<vmem>>, vector<1x8x8xf32>
    %93 = vector.shape_cast %92 : vector<1x8x8xf32> to vector<8x8xf32>
    %94 = vector.shape_cast %91 : vector<8x8xf32> to vector<1x8x8xf32>
    tpu.vector_store %arg7[%c3_82, %c1_83, %c0_84], %94 {strides = array<i32>} : memref<10x10x128xf32, #tpu.memory_space<vmem>>, vector<1x8x8xf32>,
    %95 = vector.extract_strided_slice %82 {offsets = [24, 0], sizes = [8, 8], strides = [1, 1]} : vector<64x8xf32> to vector<8x8xf32>
    %c4_85 = arith.constant 4 : index
    %c1_86 = arith.constant 1 : index
    %c0_87 = arith.constant 0 : index
    %96 = vector.load %arg7[%c4_85, %c1_86, %c0_87] : memref<10x10x128xf32, #tpu.memory_space<vmem>>, vector<1x8x8xf32>
    %97 = vector.shape_cast %96 : vector<1x8x8xf32> to vector<8x8xf32>
    %98 = vector.shape_cast %95 : vector<8x8xf32> to vector<1x8x8xf32>
    tpu.vector_store %arg7[%c4_85, %c1_86, %c0_87], %98 {strides = array<i32>} : memref<10x10x128xf32, #tpu.memory_space<vmem>>, vector<1x8x8xf32>,
    %99 = vector.extract_strided_slice %82 {offsets = [32, 0], sizes = [8, 8], strides = [1, 1]} : vector<64x8xf32> to vector<8x8xf32>
    %c5_88 = arith.constant 5 : index
    %c1_89 = arith.constant 1 : index
    %c0_90 = arith.constant 0 : index
    %100 = vector.load %arg7[%c5_88, %c1_89, %c0_90] : memref<10x10x128xf32, #tpu.memory_space<vmem>>, vector<1x8x8xf32>
    %101 = vector.shape_cast %100 : vector<1x8x8xf32> to vector<8x8xf32>
    %102 = vector.shape_cast %99 : vector<8x8xf32> to vector<1x8x8xf32>
    tpu.vector_store %arg7[%c5_88, %c1_89, %c0_90], %102 {strides = array<i32>} : memref<10x10x128xf32, #tpu.memory_space<vmem>>, vector<1x8x8xf32>,
    %103 = vector.extract_strided_slice %82 {offsets = [40, 0], sizes = [8, 8], strides = [1, 1]} : vector<64x8xf32> to vector<8x8xf32>
    %c6_91 = arith.constant 6 : index
    %c1_92 = arith.constant 1 : index
    %c0_93 = arith.constant 0 : index
    %104 = vector.load %arg7[%c6_91, %c1_92, %c0_93] : memref<10x10x128xf32, #tpu.memory_space<vmem>>, vector<1x8x8xf32>
    %105 = vector.shape_cast %104 : vector<1x8x8xf32> to vector<8x8xf32>
    %106 = vector.shape_cast %103 : vector<8x8xf32> to vector<1x8x8xf32>
    tpu.vector_store %arg7[%c6_91, %c1_92, %c0_93], %106 {strides = array<i32>} : memref<10x10x128xf32, #tpu.memory_space<vmem>>, vector<1x8x8xf32>,
    %107 = vector.extract_strided_slice %82 {offsets = [48, 0], sizes = [8, 8], strides = [1, 1]} : vector<64x8xf32> to vector<8x8xf32>
    %c7_94 = arith.constant 7 : index
    %c1_95 = arith.constant 1 : index
    %c0_96 = arith.constant 0 : index
    %108 = vector.load %arg7[%c7_94, %c1_95, %c0_96] : memref<10x10x128xf32, #tpu.memory_space<vmem>>, vector<1x8x8xf32>
    %109 = vector.shape_cast %108 : vector<1x8x8xf32> to vector<8x8xf32>
    %110 = vector.shape_cast %107 : vector<8x8xf32> to vector<1x8x8xf32>
    tpu.vector_store %arg7[%c7_94, %c1_95, %c0_96], %110 {strides = array<i32>} : memref<10x10x128xf32, #tpu.memory_space<vmem>>, vector<1x8x8xf32>,
    %111 = vector.extract_strided_slice %82 {offsets = [56, 0], sizes = [8, 8], strides = [1, 1]} : vector<64x8xf32> to vector<8x8xf32>
    %c8_97 = arith.constant 8 : index
    %c1_98 = arith.constant 1 : index
    %c0_99 = arith.constant 0 : index
    %112 = vector.load %arg7[%c8_97, %c1_98, %c0_99] : memref<10x10x128xf32, #tpu.memory_space<vmem>>, vector<1x8x8xf32>
    %113 = vector.shape_cast %112 : vector<1x8x8xf32> to vector<8x8xf32>
    %114 = vector.shape_cast %111 : vector<8x8xf32> to vector<1x8x8xf32>
    tpu.vector_store %arg7[%c8_97, %c1_98, %c0_99], %114 {strides = array<i32>} : memref<10x10x128xf32, #tpu.memory_space<vmem>>, vector<1x8x8xf32>,
    %c0_100 = arith.constant 0 : index
    %c0_101 = arith.constant 0 : index
    %c0_102 = arith.constant 0 : index
    %115 = vector.load %arg7[%c0_100, %c0_101, %c0_102] : memref<10x10x128xf32, #tpu.memory_space<vmem>>, vector<8x8x128xf32>
    %116 = vector.shape_cast %115 : vector<8x8x128xf32> to vector<64x128xf32>
    %117 = arith.truncf %116 : vector<64x128xf32> to vector<64x128xbf16>
    %c0_103 = arith.constant 0 : index
    %c0_104 = arith.constant 0 : index
    %c8_105 = arith.constant 8 : index
    %118 = vector.load %arg2[%c0_103, %c0_104, %c8_105] : memref<9x128x48xbf16, #tpu.memory_space<vmem>>, vector<1x128x8xbf16>
    %119 = vector.shape_cast %118 : vector<1x128x8xbf16> to vector<128x8xbf16>
    %cst_106 = arith.constant dense<0.000000e+00> : vector<64x8xf32>
    %120 = tpu.matmul %117, %119, %cst_106 {dimension_numbers = #tpu.dot_dimension_numbers<[1], [0], [0], [1], [0, 0, 1, 1], [], []>} : vector<64x128xbf16>, vector<128x8xbf16>, vector<64x8xf32> -> vector<64x8xf32>
    %c0_107 = arith.constant 0 : index
    %c1_108 = arith.constant 1 : index
    %c0_109 = arith.constant 0 : index
    %121 = vector.load %arg7[%c0_107, %c1_108, %c0_109] : memref<10x10x128xf32, #tpu.memory_space<vmem>>, vector<8x8x128xf32>
    %122 = vector.shape_cast %121 : vector<8x8x128xf32> to vector<64x128xf32>
    %123 = arith.truncf %122 : vector<64x128xf32> to vector<64x128xbf16>
    %c1_110 = arith.constant 1 : index
    %c0_111 = arith.constant 0 : index
    %c8_112 = arith.constant 8 : index
    %124 = vector.load %arg2[%c1_110, %c0_111, %c8_112] : memref<9x128x48xbf16, #tpu.memory_space<vmem>>, vector<1x128x8xbf16>
    %125 = vector.shape_cast %124 : vector<1x128x8xbf16> to vector<128x8xbf16>
    %cst_113 = arith.constant dense<0.000000e+00> : vector<64x8xf32>
    %126 = tpu.matmul %123, %125, %cst_113 {dimension_numbers = #tpu.dot_dimension_numbers<[1], [0], [0], [1], [0, 0, 1, 1], [], []>} : vector<64x128xbf16>, vector<128x8xbf16>, vector<64x8xf32> -> vector<64x8xf32>
    %127 = arith.addf %120, %126 : vector<64x8xf32>
    %c0_114 = arith.constant 0 : index
    %c2_115 = arith.constant 2 : index
    %c0_116 = arith.constant 0 : index
    %128 = vector.load %arg7[%c0_114, %c2_115, %c0_116] : memref<10x10x128xf32, #tpu.memory_space<vmem>>, vector<8x8x128xf32>
    %129 = vector.shape_cast %128 : vector<8x8x128xf32> to vector<64x128xf32>
    %130 = arith.truncf %129 : vector<64x128xf32> to vector<64x128xbf16>
    %c2_117 = arith.constant 2 : index
    %c0_118 = arith.constant 0 : index
    %c8_119 = arith.constant 8 : index
    %131 = vector.load %arg2[%c2_117, %c0_118, %c8_119] : memref<9x128x48xbf16, #tpu.memory_space<vmem>>, vector<1x128x8xbf16>
    %132 = vector.shape_cast %131 : vector<1x128x8xbf16> to vector<128x8xbf16>
    %cst_120 = arith.constant dense<0.000000e+00> : vector<64x8xf32>
    %133 = tpu.matmul %130, %132, %cst_120 {dimension_numbers = #tpu.dot_dimension_numbers<[1], [0], [0], [1], [0, 0, 1, 1], [], []>} : vector<64x128xbf16>, vector<128x8xbf16>, vector<64x8xf32> -> vector<64x8xf32>
    %134 = arith.addf %127, %133 : vector<64x8xf32>
    %c1_121 = arith.constant 1 : index
    %c0_122 = arith.constant 0 : index
    %c0_123 = arith.constant 0 : index
    %135 = vector.load %arg7[%c1_121, %c0_122, %c0_123] : memref<10x10x128xf32, #tpu.memory_space<vmem>>, vector<8x8x128xf32>
    %136 = vector.shape_cast %135 : vector<8x8x128xf32> to vector<64x128xf32>
    %137 = arith.truncf %136 : vector<64x128xf32> to vector<64x128xbf16>
    %c3_124 = arith.constant 3 : index
    %c0_125 = arith.constant 0 : index
    %c8_126 = arith.constant 8 : index
    %138 = vector.load %arg2[%c3_124, %c0_125, %c8_126] : memref<9x128x48xbf16, #tpu.memory_space<vmem>>, vector<1x128x8xbf16>
    %139 = vector.shape_cast %138 : vector<1x128x8xbf16> to vector<128x8xbf16>
    %cst_127 = arith.constant dense<0.000000e+00> : vector<64x8xf32>
    %140 = tpu.matmul %137, %139, %cst_127 {dimension_numbers = #tpu.dot_dimension_numbers<[1], [0], [0], [1], [0, 0, 1, 1], [], []>} : vector<64x128xbf16>, vector<128x8xbf16>, vector<64x8xf32> -> vector<64x8xf32>
    %141 = arith.addf %134, %140 : vector<64x8xf32>
    %c1_128 = arith.constant 1 : index
    %c1_129 = arith.constant 1 : index
    %c0_130 = arith.constant 0 : index
    %142 = vector.load %arg7[%c1_128, %c1_129, %c0_130] : memref<10x10x128xf32, #tpu.memory_space<vmem>>, vector<8x8x128xf32>
    %143 = vector.shape_cast %142 : vector<8x8x128xf32> to vector<64x128xf32>
    %144 = arith.truncf %143 : vector<64x128xf32> to vector<64x128xbf16>
    %c4_131 = arith.constant 4 : index
    %c0_132 = arith.constant 0 : index
    %c8_133 = arith.constant 8 : index
    %145 = vector.load %arg2[%c4_131, %c0_132, %c8_133] : memref<9x128x48xbf16, #tpu.memory_space<vmem>>, vector<1x128x8xbf16>
    %146 = vector.shape_cast %145 : vector<1x128x8xbf16> to vector<128x8xbf16>
    %cst_134 = arith.constant dense<0.000000e+00> : vector<64x8xf32>
    %147 = tpu.matmul %144, %146, %cst_134 {dimension_numbers = #tpu.dot_dimension_numbers<[1], [0], [0], [1], [0, 0, 1, 1], [], []>} : vector<64x128xbf16>, vector<128x8xbf16>, vector<64x8xf32> -> vector<64x8xf32>
    %148 = arith.addf %141, %147 : vector<64x8xf32>
    %c1_135 = arith.constant 1 : index
    %c2_136 = arith.constant 2 : index
    %c0_137 = arith.constant 0 : index
    %149 = vector.load %arg7[%c1_135, %c2_136, %c0_137] : memref<10x10x128xf32, #tpu.memory_space<vmem>>, vector<8x8x128xf32>
    %150 = vector.shape_cast %149 : vector<8x8x128xf32> to vector<64x128xf32>
    %151 = arith.truncf %150 : vector<64x128xf32> to vector<64x128xbf16>
    %c5_138 = arith.constant 5 : index
    %c0_139 = arith.constant 0 : index
    %c8_140 = arith.constant 8 : index
    %152 = vector.load %arg2[%c5_138, %c0_139, %c8_140] : memref<9x128x48xbf16, #tpu.memory_space<vmem>>, vector<1x128x8xbf16>
    %153 = vector.shape_cast %152 : vector<1x128x8xbf16> to vector<128x8xbf16>
    %cst_141 = arith.constant dense<0.000000e+00> : vector<64x8xf32>
    %154 = tpu.matmul %151, %153, %cst_141 {dimension_numbers = #tpu.dot_dimension_numbers<[1], [0], [0], [1], [0, 0, 1, 1], [], []>} : vector<64x128xbf16>, vector<128x8xbf16>, vector<64x8xf32> -> vector<64x8xf32>
    %155 = arith.addf %148, %154 : vector<64x8xf32>
    %c2_142 = arith.constant 2 : index
    %c0_143 = arith.constant 0 : index
    %c0_144 = arith.constant 0 : index
    %156 = vector.load %arg7[%c2_142, %c0_143, %c0_144] : memref<10x10x128xf32, #tpu.memory_space<vmem>>, vector<8x8x128xf32>
    %157 = vector.shape_cast %156 : vector<8x8x128xf32> to vector<64x128xf32>
    %158 = arith.truncf %157 : vector<64x128xf32> to vector<64x128xbf16>
    %c6_145 = arith.constant 6 : index
    %c0_146 = arith.constant 0 : index
    %c8_147 = arith.constant 8 : index
    %159 = vector.load %arg2[%c6_145, %c0_146, %c8_147] : memref<9x128x48xbf16, #tpu.memory_space<vmem>>, vector<1x128x8xbf16>
    %160 = vector.shape_cast %159 : vector<1x128x8xbf16> to vector<128x8xbf16>
    %cst_148 = arith.constant dense<0.000000e+00> : vector<64x8xf32>
    %161 = tpu.matmul %158, %160, %cst_148 {dimension_numbers = #tpu.dot_dimension_numbers<[1], [0], [0], [1], [0, 0, 1, 1], [], []>} : vector<64x128xbf16>, vector<128x8xbf16>, vector<64x8xf32> -> vector<64x8xf32>
    %162 = arith.addf %155, %161 : vector<64x8xf32>
    %c2_149 = arith.constant 2 : index
    %c1_150 = arith.constant 1 : index
    %c0_151 = arith.constant 0 : index
    %163 = vector.load %arg7[%c2_149, %c1_150, %c0_151] : memref<10x10x128xf32, #tpu.memory_space<vmem>>, vector<8x8x128xf32>
    %164 = vector.shape_cast %163 : vector<8x8x128xf32> to vector<64x128xf32>
    %165 = arith.truncf %164 : vector<64x128xf32> to vector<64x128xbf16>
    %c7_152 = arith.constant 7 : index
    %c0_153 = arith.constant 0 : index
    %c8_154 = arith.constant 8 : index
    %166 = vector.load %arg2[%c7_152, %c0_153, %c8_154] : memref<9x128x48xbf16, #tpu.memory_space<vmem>>, vector<1x128x8xbf16>
    %167 = vector.shape_cast %166 : vector<1x128x8xbf16> to vector<128x8xbf16>
    %cst_155 = arith.constant dense<0.000000e+00> : vector<64x8xf32>
    %168 = tpu.matmul %165, %167, %cst_155 {dimension_numbers = #tpu.dot_dimension_numbers<[1], [0], [0], [1], [0, 0, 1, 1], [], []>} : vector<64x128xbf16>, vector<128x8xbf16>, vector<64x8xf32> -> vector<64x8xf32>
    %169 = arith.addf %162, %168 : vector<64x8xf32>
    %c2_156 = arith.constant 2 : index
    %c2_157 = arith.constant 2 : index
    %c0_158 = arith.constant 0 : index
    %170 = vector.load %arg7[%c2_156, %c2_157, %c0_158] : memref<10x10x128xf32, #tpu.memory_space<vmem>>, vector<8x8x128xf32>
    %171 = vector.shape_cast %170 : vector<8x8x128xf32> to vector<64x128xf32>
    %172 = arith.truncf %171 : vector<64x128xf32> to vector<64x128xbf16>
    %c8_159 = arith.constant 8 : index
    %c0_160 = arith.constant 0 : index
    %c8_161 = arith.constant 8 : index
    %173 = vector.load %arg2[%c8_159, %c0_160, %c8_161] : memref<9x128x48xbf16, #tpu.memory_space<vmem>>, vector<1x128x8xbf16>
    %174 = vector.shape_cast %173 : vector<1x128x8xbf16> to vector<128x8xbf16>
    %cst_162 = arith.constant dense<0.000000e+00> : vector<64x8xf32>
    %175 = tpu.matmul %172, %174, %cst_162 {dimension_numbers = #tpu.dot_dimension_numbers<[1], [0], [0], [1], [0, 0, 1, 1], [], []>} : vector<64x128xbf16>, vector<128x8xbf16>, vector<64x8xf32> -> vector<64x8xf32>
    %176 = arith.addf %169, %175 : vector<64x8xf32>
    %c1_163 = arith.constant 1 : index
    %c0_164 = arith.constant 0 : index
    %177 = vector.load %arg5[%c1_163, %c0_164] : memref<8x48xf32, #tpu.memory_space<vmem>>, vector<1x8xf32>
    %178 = vector.broadcast %177 : vector<1x8xf32> to vector<64x8xf32>
    %179 = arith.addf %176, %178 : vector<64x8xf32>
    %cst_165 = arith.constant 0.000000e+00 : f32
    %180 = vector.broadcast %cst_165 : f32 to vector<64x8xf32>
    %181 = arith.maximumf %179, %180 : vector<64x8xf32>
    %c64 = arith.constant 64 : index
    %c0_166 = arith.constant 0 : index
    %182 = vector.load %arg3[%c64, %c0_166] : memref<84x256xbf16, #tpu.memory_space<vmem>>, vector<16x64xbf16>
    %183 = arith.truncf %181 : vector<64x8xf32> to vector<64x8xbf16>
    %cst_167 = arith.constant dense<0.000000e+00> : vector<16x8xf32>
    %184 = tpu.matmul %182, %183, %cst_167 {dimension_numbers = #tpu.dot_dimension_numbers<[1], [0], [0], [1], [0, 0, 1, 1], [], []>} : vector<16x64xbf16>, vector<64x8xbf16>, vector<16x8xf32> -> vector<16x8xf32>
    %185 = vector.extract_strided_slice %184 {offsets = [0, 0], sizes = [4, 8], strides = [1, 1]} : vector<16x8xf32> to vector<4x8xf32>
    %c1_168 = arith.constant 1 : index
    %c1_169 = arith.constant 1 : index
    %c0_170 = arith.constant 0 : index
    %186 = vector.load %arg8[%c1_168, %c1_169, %c0_170] : memref<6x6x128xf32, #tpu.memory_space<vmem>>, vector<1x4x8xf32>
    %187 = vector.shape_cast %186 : vector<1x4x8xf32> to vector<4x8xf32>
    %188 = vector.shape_cast %185 : vector<4x8xf32> to vector<1x4x8xf32>
    tpu.vector_store %arg8[%c1_168, %c1_169, %c0_170], %188 {strides = array<i32>} : memref<6x6x128xf32, #tpu.memory_space<vmem>>, vector<1x4x8xf32>,
    %189 = vector.extract_strided_slice %184 {offsets = [4, 0], sizes = [4, 8], strides = [1, 1]} : vector<16x8xf32> to vector<4x8xf32>
    %c2_171 = arith.constant 2 : index
    %c1_172 = arith.constant 1 : index
    %c0_173 = arith.constant 0 : index
    %190 = vector.load %arg8[%c2_171, %c1_172, %c0_173] : memref<6x6x128xf32, #tpu.memory_space<vmem>>, vector<1x4x8xf32>
    %191 = vector.shape_cast %190 : vector<1x4x8xf32> to vector<4x8xf32>
    %192 = vector.shape_cast %189 : vector<4x8xf32> to vector<1x4x8xf32>
    tpu.vector_store %arg8[%c2_171, %c1_172, %c0_173], %192 {strides = array<i32>} : memref<6x6x128xf32, #tpu.memory_space<vmem>>, vector<1x4x8xf32>,
    %193 = vector.extract_strided_slice %184 {offsets = [8, 0], sizes = [4, 8], strides = [1, 1]} : vector<16x8xf32> to vector<4x8xf32>
    %c3_174 = arith.constant 3 : index
    %c1_175 = arith.constant 1 : index
    %c0_176 = arith.constant 0 : index
    %194 = vector.load %arg8[%c3_174, %c1_175, %c0_176] : memref<6x6x128xf32, #tpu.memory_space<vmem>>, vector<1x4x8xf32>
    %195 = vector.shape_cast %194 : vector<1x4x8xf32> to vector<4x8xf32>
    %196 = vector.shape_cast %193 : vector<4x8xf32> to vector<1x4x8xf32>
    tpu.vector_store %arg8[%c3_174, %c1_175, %c0_176], %196 {strides = array<i32>} : memref<6x6x128xf32, #tpu.memory_space<vmem>>, vector<1x4x8xf32>,
    %197 = vector.extract_strided_slice %184 {offsets = [12, 0], sizes = [4, 8], strides = [1, 1]} : vector<16x8xf32> to vector<4x8xf32>
    %c4_177 = arith.constant 4 : index
    %c1_178 = arith.constant 1 : index
    %c0_179 = arith.constant 0 : index
    %198 = vector.load %arg8[%c4_177, %c1_178, %c0_179] : memref<6x6x128xf32, #tpu.memory_space<vmem>>, vector<1x4x8xf32>
    %199 = vector.shape_cast %198 : vector<1x4x8xf32> to vector<4x8xf32>
    %200 = vector.shape_cast %197 : vector<4x8xf32> to vector<1x4x8xf32>
    tpu.vector_store %arg8[%c4_177, %c1_178, %c0_179], %200 {strides = array<i32>} : memref<6x6x128xf32, #tpu.memory_space<vmem>>, vector<1x4x8xf32>,
    %c0_180 = arith.constant 0 : index
    %c0_181 = arith.constant 0 : index
    %c0_182 = arith.constant 0 : index
    %201 = vector.load %arg8[%c0_180, %c0_181, %c0_182] : memref<6x6x128xf32, #tpu.memory_space<vmem>>, vector<4x4x128xf32>
    %202 = vector.shape_cast %201 : vector<4x4x128xf32> to vector<16x128xf32>
    %203 = arith.truncf %202 : vector<16x128xf32> to vector<16x128xbf16>
    %c0_183 = arith.constant 0 : index
    %c0_184 = arith.constant 0 : index
    %c16 = arith.constant 16 : index
    %204 = vector.load %arg2[%c0_183, %c0_184, %c16] : memref<9x128x48xbf16, #tpu.memory_space<vmem>>, vector<1x128x32xbf16>
    %205 = vector.shape_cast %204 : vector<1x128x32xbf16> to vector<128x32xbf16>
    %cst_185 = arith.constant dense<0.000000e+00> : vector<16x32xf32>
    %206 = tpu.matmul %203, %205, %cst_185 {dimension_numbers = #tpu.dot_dimension_numbers<[1], [0], [0], [1], [0, 0, 1, 1], [], []>} : vector<16x128xbf16>, vector<128x32xbf16>, vector<16x32xf32> -> vector<16x32xf32>
    %c0_186 = arith.constant 0 : index
    %c1_187 = arith.constant 1 : index
    %c0_188 = arith.constant 0 : index
    %207 = vector.load %arg8[%c0_186, %c1_187, %c0_188] : memref<6x6x128xf32, #tpu.memory_space<vmem>>, vector<4x4x128xf32>
    %208 = vector.shape_cast %207 : vector<4x4x128xf32> to vector<16x128xf32>
    %209 = arith.truncf %208 : vector<16x128xf32> to vector<16x128xbf16>
    %c1_189 = arith.constant 1 : index
    %c0_190 = arith.constant 0 : index
    %c16_191 = arith.constant 16 : index
    %210 = vector.load %arg2[%c1_189, %c0_190, %c16_191] : memref<9x128x48xbf16, #tpu.memory_space<vmem>>, vector<1x128x32xbf16>
    %211 = vector.shape_cast %210 : vector<1x128x32xbf16> to vector<128x32xbf16>
    %cst_192 = arith.constant dense<0.000000e+00> : vector<16x32xf32>
    %212 = tpu.matmul %209, %211, %cst_192 {dimension_numbers = #tpu.dot_dimension_numbers<[1], [0], [0], [1], [0, 0, 1, 1], [], []>} : vector<16x128xbf16>, vector<128x32xbf16>, vector<16x32xf32> -> vector<16x32xf32>
    %213 = arith.addf %206, %212 : vector<16x32xf32>
    %c0_193 = arith.constant 0 : index
    %c2_194 = arith.constant 2 : index
    %c0_195 = arith.constant 0 : index
    %214 = vector.load %arg8[%c0_193, %c2_194, %c0_195] : memref<6x6x128xf32, #tpu.memory_space<vmem>>, vector<4x4x128xf32>
    %215 = vector.shape_cast %214 : vector<4x4x128xf32> to vector<16x128xf32>
    %216 = arith.truncf %215 : vector<16x128xf32> to vector<16x128xbf16>
    %c2_196 = arith.constant 2 : index
    %c0_197 = arith.constant 0 : index
    %c16_198 = arith.constant 16 : index
    %217 = vector.load %arg2[%c2_196, %c0_197, %c16_198] : memref<9x128x48xbf16, #tpu.memory_space<vmem>>, vector<1x128x32xbf16>
    %218 = vector.shape_cast %217 : vector<1x128x32xbf16> to vector<128x32xbf16>
    %cst_199 = arith.constant dense<0.000000e+00> : vector<16x32xf32>
    %219 = tpu.matmul %216, %218, %cst_199 {dimension_numbers = #tpu.dot_dimension_numbers<[1], [0], [0], [1], [0, 0, 1, 1], [], []>} : vector<16x128xbf16>, vector<128x32xbf16>, vector<16x32xf32> -> vector<16x32xf32>
    %220 = arith.addf %213, %219 : vector<16x32xf32>
    %c1_200 = arith.constant 1 : index
    %c0_201 = arith.constant 0 : index
    %c0_202 = arith.constant 0 : index
    %221 = vector.load %arg8[%c1_200, %c0_201, %c0_202] : memref<6x6x128xf32, #tpu.memory_space<vmem>>, vector<4x4x128xf32>
    %222 = vector.shape_cast %221 : vector<4x4x128xf32> to vector<16x128xf32>
    %223 = arith.truncf %222 : vector<16x128xf32> to vector<16x128xbf16>
    %c3_203 = arith.constant 3 : index
    %c0_204 = arith.constant 0 : index
    %c16_205 = arith.constant 16 : index
    %224 = vector.load %arg2[%c3_203, %c0_204, %c16_205] : memref<9x128x48xbf16, #tpu.memory_space<vmem>>, vector<1x128x32xbf16>
    %225 = vector.shape_cast %224 : vector<1x128x32xbf16> to vector<128x32xbf16>
    %cst_206 = arith.constant dense<0.000000e+00> : vector<16x32xf32>
    %226 = tpu.matmul %223, %225, %cst_206 {dimension_numbers = #tpu.dot_dimension_numbers<[1], [0], [0], [1], [0, 0, 1, 1], [], []>} : vector<16x128xbf16>, vector<128x32xbf16>, vector<16x32xf32> -> vector<16x32xf32>
    %227 = arith.addf %220, %226 : vector<16x32xf32>
    %c1_207 = arith.constant 1 : index
    %c1_208 = arith.constant 1 : index
    %c0_209 = arith.constant 0 : index
    %228 = vector.load %arg8[%c1_207, %c1_208, %c0_209] : memref<6x6x128xf32, #tpu.memory_space<vmem>>, vector<4x4x128xf32>
    %229 = vector.shape_cast %228 : vector<4x4x128xf32> to vector<16x128xf32>
    %230 = arith.truncf %229 : vector<16x128xf32> to vector<16x128xbf16>
    %c4_210 = arith.constant 4 : index
    %c0_211 = arith.constant 0 : index
    %c16_212 = arith.constant 16 : index
    %231 = vector.load %arg2[%c4_210, %c0_211, %c16_212] : memref<9x128x48xbf16, #tpu.memory_space<vmem>>, vector<1x128x32xbf16>
    %232 = vector.shape_cast %231 : vector<1x128x32xbf16> to vector<128x32xbf16>
    %cst_213 = arith.constant dense<0.000000e+00> : vector<16x32xf32>
    %233 = tpu.matmul %230, %232, %cst_213 {dimension_numbers = #tpu.dot_dimension_numbers<[1], [0], [0], [1], [0, 0, 1, 1], [], []>} : vector<16x128xbf16>, vector<128x32xbf16>, vector<16x32xf32> -> vector<16x32xf32>
    %234 = arith.addf %227, %233 : vector<16x32xf32>
    %c1_214 = arith.constant 1 : index
    %c2_215 = arith.constant 2 : index
    %c0_216 = arith.constant 0 : index
    %235 = vector.load %arg8[%c1_214, %c2_215, %c0_216] : memref<6x6x128xf32, #tpu.memory_space<vmem>>, vector<4x4x128xf32>
    %236 = vector.shape_cast %235 : vector<4x4x128xf32> to vector<16x128xf32>
    %237 = arith.truncf %236 : vector<16x128xf32> to vector<16x128xbf16>
    %c5_217 = arith.constant 5 : index
    %c0_218 = arith.constant 0 : index
    %c16_219 = arith.constant 16 : index
    %238 = vector.load %arg2[%c5_217, %c0_218, %c16_219] : memref<9x128x48xbf16, #tpu.memory_space<vmem>>, vector<1x128x32xbf16>
    %239 = vector.shape_cast %238 : vector<1x128x32xbf16> to vector<128x32xbf16>
    %cst_220 = arith.constant dense<0.000000e+00> : vector<16x32xf32>
    %240 = tpu.matmul %237, %239, %cst_220 {dimension_numbers = #tpu.dot_dimension_numbers<[1], [0], [0], [1], [0, 0, 1, 1], [], []>} : vector<16x128xbf16>, vector<128x32xbf16>, vector<16x32xf32> -> vector<16x32xf32>
    %241 = arith.addf %234, %240 : vector<16x32xf32>
    %c2_221 = arith.constant 2 : index
    %c0_222 = arith.constant 0 : index
    %c0_223 = arith.constant 0 : index
    %242 = vector.load %arg8[%c2_221, %c0_222, %c0_223] : memref<6x6x128xf32, #tpu.memory_space<vmem>>, vector<4x4x128xf32>
    %243 = vector.shape_cast %242 : vector<4x4x128xf32> to vector<16x128xf32>
    %244 = arith.truncf %243 : vector<16x128xf32> to vector<16x128xbf16>
    %c6_224 = arith.constant 6 : index
    %c0_225 = arith.constant 0 : index
    %c16_226 = arith.constant 16 : index
    %245 = vector.load %arg2[%c6_224, %c0_225, %c16_226] : memref<9x128x48xbf16, #tpu.memory_space<vmem>>, vector<1x128x32xbf16>
    %246 = vector.shape_cast %245 : vector<1x128x32xbf16> to vector<128x32xbf16>
    %cst_227 = arith.constant dense<0.000000e+00> : vector<16x32xf32>
    %247 = tpu.matmul %244, %246, %cst_227 {dimension_numbers = #tpu.dot_dimension_numbers<[1], [0], [0], [1], [0, 0, 1, 1], [], []>} : vector<16x128xbf16>, vector<128x32xbf16>, vector<16x32xf32> -> vector<16x32xf32>
    %248 = arith.addf %241, %247 : vector<16x32xf32>
    %c2_228 = arith.constant 2 : index
    %c1_229 = arith.constant 1 : index
    %c0_230 = arith.constant 0 : index
    %249 = vector.load %arg8[%c2_228, %c1_229, %c0_230] : memref<6x6x128xf32, #tpu.memory_space<vmem>>, vector<4x4x128xf32>
    %250 = vector.shape_cast %249 : vector<4x4x128xf32> to vector<16x128xf32>
    %251 = arith.truncf %250 : vector<16x128xf32> to vector<16x128xbf16>
    %c7_231 = arith.constant 7 : index
    %c0_232 = arith.constant 0 : index
    %c16_233 = arith.constant 16 : index
    %252 = vector.load %arg2[%c7_231, %c0_232, %c16_233] : memref<9x128x48xbf16, #tpu.memory_space<vmem>>, vector<1x128x32xbf16>
    %253 = vector.shape_cast %252 : vector<1x128x32xbf16> to vector<128x32xbf16>
    %cst_234 = arith.constant dense<0.000000e+00> : vector<16x32xf32>
    %254 = tpu.matmul %251, %253, %cst_234 {dimension_numbers = #tpu.dot_dimension_numbers<[1], [0], [0], [1], [0, 0, 1, 1], [], []>} : vector<16x128xbf16>, vector<128x32xbf16>, vector<16x32xf32> -> vector<16x32xf32>
    %255 = arith.addf %248, %254 : vector<16x32xf32>
    %c2_235 = arith.constant 2 : index
    %c2_236 = arith.constant 2 : index
    %c0_237 = arith.constant 0 : index
    %256 = vector.load %arg8[%c2_235, %c2_236, %c0_237] : memref<6x6x128xf32, #tpu.memory_space<vmem>>, vector<4x4x128xf32>
    %257 = vector.shape_cast %256 : vector<4x4x128xf32> to vector<16x128xf32>
    %258 = arith.truncf %257 : vector<16x128xf32> to vector<16x128xbf16>
    %c8_238 = arith.constant 8 : index
    %c0_239 = arith.constant 0 : index
    %c16_240 = arith.constant 16 : index
    %259 = vector.load %arg2[%c8_238, %c0_239, %c16_240] : memref<9x128x48xbf16, #tpu.memory_space<vmem>>, vector<1x128x32xbf16>
    %260 = vector.shape_cast %259 : vector<1x128x32xbf16> to vector<128x32xbf16>
    %cst_241 = arith.constant dense<0.000000e+00> : vector<16x32xf32>
    %261 = tpu.matmul %258, %260, %cst_241 {dimension_numbers = #tpu.dot_dimension_numbers<[1], [0], [0], [1], [0, 0, 1, 1], [], []>} : vector<16x128xbf16>, vector<128x32xbf16>, vector<16x32xf32> -> vector<16x32xf32>
    %262 = arith.addf %255, %261 : vector<16x32xf32>
    %c2_242 = arith.constant 2 : index
    %c0_243 = arith.constant 0 : index
    %263 = vector.load %arg5[%c2_242, %c0_243] : memref<8x48xf32, #tpu.memory_space<vmem>>, vector<1x32xf32>
    %264 = vector.broadcast %263 : vector<1x32xf32> to vector<16x32xf32>
    %265 = arith.addf %262, %264 : vector<16x32xf32>
    %cst_244 = arith.constant 0.000000e+00 : f32
    %266 = vector.broadcast %cst_244 : f32 to vector<16x32xf32>
    %267 = arith.maximumf %265, %266 : vector<16x32xf32>
    %c80 = arith.constant 80 : index
    %c0_245 = arith.constant 0 : index
    %268 = vector.load %arg3[%c80, %c0_245] : memref<84x256xbf16, #tpu.memory_space<vmem>>, vector<4x16xbf16>
    %269 = arith.truncf %267 : vector<16x32xf32> to vector<16x32xbf16>
    %cst_246 = arith.constant dense<0.000000e+00> : vector<4x32xf32>
    %270 = tpu.matmul %268, %269, %cst_246 {dimension_numbers = #tpu.dot_dimension_numbers<[1], [0], [0], [1], [0, 0, 1, 1], [], []>} : vector<4x16xbf16>, vector<16x32xbf16>, vector<4x32xf32> -> vector<4x32xf32>
    %271 = vector.extract_strided_slice %270 {offsets = [0, 0], sizes = [4, 16], strides = [1, 1]} : vector<4x32xf32> to vector<4x16xf32>
    %272 = vector.extract_strided_slice %270 {offsets = [0, 16], sizes = [4, 16], strides = [1, 1]} : vector<4x32xf32> to vector<4x16xf32>
    %cst_247 = arith.constant dense<0.000000e+00> : vector<16xf32>
    %273 = vector.multi_reduction <add>, %272, %cst_247 [0] : vector<4x16xf32> to vector<16xf32>
    %274 = vector.shape_cast %273 : vector<16xf32> to vector<1x16xf32>
    %cst_248 = arith.constant 4.000000e+00 : f32
    %275 = vector.broadcast %cst_248 : f32 to vector<1x16xf32>
    %276 = arith.divf %274, %275 : vector<1x16xf32>
    %c0_249 = arith.constant 0 : index
    %c0_250 = arith.constant 0 : index
    %277 = vector.load %arg4[%c0_249, %c0_250] : memref<100x48xbf16, #tpu.memory_space<vmem>>, vector<16x48xbf16>
    %c16_251 = arith.constant 16 : index
    %c0_252 = arith.constant 0 : index
    %278 = vector.load %arg4[%c16_251, %c0_252] : memref<100x48xbf16, #tpu.memory_space<vmem>>, vector<16x48xbf16>
    %c32 = arith.constant 32 : index
    %c0_253 = arith.constant 0 : index
    %279 = vector.load %arg4[%c32, %c0_253] : memref<100x48xbf16, #tpu.memory_space<vmem>>, vector<16x10xbf16>
    %280 = arith.truncf %271 : vector<4x16xf32> to vector<4x16xbf16>
    %cst_254 = arith.constant dense<0.000000e+00> : vector<4x48xf32>
    %281 = tpu.matmul %280, %277, %cst_254 {dimension_numbers = #tpu.dot_dimension_numbers<[1], [0], [0], [1], [0, 0, 1, 1], [], []>} : vector<4x16xbf16>, vector<16x48xbf16>, vector<4x48xf32> -> vector<4x48xf32>
    %c3_255 = arith.constant 3 : index
    %c0_256 = arith.constant 0 : index
    %282 = vector.load %arg5[%c3_255, %c0_256] : memref<8x48xf32, #tpu.memory_space<vmem>>, vector<1x48xf32>
    %283 = vector.broadcast %282 : vector<1x48xf32> to vector<4x48xf32>
    %284 = arith.addf %281, %283 : vector<4x48xf32>
    %c4_257 = arith.constant 4 : index
    %c0_258 = arith.constant 0 : index
    %285 = vector.load %arg5[%c4_257, %c0_258] : memref<8x48xf32, #tpu.memory_space<vmem>>, vector<1x48xf32>
    %c5_259 = arith.constant 5 : index
    %c0_260 = arith.constant 0 : index
    %286 = vector.load %arg5[%c5_259, %c0_260] : memref<8x48xf32, #tpu.memory_space<vmem>>, vector<1x10xf32>
    %cst_261 = arith.constant 0.000000e+00 : f32
    %287 = vector.broadcast %cst_261 : f32 to vector<1x16xf32>
    %cst_262 = arith.constant 0.000000e+00 : f32
    %288 = vector.broadcast %cst_262 : f32 to vector<1x10xf32>
    %289 = arith.truncf %287 : vector<1x16xf32> to vector<1x16xbf16>
    %cst_263 = arith.constant dense<0.000000e+00> : vector<1x48xf32>
    %290 = tpu.matmul %289, %278, %cst_263 {dimension_numbers = #tpu.dot_dimension_numbers<[1], [0], [0], [1], [0, 0, 1, 1], [], []>} : vector<1x16xbf16>, vector<16x48xbf16>, vector<1x48xf32> -> vector<1x48xf32>
    %291 = arith.addf %290, %285 : vector<1x48xf32>
    %292 = vector.extract_strided_slice %284 {offsets = [0, 0], sizes = [1, 16], strides = [1, 1]} : vector<4x48xf32> to vector<1x16xf32>
    %293 = vector.extract_strided_slice %291 {offsets = [0, 0], sizes = [1, 16], strides = [1, 1]} : vector<1x48xf32> to vector<1x16xf32>
    %294 = arith.addf %292, %293 : vector<1x16xf32>
    %cst_264 = arith.constant 5.000000e-01 : f32
    %295 = vector.broadcast %cst_264 : f32 to vector<1x16xf32>
    %296 = arith.mulf %295, %294 : vector<1x16xf32>
    %297 = math.tanh %296 : vector<1x16xf32>
    %cst_265 = arith.constant 1.000000e+00 : f32
    %298 = vector.broadcast %cst_265 : f32 to vector<1x16xf32>
    %299 = arith.addf %297, %298 : vector<1x16xf32>
    %cst_266 = arith.constant 5.000000e-01 : f32
    %300 = vector.broadcast %cst_266 : f32 to vector<1x16xf32>
    %301 = arith.mulf %300, %299 : vector<1x16xf32>
    %302 = vector.extract_strided_slice %284 {offsets = [0, 16], sizes = [1, 16], strides = [1, 1]} : vector<4x48xf32> to vector<1x16xf32>
    %303 = vector.extract_strided_slice %291 {offsets = [0, 16], sizes = [1, 16], strides = [1, 1]} : vector<1x48xf32> to vector<1x16xf32>
    %304 = arith.addf %302, %303 : vector<1x16xf32>
    %cst_267 = arith.constant 5.000000e-01 : f32
    %305 = vector.broadcast %cst_267 : f32 to vector<1x16xf32>
    %306 = arith.mulf %305, %304 : vector<1x16xf32>
    %307 = math.tanh %306 : vector<1x16xf32>
    %cst_268 = arith.constant 1.000000e+00 : f32
    %308 = vector.broadcast %cst_268 : f32 to vector<1x16xf32>
    %309 = arith.addf %307, %308 : vector<1x16xf32>
    %cst_269 = arith.constant 5.000000e-01 : f32
    %310 = vector.broadcast %cst_269 : f32 to vector<1x16xf32>
    %311 = arith.mulf %310, %309 : vector<1x16xf32>
    %312 = vector.extract_strided_slice %284 {offsets = [0, 32], sizes = [1, 16], strides = [1, 1]} : vector<4x48xf32> to vector<1x16xf32>
    %313 = vector.extract_strided_slice %291 {offsets = [0, 32], sizes = [1, 16], strides = [1, 1]} : vector<1x48xf32> to vector<1x16xf32>
    %314 = arith.mulf %301, %313 : vector<1x16xf32>
    %315 = arith.addf %312, %314 : vector<1x16xf32>
    %316 = math.tanh %315 : vector<1x16xf32>
    %cst_270 = arith.constant 1.000000e+00 : f32
    %317 = vector.broadcast %cst_270 : f32 to vector<1x16xf32>
    %318 = arith.subf %317, %311 : vector<1x16xf32>
    %319 = arith.mulf %318, %316 : vector<1x16xf32>
    %320 = arith.mulf %311, %287 : vector<1x16xf32>
    %321 = arith.addf %319, %320 : vector<1x16xf32>
    %322 = arith.truncf %321 : vector<1x16xf32> to vector<1x16xbf16>
    %cst_271 = arith.constant dense<0.000000e+00> : vector<1x10xf32>
    %323 = tpu.matmul %322, %279, %cst_271 {dimension_numbers = #tpu.dot_dimension_numbers<[1], [0], [0], [1], [0, 0, 1, 1], [], []>} : vector<1x16xbf16>, vector<16x10xbf16>, vector<1x10xf32> -> vector<1x10xf32>
    %324 = arith.addf %323, %286 : vector<1x10xf32>
    %cst_272 = arith.constant 5.000000e-01 : f32
    %325 = vector.broadcast %cst_272 : f32 to vector<1x10xf32>
    %326 = arith.mulf %325, %324 : vector<1x10xf32>
    %327 = math.tanh %326 : vector<1x10xf32>
    %cst_273 = arith.constant 1.000000e+00 : f32
    %328 = vector.broadcast %cst_273 : f32 to vector<1x10xf32>
    %329 = arith.addf %327, %328 : vector<1x10xf32>
    %cst_274 = arith.constant 5.000000e-01 : f32
    %330 = vector.broadcast %cst_274 : f32 to vector<1x10xf32>
    %331 = arith.mulf %330, %329 : vector<1x10xf32>
    %332 = arith.addf %288, %331 : vector<1x10xf32>
    %333 = arith.truncf %321 : vector<1x16xf32> to vector<1x16xbf16>
    %cst_275 = arith.constant dense<0.000000e+00> : vector<1x48xf32>
    %334 = tpu.matmul %333, %278, %cst_275 {dimension_numbers = #tpu.dot_dimension_numbers<[1], [0], [0], [1], [0, 0, 1, 1], [], []>} : vector<1x16xbf16>, vector<16x48xbf16>, vector<1x48xf32> -> vector<1x48xf32>
    %335 = arith.addf %334, %285 : vector<1x48xf32>
    %336 = vector.extract_strided_slice %284 {offsets = [1, 0], sizes = [1, 16], strides = [1, 1]} : vector<4x48xf32> to vector<1x16xf32>
    %337 = vector.extract_strided_slice %335 {offsets = [0, 0], sizes = [1, 16], strides = [1, 1]} : vector<1x48xf32> to vector<1x16xf32>
    %338 = arith.addf %336, %337 : vector<1x16xf32>
    %cst_276 = arith.constant 5.000000e-01 : f32
    %339 = vector.broadcast %cst_276 : f32 to vector<1x16xf32>
    %340 = arith.mulf %339, %338 : vector<1x16xf32>
    %341 = math.tanh %340 : vector<1x16xf32>
    %cst_277 = arith.constant 1.000000e+00 : f32
    %342 = vector.broadcast %cst_277 : f32 to vector<1x16xf32>
    %343 = arith.addf %341, %342 : vector<1x16xf32>
    %cst_278 = arith.constant 5.000000e-01 : f32
    %344 = vector.broadcast %cst_278 : f32 to vector<1x16xf32>
    %345 = arith.mulf %344, %343 : vector<1x16xf32>
    %346 = vector.extract_strided_slice %284 {offsets = [1, 16], sizes = [1, 16], strides = [1, 1]} : vector<4x48xf32> to vector<1x16xf32>
    %347 = vector.extract_strided_slice %335 {offsets = [0, 16], sizes = [1, 16], strides = [1, 1]} : vector<1x48xf32> to vector<1x16xf32>
    %348 = arith.addf %346, %347 : vector<1x16xf32>
    %cst_279 = arith.constant 5.000000e-01 : f32
    %349 = vector.broadcast %cst_279 : f32 to vector<1x16xf32>
    %350 = arith.mulf %349, %348 : vector<1x16xf32>
    %351 = math.tanh %350 : vector<1x16xf32>
    %cst_280 = arith.constant 1.000000e+00 : f32
    %352 = vector.broadcast %cst_280 : f32 to vector<1x16xf32>
    %353 = arith.addf %351, %352 : vector<1x16xf32>
    %cst_281 = arith.constant 5.000000e-01 : f32
    %354 = vector.broadcast %cst_281 : f32 to vector<1x16xf32>
    %355 = arith.mulf %354, %353 : vector<1x16xf32>
    %356 = vector.extract_strided_slice %284 {offsets = [1, 32], sizes = [1, 16], strides = [1, 1]} : vector<4x48xf32> to vector<1x16xf32>
    %357 = vector.extract_strided_slice %335 {offsets = [0, 32], sizes = [1, 16], strides = [1, 1]} : vector<1x48xf32> to vector<1x16xf32>
    %358 = arith.mulf %345, %357 : vector<1x16xf32>
    %359 = arith.addf %356, %358 : vector<1x16xf32>
    %360 = math.tanh %359 : vector<1x16xf32>
    %cst_282 = arith.constant 1.000000e+00 : f32
    %361 = vector.broadcast %cst_282 : f32 to vector<1x16xf32>
    %362 = arith.subf %361, %355 : vector<1x16xf32>
    %363 = arith.mulf %362, %360 : vector<1x16xf32>
    %364 = arith.mulf %355, %321 : vector<1x16xf32>
    %365 = arith.addf %363, %364 : vector<1x16xf32>
    %366 = arith.truncf %365 : vector<1x16xf32> to vector<1x16xbf16>
    %cst_283 = arith.constant dense<0.000000e+00> : vector<1x10xf32>
    %367 = tpu.matmul %366, %279, %cst_283 {dimension_numbers = #tpu.dot_dimension_numbers<[1], [0], [0], [1], [0, 0, 1, 1], [], []>} : vector<1x16xbf16>, vector<16x10xbf16>, vector<1x10xf32> -> vector<1x10xf32>
    %368 = arith.addf %367, %286 : vector<1x10xf32>
    %cst_284 = arith.constant 5.000000e-01 : f32
    %369 = vector.broadcast %cst_284 : f32 to vector<1x10xf32>
    %370 = arith.mulf %369, %368 : vector<1x10xf32>
    %371 = math.tanh %370 : vector<1x10xf32>
    %cst_285 = arith.constant 1.000000e+00 : f32
    %372 = vector.broadcast %cst_285 : f32 to vector<1x10xf32>
    %373 = arith.addf %371, %372 : vector<1x10xf32>
    %cst_286 = arith.constant 5.000000e-01 : f32
    %374 = vector.broadcast %cst_286 : f32 to vector<1x10xf32>
    %375 = arith.mulf %374, %373 : vector<1x10xf32>
    %376 = arith.addf %332, %375 : vector<1x10xf32>
    %377 = arith.truncf %365 : vector<1x16xf32> to vector<1x16xbf16>
    %cst_287 = arith.constant dense<0.000000e+00> : vector<1x48xf32>
    %378 = tpu.matmul %377, %278, %cst_287 {dimension_numbers = #tpu.dot_dimension_numbers<[1], [0], [0], [1], [0, 0, 1, 1], [], []>} : vector<1x16xbf16>, vector<16x48xbf16>, vector<1x48xf32> -> vector<1x48xf32>
    %379 = arith.addf %378, %285 : vector<1x48xf32>
    %380 = vector.extract_strided_slice %284 {offsets = [2, 0], sizes = [1, 16], strides = [1, 1]} : vector<4x48xf32> to vector<1x16xf32>
    %381 = vector.extract_strided_slice %379 {offsets = [0, 0], sizes = [1, 16], strides = [1, 1]} : vector<1x48xf32> to vector<1x16xf32>
    %382 = arith.addf %380, %381 : vector<1x16xf32>
    %cst_288 = arith.constant 5.000000e-01 : f32
    %383 = vector.broadcast %cst_288 : f32 to vector<1x16xf32>
    %384 = arith.mulf %383, %382 : vector<1x16xf32>
    %385 = math.tanh %384 : vector<1x16xf32>
    %cst_289 = arith.constant 1.000000e+00 : f32
    %386 = vector.broadcast %cst_289 : f32 to vector<1x16xf32>
    %387 = arith.addf %385, %386 : vector<1x16xf32>
    %cst_290 = arith.constant 5.000000e-01 : f32
    %388 = vector.broadcast %cst_290 : f32 to vector<1x16xf32>
    %389 = arith.mulf %388, %387 : vector<1x16xf32>
    %390 = vector.extract_strided_slice %284 {offsets = [2, 16], sizes = [1, 16], strides = [1, 1]} : vector<4x48xf32> to vector<1x16xf32>
    %391 = vector.extract_strided_slice %379 {offsets = [0, 16], sizes = [1, 16], strides = [1, 1]} : vector<1x48xf32> to vector<1x16xf32>
    %392 = arith.addf %390, %391 : vector<1x16xf32>
    %cst_291 = arith.constant 5.000000e-01 : f32
    %393 = vector.broadcast %cst_291 : f32 to vector<1x16xf32>
    %394 = arith.mulf %393, %392 : vector<1x16xf32>
    %395 = math.tanh %394 : vector<1x16xf32>
    %cst_292 = arith.constant 1.000000e+00 : f32
    %396 = vector.broadcast %cst_292 : f32 to vector<1x16xf32>
    %397 = arith.addf %395, %396 : vector<1x16xf32>
    %cst_293 = arith.constant 5.000000e-01 : f32
    %398 = vector.broadcast %cst_293 : f32 to vector<1x16xf32>
    %399 = arith.mulf %398, %397 : vector<1x16xf32>
    %400 = vector.extract_strided_slice %284 {offsets = [2, 32], sizes = [1, 16], strides = [1, 1]} : vector<4x48xf32> to vector<1x16xf32>
    %401 = vector.extract_strided_slice %379 {offsets = [0, 32], sizes = [1, 16], strides = [1, 1]} : vector<1x48xf32> to vector<1x16xf32>
    %402 = arith.mulf %389, %401 : vector<1x16xf32>
    %403 = arith.addf %400, %402 : vector<1x16xf32>
    %404 = math.tanh %403 : vector<1x16xf32>
    %cst_294 = arith.constant 1.000000e+00 : f32
    %405 = vector.broadcast %cst_294 : f32 to vector<1x16xf32>
    %406 = arith.subf %405, %399 : vector<1x16xf32>
    %407 = arith.mulf %406, %404 : vector<1x16xf32>
    %408 = arith.mulf %399, %365 : vector<1x16xf32>
    %409 = arith.addf %407, %408 : vector<1x16xf32>
    %410 = arith.truncf %409 : vector<1x16xf32> to vector<1x16xbf16>
    %cst_295 = arith.constant dense<0.000000e+00> : vector<1x10xf32>
    %411 = tpu.matmul %410, %279, %cst_295 {dimension_numbers = #tpu.dot_dimension_numbers<[1], [0], [0], [1], [0, 0, 1, 1], [], []>} : vector<1x16xbf16>, vector<16x10xbf16>, vector<1x10xf32> -> vector<1x10xf32>
    %412 = arith.addf %411, %286 : vector<1x10xf32>
    %cst_296 = arith.constant 5.000000e-01 : f32
    %413 = vector.broadcast %cst_296 : f32 to vector<1x10xf32>
    %414 = arith.mulf %413, %412 : vector<1x10xf32>
    %415 = math.tanh %414 : vector<1x10xf32>
    %cst_297 = arith.constant 1.000000e+00 : f32
    %416 = vector.broadcast %cst_297 : f32 to vector<1x10xf32>
    %417 = arith.addf %415, %416 : vector<1x10xf32>
    %cst_298 = arith.constant 5.000000e-01 : f32
    %418 = vector.broadcast %cst_298 : f32 to vector<1x10xf32>
    %419 = arith.mulf %418, %417 : vector<1x10xf32>
    %420 = arith.addf %376, %419 : vector<1x10xf32>
    %421 = arith.truncf %409 : vector<1x16xf32> to vector<1x16xbf16>
    %cst_299 = arith.constant dense<0.000000e+00> : vector<1x48xf32>
    %422 = tpu.matmul %421, %278, %cst_299 {dimension_numbers = #tpu.dot_dimension_numbers<[1], [0], [0], [1], [0, 0, 1, 1], [], []>} : vector<1x16xbf16>, vector<16x48xbf16>, vector<1x48xf32> -> vector<1x48xf32>
    %423 = arith.addf %422, %285 : vector<1x48xf32>
    %424 = vector.extract_strided_slice %284 {offsets = [3, 0], sizes = [1, 16], strides = [1, 1]} : vector<4x48xf32> to vector<1x16xf32>
    %425 = vector.extract_strided_slice %423 {offsets = [0, 0], sizes = [1, 16], strides = [1, 1]} : vector<1x48xf32> to vector<1x16xf32>
    %426 = arith.addf %424, %425 : vector<1x16xf32>
    %cst_300 = arith.constant 5.000000e-01 : f32
    %427 = vector.broadcast %cst_300 : f32 to vector<1x16xf32>
    %428 = arith.mulf %427, %426 : vector<1x16xf32>
    %429 = math.tanh %428 : vector<1x16xf32>
    %cst_301 = arith.constant 1.000000e+00 : f32
    %430 = vector.broadcast %cst_301 : f32 to vector<1x16xf32>
    %431 = arith.addf %429, %430 : vector<1x16xf32>
    %cst_302 = arith.constant 5.000000e-01 : f32
    %432 = vector.broadcast %cst_302 : f32 to vector<1x16xf32>
    %433 = arith.mulf %432, %431 : vector<1x16xf32>
    %434 = vector.extract_strided_slice %284 {offsets = [3, 16], sizes = [1, 16], strides = [1, 1]} : vector<4x48xf32> to vector<1x16xf32>
    %435 = vector.extract_strided_slice %423 {offsets = [0, 16], sizes = [1, 16], strides = [1, 1]} : vector<1x48xf32> to vector<1x16xf32>
    %436 = arith.addf %434, %435 : vector<1x16xf32>
    %cst_303 = arith.constant 5.000000e-01 : f32
    %437 = vector.broadcast %cst_303 : f32 to vector<1x16xf32>
    %438 = arith.mulf %437, %436 : vector<1x16xf32>
    %439 = math.tanh %438 : vector<1x16xf32>
    %cst_304 = arith.constant 1.000000e+00 : f32
    %440 = vector.broadcast %cst_304 : f32 to vector<1x16xf32>
    %441 = arith.addf %439, %440 : vector<1x16xf32>
    %cst_305 = arith.constant 5.000000e-01 : f32
    %442 = vector.broadcast %cst_305 : f32 to vector<1x16xf32>
    %443 = arith.mulf %442, %441 : vector<1x16xf32>
    %444 = vector.extract_strided_slice %284 {offsets = [3, 32], sizes = [1, 16], strides = [1, 1]} : vector<4x48xf32> to vector<1x16xf32>
    %445 = vector.extract_strided_slice %423 {offsets = [0, 32], sizes = [1, 16], strides = [1, 1]} : vector<1x48xf32> to vector<1x16xf32>
    %446 = arith.mulf %433, %445 : vector<1x16xf32>
    %447 = arith.addf %444, %446 : vector<1x16xf32>
    %448 = math.tanh %447 : vector<1x16xf32>
    %cst_306 = arith.constant 1.000000e+00 : f32
    %449 = vector.broadcast %cst_306 : f32 to vector<1x16xf32>
    %450 = arith.subf %449, %443 : vector<1x16xf32>
    %451 = arith.mulf %450, %448 : vector<1x16xf32>
    %452 = arith.mulf %443, %409 : vector<1x16xf32>
    %453 = arith.addf %451, %452 : vector<1x16xf32>
    %454 = arith.truncf %453 : vector<1x16xf32> to vector<1x16xbf16>
    %cst_307 = arith.constant dense<0.000000e+00> : vector<1x10xf32>
    %455 = tpu.matmul %454, %279, %cst_307 {dimension_numbers = #tpu.dot_dimension_numbers<[1], [0], [0], [1], [0, 0, 1, 1], [], []>} : vector<1x16xbf16>, vector<16x10xbf16>, vector<1x10xf32> -> vector<1x10xf32>
    %456 = arith.addf %455, %286 : vector<1x10xf32>
    %cst_308 = arith.constant 5.000000e-01 : f32
    %457 = vector.broadcast %cst_308 : f32 to vector<1x10xf32>
    %458 = arith.mulf %457, %456 : vector<1x10xf32>
    %459 = math.tanh %458 : vector<1x10xf32>
    %cst_309 = arith.constant 1.000000e+00 : f32
    %460 = vector.broadcast %cst_309 : f32 to vector<1x10xf32>
    %461 = arith.addf %459, %460 : vector<1x10xf32>
    %cst_310 = arith.constant 5.000000e-01 : f32
    %462 = vector.broadcast %cst_310 : f32 to vector<1x10xf32>
    %463 = arith.mulf %462, %461 : vector<1x10xf32>
    %464 = arith.addf %420, %463 : vector<1x10xf32>
    %cst_311 = arith.constant 2.500000e-01 : f32
    %465 = vector.broadcast %cst_311 : f32 to vector<1x10xf32>
    %466 = arith.mulf %464, %465 : vector<1x10xf32>
    %c48 = arith.constant 48 : index
    %c0_312 = arith.constant 0 : index
    %467 = vector.load %arg4[%c48, %c0_312] : memref<100x48xbf16, #tpu.memory_space<vmem>>, vector<16x32xbf16>
    %c64_313 = arith.constant 64 : index
    %c0_314 = arith.constant 0 : index
    %468 = vector.load %arg4[%c64_313, %c0_314] : memref<100x48xbf16, #tpu.memory_space<vmem>>, vector<32x4xbf16>
    %c96 = arith.constant 96 : index
    %c0_315 = arith.constant 0 : index
    %469 = vector.load %arg4[%c96, %c0_315] : memref<100x48xbf16, #tpu.memory_space<vmem>>, vector<4x10xbf16>
    %470 = arith.truncf %276 : vector<1x16xf32> to vector<1x16xbf16>
    %cst_316 = arith.constant dense<0.000000e+00> : vector<1x32xf32>
    %471 = tpu.matmul %470, %467, %cst_316 {dimension_numbers = #tpu.dot_dimension_numbers<[1], [0], [0], [1], [0, 0, 1, 1], [], []>} : vector<1x16xbf16>, vector<16x32xbf16>, vector<1x32xf32> -> vector<1x32xf32>
    %c6_317 = arith.constant 6 : index
    %c0_318 = arith.constant 0 : index
    %472 = vector.load %arg5[%c6_317, %c0_318] : memref<8x48xf32, #tpu.memory_space<vmem>>, vector<1x32xf32>
    %473 = arith.addf %471, %472 : vector<1x32xf32>
    %cst_319 = arith.constant 0.000000e+00 : f32
    %474 = vector.broadcast %cst_319 : f32 to vector<1x32xf32>
    %475 = arith.maximumf %473, %474 : vector<1x32xf32>
    %476 = arith.truncf %475 : vector<1x32xf32> to vector<1x32xbf16>
    %cst_320 = arith.constant dense<0.000000e+00> : vector<1x4xf32>
    %477 = tpu.matmul %476, %468, %cst_320 {dimension_numbers = #tpu.dot_dimension_numbers<[1], [0], [0], [1], [0, 0, 1, 1], [], []>} : vector<1x32xbf16>, vector<32x4xbf16>, vector<1x4xf32> -> vector<1x4xf32>
    %c7_321 = arith.constant 7 : index
    %c0_322 = arith.constant 0 : index
    %478 = vector.load %arg5[%c7_321, %c0_322] : memref<8x48xf32, #tpu.memory_space<vmem>>, vector<1x4xf32>
    %479 = arith.addf %477, %478 : vector<1x4xf32>
    %cst_323 = arith.constant dense<0xFF800000> : vector<1xf32>
    %480 = vector.multi_reduction <maximumf>, %479, %cst_323 [1] : vector<1x4xf32> to vector<1xf32>
    %481 = vector.shape_cast %480 : vector<1xf32> to vector<1x1xf32>
    %482 = vector.broadcast %481 : vector<1x1xf32> to vector<1x4xf32>
    %483 = arith.subf %479, %482 : vector<1x4xf32>
    %484 = math.exp %483 : vector<1x4xf32>
    %cst_324 = arith.constant dense<0.000000e+00> : vector<1xf32>
    %485 = vector.multi_reduction <add>, %484, %cst_324 [1] : vector<1x4xf32> to vector<1xf32>
    %486 = vector.shape_cast %485 : vector<1xf32> to vector<1x1xf32>
    %487 = vector.broadcast %486 : vector<1x1xf32> to vector<1x4xf32>
    %488 = arith.divf %484, %487 : vector<1x4xf32>
    %489 = arith.truncf %488 : vector<1x4xf32> to vector<1x4xbf16>
    %cst_325 = arith.constant dense<0.000000e+00> : vector<1x10xf32>
    %490 = tpu.matmul %489, %469, %cst_325 {dimension_numbers = #tpu.dot_dimension_numbers<[1], [0], [0], [1], [0, 0, 1, 1], [], []>} : vector<1x4xbf16>, vector<4x10xbf16>, vector<1x10xf32> -> vector<1x10xf32>
    %cst_326 = arith.constant 5.000000e-01 : f32
    %491 = vector.broadcast %cst_326 : f32 to vector<1x10xf32>
    %492 = arith.mulf %491, %490 : vector<1x10xf32>
    %493 = math.tanh %492 : vector<1x10xf32>
    %cst_327 = arith.constant 1.000000e+00 : f32
    %494 = vector.broadcast %cst_327 : f32 to vector<1x10xf32>
    %495 = arith.addf %493, %494 : vector<1x10xf32>
    %cst_328 = arith.constant 5.000000e-01 : f32
    %496 = vector.broadcast %cst_328 : f32 to vector<1x10xf32>
    %497 = arith.mulf %496, %495 : vector<1x10xf32>
    %498 = arith.mulf %466, %497 : vector<1x10xf32>
    %cst_329 = arith.constant 0.000000e+00 : f32
    %499 = vector.broadcast %cst_329 : f32 to vector<8x128xf32>
    %c0_330 = arith.constant 0 : index
    %c0_331 = arith.constant 0 : index
    %c0_332 = arith.constant 0 : index
    %500 = vector.load %arg6[%c0_330, %c0_331, %c0_332] : memref<1x8x128xf32, #tpu.memory_space<vmem>>, vector<1x8x128xf32>
    %501 = vector.shape_cast %500 : vector<1x8x128xf32> to vector<8x128xf32>
    %502 = vector.shape_cast %499 : vector<8x128xf32> to vector<1x8x128xf32>
    tpu.vector_store %arg6[%c0_330, %c0_331, %c0_332], %502 {strides = array<i32>} : memref<1x8x128xf32, #tpu.memory_space<vmem>>, vector<1x8x128xf32>,
    %c0_333 = arith.constant 0 : index
    %c0_334 = arith.constant 0 : index
    %c0_335 = arith.constant 0 : index
    %503 = vector.load %arg6[%c0_333, %c0_334, %c0_335] : memref<1x8x128xf32, #tpu.memory_space<vmem>>, vector<1x1x10xf32>
    %504 = vector.shape_cast %503 : vector<1x1x10xf32> to vector<1x10xf32>
    %505 = vector.shape_cast %498 : vector<1x10xf32> to vector<1x1x10xf32>
    tpu.vector_store %arg6[%c0_333, %c0_334, %c0_335], %505 {strides = array<i32>} : memref<1x8x128xf32, #tpu.memory_space<vmem>>, vector<1x1x10xf32>,
    %c0_336 = arith.constant 0 : index
    %c1_337 = arith.constant 1 : index
    %c0_338 = arith.constant 0 : index
    %506 = vector.load %arg6[%c0_336, %c1_337, %c0_338] : memref<1x8x128xf32, #tpu.memory_space<vmem>>, vector<1x1x4xf32>
    %507 = vector.shape_cast %506 : vector<1x1x4xf32> to vector<1x4xf32>
    %508 = vector.shape_cast %488 : vector<1x4xf32> to vector<1x1x4xf32>
    tpu.vector_store %arg6[%c0_336, %c1_337, %c0_338], %508 {strides = array<i32>} : memref<1x8x128xf32, #tpu.memory_space<vmem>>, vector<1x1x4xf32>,
    %c0_339 = arith.constant 0 : index
    %c2_340 = arith.constant 2 : index
    %c0_341 = arith.constant 0 : index
    %509 = vector.load %arg6[%c0_339, %c2_340, %c0_341] : memref<1x8x128xf32, #tpu.memory_space<vmem>>, vector<1x1x10xf32>
    %510 = vector.shape_cast %509 : vector<1x1x10xf32> to vector<1x10xf32>
    %511 = vector.shape_cast %466 : vector<1x10xf32> to vector<1x1x10xf32>
    tpu.vector_store %arg6[%c0_339, %c2_340, %c0_341], %511 {strides = array<i32>} : memref<1x8x128xf32, #tpu.memory_space<vmem>>, vector<1x1x10xf32>,
    return
  }
  func.func @transform_0(%arg0: i32) -> (i32, i32, i32, i32) {
    %c0_i32 = arith.constant 0 : i32
    %c0_i32_0 = arith.constant 0 : i32
    %c0_i32_1 = arith.constant 0 : i32
    %c0_i32_2 = arith.constant 0 : i32
    return %arg0, %c0_i32, %c0_i32_0, %c0_i32_1 : i32, i32, i32, i32
  }
  func.func @transform_1(%arg0: i32) -> (i32, i32, i32) {
    %c0_i32 = arith.constant 0 : i32
    %c0_i32_0 = arith.constant 0 : i32
    %c0_i32_1 = arith.constant 0 : i32
    %c0_i32_2 = arith.constant 0 : i32
    return %c0_i32, %c0_i32_0, %c0_i32_1 : i32, i32, i32
  }
  func.func @transform_2(%arg0: i32) -> (i32, i32) {
    %c0_i32 = arith.constant 0 : i32
    %c0_i32_0 = arith.constant 0 : i32
    %c0_i32_1 = arith.constant 0 : i32
    return %c0_i32, %c0_i32_0 : i32, i32
  }
  func.func @transform_3(%arg0: i32) -> (i32, i32) {
    %c0_i32 = arith.constant 0 : i32
    %c0_i32_0 = arith.constant 0 : i32
    %c0_i32_1 = arith.constant 0 : i32
    return %c0_i32, %c0_i32_0 : i32, i32
  }
  func.func @transform_4(%arg0: i32) -> (i32, i32) {
    %c0_i32 = arith.constant 0 : i32
    %c0_i32_0 = arith.constant 0 : i32
    %c0_i32_1 = arith.constant 0 : i32
    return %c0_i32, %c0_i32_0 : i32, i32
  }
  func.func @transform_5(%arg0: i32) -> (i32, i32, i32) {
    %c0_i32 = arith.constant 0 : i32
    %c0_i32_0 = arith.constant 0 : i32
    %c0_i32_1 = arith.constant 0 : i32
    return %arg0, %c0_i32, %c0_i32_0 : i32, i32, i32
  }
}

</mosaic_0001>

<bundles_post_ra>
// kernel: _lambda_.1
= control target key start
LH: loop header
LB: loop body
LE: loop exit
PB: predicated region body
PF: predicated region fallthrough
CT: control target
= control target key end

     0   :  { %s9701_s18 = smov 0   ;;  %s11521_s0 = inlined_call_operand.vmem [shape: f32[2,18,18,128], index: 0, kind: input, shape index: {}]   ;;  %s11522_s1 = inlined_call_operand.vmem [shape: bf16[9,128,48], index: 1, kind: input, shape index: {}]   ;;  %s11523_s2 = inlined_call_operand.vmem [shape: bf16[84,256], index: 2, kind: input, shape index: {}]   ;;  %s11524_s3 = inlined_call_operand.vmem [shape: bf16[100,48], index: 3, kind: input, shape index: {}]   ;;  %s11525_s4 = inlined_call_operand.vmem [shape: f32[8,48], index: 4, kind: input, shape index: {}]   ;;  %s11526_s5 = inlined_call_operand.vmem [shape: f32[2,8,128], index: 5, kind: output, shape index: {}]  }
   0x1 LB: > { %s6805_s19 = sadd.s32 4294967295, %s9662_s18   ;;  %p6809_p0 = scmp.ge.s32.totalorder %s9662_s18, 1  ;;  %s9662_s18 = sphi %s9701_s18, %s15_s18  }
   0x2   : > { %p187_p1 = scmp.lt.s32.totalorder %s9662_s18, 3 }
   0x4   : > { %p188_p2 = pnand %p6809_p0, %p187_p1 }
   0x5   : > { %v9371_v0 = vld [vmem:[%s11522_s1 + $0x40] sm:$0xff] (!%p188_p2)   ;;  %p214_p3 = scmp.lt.s32.totalorder (!%p188_p2), %s6805_s19, 1  ;;  %v9372_v1 = vld [vmem:[%s11522_s1 + $0x48] sm:$0xff] (!%p188_p2)   ;;  %v9373_v2 = vld [vmem:[%s11522_s1 + $0x50] sm:$0xff] (!%p188_p2)   ;;  %s9664_s17 = smov (!%p188_p2), 120   ;;  %vm3140_vm0 = vcmask (!%p188_p2), 64512  }
   0x6   : > { %191 = sbr.rel (%p188_p2) target bundleno = 5917 (0x171d), region = 40  ;;  %8115 = vmatprep.subr.bf16.mxu0 (!%p188_p2), %v9371_v0  ;;  %v9374_v3 = vld [vmem:[%s11522_s1 + $0x58] sm:$0xff] (!%p188_p2)   ;;  %v9375_v7 = vld [vmem:[%s11522_s1 + $0x60] sm:$0xff] (!%p188_p2)   ;;  %v9376_v8 = vld [vmem:[%s11522_s1 + $0x68] sm:$0xff] (!%p188_p2)   ;;  %s9666_s22 = smov (!%p188_p2), 112   ;;  %vm9667_vm1 = vmmov (!%p188_p2), 0  }
   0x7   : > { %8116 = vmatpush3.bf16.msra.mxu0 (!%p188_p2), %v9371_v0  ;;  %v9377_v9 = vld [vmem:[%s11522_s1 + $0x70] sm:$0xff] (!%p188_p2)   ;;  %v9378_v10 = vld [vmem:[%s11522_s1 + $0x78] sm:$0xff] (!%p188_p2)   ;;  %v9379_v13 = vld [vmem:[%s11522_s1] sm:$0xff] (!%p188_p2)   ;;  %vm4657_vm2 = vcmask (!%p188_p2), 523264   ;;  %vm4703_vm3 = vcmask (!%p188_p2), 60416   ;;  %vm4706_vm4 = vcmask (!%p188_p2), 64516  }
   0x8   : > { %8117 = vmatprep.subr.bf16.mxu0 (!%p188_p2), %v9372_v1  ;;  %v9380_v18 = vld [vmem:[%s11522_s1 + $0x8] sm:$0xff] (!%p188_p2)   ;;  %v9381_v23 = vld [vmem:[%s11522_s1 + $0x10] sm:$0xff] (!%p188_p2)   ;;  %v9382_v26 = vld [vmem:[%s11522_s1 + $0x18] sm:$0xff] (!%p188_p2)   ;;  %vm5943_vm5 = vcmask (!%p188_p2), 130048   ;;  %s9669_s25 = smov (!%p188_p2), 96   ;;  %s9670_s28 = smov (!%p188_p2), 32  }
   0x9   : > { %v9383_v31 = vld [vmem:[%s11522_s1 + $0x20] sm:$0xff] (!%p188_p2)   ;;  %v9384_v34 = vld [vmem:[%s11522_s1 + $0x28] sm:$0xff] (!%p188_p2)   ;;  %v9385_v39 = vld [vmem:[%s11522_s1 + $0x30] sm:$0xff] (!%p188_p2)   ;;  %vm5987_vm6 = vcmask (!%p188_p2), 257152   ;;  %vm6637_vm7 = vcmask (!%p188_p2), 261120   ;;  %vm6681_vm8 = vcmask (!%p188_p2), 24576  }
   0xa   : > { %v9386_v41 = vld [vmem:[%s11522_s1 + $0x38] sm:$0xff] (!%p188_p2)   ;;  %v9387_v47 = vld [vmem:[%s11522_s1 + $0x80] sm:$0xff] (!%p188_p2)   ;;  %vm6748_vm9 = vcmask (!%p188_p2), 73728   ;;  %vm6698_vm10 = vcmask (!%p188_p2), 1041408   ;;  %vm6694_vm11 = vcmask (!%p188_p2), 31744  }
   0xb   : > { %8118 = vmatpush3.bf16.msra.mxu0 (!%p188_p2), %v9372_v1 }
   0xc   : > { %8119 = vmatprep.subr.bf16.mxu0 (!%p188_p2), %v9373_v2 }
   0xd   : > { %s11528_s19 = smov (!%p214_p3, %s6805_s19), 1 }
   0xe   : > { %s9355_s26 = smul.u32 432, %s11528_s19  ;;  %s6811_s11 = sshll.u32 %s11528_s19, 3 }
   0xf   : > { %8120 = vmatpush3.bf16.msra.mxu0 %v9373_v2  ;;  %s11485_s14 = scalar_lea.vmem %s11526_s5, %s6811_s11 }
  0x10   : > { %s9724_s29 = scalar_lea.vmem %s11521_s0, %s9355_s26  ;;  %8121 = vmatprep.subr.bf16.mxu0 %v9374_v3 }
  0x11   : > { %v314_v4 = vld [vmem:[%s9724_s29 + $0x1] sm:$0xff]  ;;  %v315_v5 = vld [vmem:[%s9724_s29 + $0x9] sm:$0xff]  ;;  %v316_v11 = vld [vmem:[%s9724_s29 + $0x19] sm:$0xff] }
  0x12   : > { %v346_v6 = vpack.c.bf16 %v315_v5, %v314_v4  ;;  %v317_v12 = vld [vmem:[%s9724_s29 + $0x21] sm:$0xff]  ;;  %v318_v14 = vld [vmem:[%s9724_s29 + $0x31] sm:$0xff]  ;;  %v319_v15 = vld [vmem:[%s9724_s29 + $0x39] sm:$0xff] }
  0x13   : > { %8122 = vmatpush3.bf16.msra.mxu0 %v9374_v3  ;;  %v9750_v16 = vpack.c.bf16 %v317_v12, %v316_v11  ;;  %v9752_v17 = vpack.c.bf16 %v319_v15, %v318_v14  ;;  %v320_v19 = vld [vmem:[%s9724_s29 + $0x49] sm:$0xff]  ;;  %v321_v20 = vld [vmem:[%s9724_s29 + $0x51] sm:$0xff]  ;;  %v322_v21 = vld [vmem:[%s9724_s29 + $0x61] sm:$0xff] }
  0x14   : > { %8131 = vmatprep.mubr.bf16.mxu0 %v346_v6  ;;  %8123 = vmatprep.subr.bf16.mxu0 %v9375_v7  ;;  %v323_v22 = vld [vmem:[%s9724_s29 + $0x69] sm:$0xff]  ;;  %v9766_v24 = vpack.c.bf16 %v321_v20, %v320_v19  ;;  %v324_v27 = vld [vmem:[%s9724_s29 + $0x79] sm:$0xff]  ;;  %v325_v28 = vld [vmem:[%s9724_s29 + $0x81] sm:$0xff] }
  0x15   : > { %v9768_v25 = vpack.c.bf16 %v323_v22, %v322_v21  ;;  %v326_v29 = vld [vmem:[%s9724_s29 + $0x91] sm:$0xff]  ;;  %v327_v30 = vld [vmem:[%s9724_s29 + $0x99] sm:$0xff]  ;;  %v9782_v32 = vpack.c.bf16 %v325_v28, %v324_v27  ;;  %v328_v35 = vld [vmem:[%s9724_s29 + $0xa9] sm:$0xff] }
  0x16   : > { %v9784_v33 = vpack.c.bf16 %v327_v30, %v326_v29  ;;  %v329_v36 = vld [vmem:[%s9724_s29 + $0xb1] sm:$0xff]  ;;  %v330_v37 = vld [vmem:[%s9724_s29 + $0xc1] sm:$0xff]  ;;  %v331_v38 = vld [vmem:[%s9724_s29 + $0xc9] sm:$0xff] }
  0x17   : > { %8124 = vmatpush3.bf16.msra.mxu0 %v9375_v7  ;;  %v9798_v40 = vpack.c.bf16 %v329_v36, %v328_v35  ;;  %v9803_v42 = vpack.c.bf16 %v331_v38, %v330_v37  ;;  %v332_v43 = vld [vmem:[%s9724_s29 + $0xd9] sm:$0xff]  ;;  %v333_v44 = vld [vmem:[%s9724_s29 + $0xe1] sm:$0xff]  ;;  %v334_v45 = vld [vmem:[%s9724_s29 + $0xf1] sm:$0xff] }
  0x18   : > { %8125 = vmatprep.subr.bf16.mxu0 %v9376_v8  ;;  %v335_v46 = vld [vmem:[%s9724_s29 + $0xf9] sm:$0xff]  ;;  %v9814_v48 = vpack.c.bf16 %v333_v44, %v332_v43  ;;  %v336_v50 = vld [vmem:[%s9724_s29 + $0x109] sm:$0xff]  ;;  %v337_v51 = vld [vmem:[%s9724_s29 + $0x111] sm:$0xff] }
  0x19   : > { %v9816_v49 = vpack.c.bf16 %v335_v46, %v334_v45  ;;  %v338_v52 = vld [vmem:[%s9724_s29 + $0x121] sm:$0xff]  ;;  %v339_v53 = vld [vmem:[%s9724_s29 + $0x129] sm:$0xff]  ;;  %v9824_v54 = vpack.c.bf16 %v337_v51, %v336_v50  ;;  %v340_v56 = vld [vmem:[%s9724_s29 + $0x139] sm:$0xff] }
  0x1a   : > { %v9826_v55 = vpack.c.bf16 %v339_v53, %v338_v52  ;;  %v341_v57 = vld [vmem:[%s9724_s29 + $0x141] sm:$0xff]  ;;  %v342_v58 = vld [vmem:[%s9724_s29 + $0x151] sm:$0xff]  ;;  %v343_v59 = vld [vmem:[%s9724_s29 + $0x159] sm:$0xff] }
  0x1b   : > { %8126 = vmatpush3.bf16.msra.mxu0 %v9376_v8  ;;  %v9834_v60 = vpack.c.bf16 %v341_v57, %v340_v56  ;;  %v9836_v61 = vpack.c.bf16 %v343_v59, %v342_v58  ;;  %v344_v62 = vld [vmem:[%s9724_s29 + $0x169] sm:$0xff]  ;;  %v345_v63 = vld [vmem:[%s9724_s29 + $0x171] sm:$0xff]  ;;  %v250_v0 = vld [vmem:[%s9724_s29] sm:$0xff] }
  0x1c   : > { %8127 = vmatprep.subr.bf16.mxu0 %v9377_v9  ;;  %v251_v1 = vld [vmem:[%s9724_s29 + $0x8] sm:$0xff]  ;;  %v9844_v2 = vpack.c.bf16 %v345_v63, %v344_v62  ;;  %v252_v4 = vld [vmem:[%s9724_s29 + $0x18] sm:$0xff]  ;;  %v253_v5 = vld [vmem:[%s9724_s29 + $0x20] sm:$0xff] }
  0x1d   : > { %v282_v3 = vpack.c.bf16 %v251_v1, %v250_v0  ;;  %v254_v6 = vld [vmem:[%s9724_s29 + $0x30] sm:$0xff]  ;;  %v255_v7 = vld [vmem:[%s9724_s29 + $0x38] sm:$0xff]  ;;  %v9851_v8 = vpack.c.bf16 %v253_v5, %v252_v4  ;;  %v256_v11 = vld [vmem:[%s9724_s29 + $0x48] sm:$0xff] }
  0x1e   : > { %v257_v12 = vld [vmem:[%s9724_s29 + $0x50] sm:$0xff]  ;;  %v259_v14 = vld [vmem:[%s9724_s29 + $0x68] sm:$0xff]  ;;  %v9390_v19 = vld [vmem:[%s11522_s1 + $0x98] sm:$0xff]  }
  0x1f   : > { %8128 = vmatpush3.bf16.msra.mxu0 %v9377_v9  ;;  %v9388_v9 = vld [vmem:[%s11522_s1 + $0x88] sm:$0xff]   ;;  %v9389_v15 = vld [vmem:[%s11522_s1 + $0x90] sm:$0xff]   ;;  %v260_v21 = vld [vmem:[%s9724_s29 + $0x78] sm:$0xff] }
  0x20   : > { %8129 = vmatprep.subr.bf16.mxu0 %v9378_v10  ;;  %v261_v22 = vld [vmem:[%s9724_s29 + $0x80] sm:$0xff]  ;;  %v9392_v29 = vld [vmem:[%s11522_s1 + $0xa8] sm:$0xff]   ;;  %v9393_v37 = vld [vmem:[%s11522_s1 + $0xb0] sm:$0xff]  }
  0x21   : > { %v9391_v27 = vld [vmem:[%s11522_s1 + $0xa0] sm:$0xff]   ;;  %v9883_v28 = vpack.c.bf16 %v261_v22, %v260_v21  ;;  %v267_v36 = vld [vmem:[%s9724_s29 + $0xc8] sm:$0xff]  ;;  %v268_v43 = vld [vmem:[%s9724_s29 + $0xd8] sm:$0xff] }
  0x22   : > { %v266_v35 = vld [vmem:[%s9724_s29 + $0xc0] sm:$0xff]  ;;  %v270_v45 = vld [vmem:[%s9724_s29 + $0xf0] sm:$0xff]  ;;  %v271_v46 = vld [vmem:[%s9724_s29 + $0xf8] sm:$0xff] }
  0x23   : > { %8130 = vmatpush3.bf16.msra.mxu0 %v9378_v10  ;;  %v9856_v10 = vpack.c.bf16 %v255_v7, %v254_v6  ;;  %v269_v44 = vld [vmem:[%s9724_s29 + $0xe0] sm:$0xff]  ;;  %v9917_v51 = vpack.c.bf16 %v271_v46, %v270_v45  ;;  %v272_v52 = vld [vmem:[%s9724_s29 + $0x108] sm:$0xff]  ;;  %v273_v53 = vld [vmem:[%s9724_s29 + $0x110] sm:$0xff] }
  0x24   : > { %8163 = vmatprep.subr.bf16.mxu0 %v9379_v13  ;;  %v9915_v50 = vpack.c.bf16 %v269_v44, %v268_v43  ;;  %v274_v56 = vld [vmem:[%s9724_s29 + $0x120] sm:$0xff]  ;;  %v275_v57 = vld [vmem:[%s9724_s29 + $0x128] sm:$0xff]  ;;  %v9925_v58 = vpack.c.bf16 %v273_v53, %v272_v52  ;;  %v276_v62 = vld [vmem:[%s9724_s29 + $0x138] sm:$0xff] }
  0x25   : > { %v9927_v59 = vpack.c.bf16 %v275_v57, %v274_v56  ;;  %v277_v63 = vld [vmem:[%s9724_s29 + $0x140] sm:$0xff]  ;;  %v278_v0 = vld [vmem:[%s9724_s29 + $0x150] sm:$0xff]  ;;  %v279_v1 = vld [vmem:[%s9724_s29 + $0x158] sm:$0xff] }
  0x26   : > { %8132 = vmatmul.mubr.bf16.vlgmr.msra.gmra.mrb[0].mxu0 %v9750_v16  ;;  %v9937_v4 = vpack.c.bf16 %v279_v1, %v278_v0  ;;  %v280_v5 = vld [vmem:[%s9724_s29 + $0x168] sm:$0xff]  ;;  %v281_v6 = vld [vmem:[%s9724_s29 + $0x170] sm:$0xff]  ;;  %v810_v45 = vld [vmem:[%s9724_s29 + $0x9a] sm:$0xff] }
  0x27   : > { %8164 = vmatpush3.bf16.msra.mxu0 %v9379_v13  ;;  %8135 = vmatprep.mubr.bf16.mxu0 %v9752_v17  ;;  %v258_v13 = vld [vmem:[%s9724_s29 + $0x60] sm:$0xff]  ;;  %v9396_v22 = vld [vmem:[%s11522_s1 + $0xc8] sm:$0xff]   ;;  %v809_v44 = vld [vmem:[%s9724_s29 + $0x92] sm:$0xff] }
  0x28   : > { %8165 = vmatprep.subr.bf16.mxu0 %v9380_v18  ;;  %v9872_v20 = vpack.c.bf16 %v259_v14, %v258_v13  ;;  %v797_v7 = vld [vmem:[%s9724_s29 + $0x2] sm:$0xff]  ;;  %v799_v13 = vld [vmem:[%s9724_s29 + $0x1a] sm:$0xff]  ;;  %v9989_v53 = vpack.c.bf16 %v810_v45, %v809_v44  ;;  %v811_v56 = vld [vmem:[%s9724_s29 + $0xaa] sm:$0xff] }
  0x29   : > { %v800_v14 = vld [vmem:[%s9724_s29 + $0x22] sm:$0xff]  ;;  %v812_v57 = vld [vmem:[%s9724_s29 + $0xb2] sm:$0xff]  ;;  %v826_v44 = vld [vmem:[%s9724_s29 + $0x15a] sm:$0xff] }
  0x2a   : > { %v9952_v21 = vpack.c.bf16 %v800_v14, %v799_v13  ;;  %v808_v43 = vld [vmem:[%s9724_s29 + $0x82] sm:$0xff]  ;;  %v9401_v0 = vld [vmem:[%s11522_s1 + $0xf0] sm:$0xff]   ;;  %v10000_v1 = vpack.c.bf16 %v812_v57, %v811_v56  ;;  %v818_v13 = vld [vmem:[%s9724_s29 + $0xfa] sm:$0xff] }
  0x2b   : > { %8166 = vmatpush3.bf16.msra.mxu0 %v9380_v18  ;;  %v9867_v18 = vpack.c.bf16 %v257_v12, %v256_v11  ;;  %v9945_v11 = vpack.c.bf16 %v281_v6, %v280_v5  ;;  %v9399_v46 = vld [vmem:[%s11522_s1 + $0xe0] sm:$0xff]   ;;  %v9400_v52 = vld [vmem:[%s11522_s1 + $0xe8] sm:$0xff]   ;;  %v9402_v5 = vld [vmem:[%s11522_s1 + $0xf8] sm:$0xff]  }
  0x2c   : > { %8167 = vmatprep.subr.bf16.mxu0 %v9381_v23  ;;  %v9403_v14 = vld [vmem:[%s11522_s1 + $0x100] sm:$0xff]   ;;  %v828_v56 = vld [vmem:[%s9724_s29 + $0x172] sm:$0xff] }
  0x2e   : > { %8136 = vmatmul.mubr.bf16.gmra.mrb[4].mxu0 %v9766_v24 }
  0x2f   : > { %8139 = vmatprep.mubr.bf16.mxu0 %v9768_v25  ;;  %8168 = vmatpush3.bf16.msra.mxu0 %v9381_v23  ;;  %v262_v23 = vld [vmem:[%s9724_s29 + $0x90] sm:$0xff] }
  0x30   : > { %8169 = vmatprep.subr.bf16.mxu0 %v9382_v26 }
  0x33   : > { %8170 = vmatpush3.bf16.msra.mxu0 %v9382_v26  ;;  %v263_v26 = vld [vmem:[%s9724_s29 + $0x98] sm:$0xff] }
  0x34   : > { %8171 = vmatprep.subr.bf16.mxu0 %v9383_v31  ;;  %v9888_v30 = vpack.c.bf16 %v263_v26, %v262_v23  ;;  %v803_v26 = vld [vmem:[%s9724_s29 + $0x4a] sm:$0xff] }
  0x36   : > { %8140 = vmatmul.mubr.bf16.gmra.mrb[8].mxu0 %v9782_v32 }
  0x37   : > { %8143 = vmatprep.mubr.bf16.mxu0 %v9784_v33  ;;  %8172 = vmatpush3.bf16.msra.mxu0 %v9383_v31  ;;  %v264_v31 = vld [vmem:[%s9724_s29 + $0xa8] sm:$0xff] }
  0x38   : > { %8173 = vmatprep.subr.bf16.mxu0 %v9384_v34 }
  0x3b   : > { %8174 = vmatpush3.bf16.msra.mxu0 %v9384_v34  ;;  %v265_v34 = vld [vmem:[%s9724_s29 + $0xb0] sm:$0xff] }
  0x3c   : > { %8175 = vmatprep.subr.bf16.mxu0 %v9385_v39  ;;  %v9899_v38 = vpack.c.bf16 %v265_v34, %v264_v31  ;;  %v806_v31 = vld [vmem:[%s9724_s29 + $0x6a] sm:$0xff] }
  0x3d   : > { %v9397_v34 = vld [vmem:[%s11522_s1 + $0xd0] sm:$0xff]  }
  0x3e   : > { %8144 = vmatmul.mubr.bf16.gmra.mrb[12].mxu0 %v9798_v40 }
  0x3f   : > { %8147 = vmatprep.mubr.bf16.mxu0 %v9803_v42  ;;  %8176 = vmatpush3.bf16.msra.mxu0 %v9385_v39  ;;  %v9394_v39 = vld [vmem:[%s11522_s1 + $0xb8] sm:$0xff]  }
  0x40   : > { %8177 = vmatprep.subr.bf16.mxu0 %v9386_v41 }
  0x43   : > { %8178 = vmatpush3.bf16.msra.mxu0 %v9386_v41  ;;  %v9904_v41 = vpack.c.bf16 %v267_v36, %v266_v35  ;;  %v9398_v36 = vld [vmem:[%s11522_s1 + $0xd8] sm:$0xff]  }
  0x44   : > { %8211 = vmatprep.subr.bf16.mxu0 %v9387_v47 }
  0x46   : > { %8148 = vmatmul.mubr.bf16.gmra.mrb[16].mxu0 %v9814_v48 }
  0x47   : > { %8151 = vmatprep.mubr.bf16.mxu0 %v9816_v49 }
  0x4e   : > { %8152 = vmatmul.mubr.bf16.gmra.mrb[20].mxu0 %v9824_v54 }
  0x4f   : > { %8155 = vmatprep.mubr.bf16.mxu0 %v9826_v55 }
  0x56   : > { %8156 = vmatmul.mubr.bf16.gmra.mrb[24].mxu0 %v9834_v60 }
  0x57   : > { %8159 = vmatprep.mubr.bf16.mxu0 %v9836_v61 }
  0x5e   : > { %8160 = vmatmul.mubr.bf16.gmra.mrb[28].mxu0 %v9844_v2 }
  0x5f   : > { %8179 = vmatprep.mubr.bf16.mxu0 %v282_v3  ;;  %v9935_v3 = vpack.c.bf16 %v277_v63, %v276_v62  ;;  %v813_v62 = vld [vmem:[%s9724_s29 + $0xc2] sm:$0xff]  ;;  %v814_v63 = vld [vmem:[%s9724_s29 + $0xca] sm:$0xff] }
  0x60   : > { %v10005_v6 = vpack.c.bf16 %v814_v63, %v813_v62  ;;  %v9404_v62 = vld [vmem:[%s11522_s1 + $0x108] sm:$0xff]   ;;  %v9405_v63 = vld [vmem:[%s11522_s1 + $0x110] sm:$0xff]  }
  0x66   : > { %8180 = vmatmul.mubr.bf16.vlgmr.msra.gmra.mrb[0].mxu0 %v9851_v8 }
  0x67   : > { %8212 = vmatpush3.bf16.msra.mxu0 %v9387_v47  ;;  %8183 = vmatprep.mubr.bf16.mxu0 %v9856_v10  ;;  %v9395_v47 = vld [vmem:[%s11522_s1 + $0xc0] sm:$0xff]  }
  0x68   : > { %8213 = vmatprep.subr.bf16.mxu0 %v9388_v9 }
  0x6b   : > { %8214 = vmatpush3.bf16.msra.mxu0 %v9388_v9  ;;  %v798_v9 = vld [vmem:[%s9724_s29 + $0xa] sm:$0xff] }
  0x6c   : > { %8215 = vmatprep.subr.bf16.mxu0 %v9389_v15  ;;  %v829_v12 = vpack.c.bf16 %v798_v9, %v797_v7  ;;  %v815_v7 = vld [vmem:[%s9724_s29 + $0xda] sm:$0xff]  ;;  %v816_v9 = vld [vmem:[%s9724_s29 + $0xe2] sm:$0xff] }
  0x6e   : > { %8184 = vmatmul.mubr.bf16.gmra.mrb[4].mxu0 %v9867_v18 }
  0x6f   : > { %8187 = vmatprep.mubr.bf16.mxu0 %v9872_v20  ;;  %8216 = vmatpush3.bf16.msra.mxu0 %v9389_v15  ;;  %v801_v15 = vld [vmem:[%s9724_s29 + $0x32] sm:$0xff] }
  0x70   : > { %8217 = vmatprep.subr.bf16.mxu0 %v9390_v19 }
  0x73   : > { %8218 = vmatpush3.bf16.msra.mxu0 %v9390_v19  ;;  %v802_v19 = vld [vmem:[%s9724_s29 + $0x3a] sm:$0xff] }
  0x74   : > { %8219 = vmatprep.subr.bf16.mxu0 %v9391_v27  ;;  %v9957_v23 = vpack.c.bf16 %v802_v19, %v801_v15  ;;  %v10016_v15 = vpack.c.bf16 %v816_v9, %v815_v7  ;;  %v9409_v7 = vld [vmem:[%s11522_s1 + $0x130] sm:$0xff]   ;;  %v9410_v9 = vld [vmem:[%s11522_s1 + $0x138] sm:$0xff]  }
  0x76   : > { %8188 = vmatmul.mubr.bf16.gmra.mrb[8].mxu0 %v9883_v28 }
  0x77   : > { %8191 = vmatprep.mubr.bf16.mxu0 %v9888_v30  ;;  %8220 = vmatpush3.bf16.msra.mxu0 %v9391_v27  ;;  %v804_v27 = vld [vmem:[%s9724_s29 + $0x52] sm:$0xff] }
  0x78   : > { %8221 = vmatprep.subr.bf16.mxu0 %v9392_v29  ;;  %v9968_v35 = vpack.c.bf16 %v804_v27, %v803_v26  ;;  %v820_v26 = vld [vmem:[%s9724_s29 + $0x112] sm:$0xff]  ;;  %v821_v27 = vld [vmem:[%s9724_s29 + $0x122] sm:$0xff] }
  0x7b   : > { %8222 = vmatpush3.bf16.msra.mxu0 %v9392_v29  ;;  %v805_v29 = vld [vmem:[%s9724_s29 + $0x62] sm:$0xff] }
  0x7c   : > { %8223 = vmatprep.subr.bf16.mxu0 %v9393_v37 }
  0x7e   : > { %8192 = vmatmul.mubr.bf16.gmra.mrb[12].mxu0 %v9899_v38 }
  0x7f   : > { %8195 = vmatprep.mubr.bf16.mxu0 %v9904_v41  ;;  %8224 = vmatpush3.bf16.msra.mxu0 %v9393_v37  ;;  %v9973_v37 = vpack.c.bf16 %v806_v31, %v805_v29  ;;  %v822_v29 = vld [vmem:[%s9724_s29 + $0x12a] sm:$0xff] }
  0x80   : > { %8225 = vmatprep.subr.bf16.mxu0 %v9394_v39 }
  0x83   : > { %8226 = vmatpush3.bf16.msra.mxu0 %v9394_v39  ;;  %v807_v39 = vld [vmem:[%s9724_s29 + $0x7a] sm:$0xff] }
  0x84   : > { %8259 = vmatprep.subr.bf16.mxu0 %v9395_v47 }
  0x86   : > { %8196 = vmatmul.mubr.bf16.gmra.mrb[16].mxu0 %v9915_v50 }
  0x87   : > { %8199 = vmatprep.mubr.bf16.mxu0 %v9917_v51 }
  0x8e   : > { %8200 = vmatmul.mubr.bf16.gmra.mrb[20].mxu0 %v9925_v58 }
  0x8f   : > { %8203 = vmatprep.mubr.bf16.mxu0 %v9927_v59 }
  0x96   : > { %8204 = vmatmul.mubr.bf16.gmra.mrb[24].mxu0 %v9935_v3 }
  0x97   : > { %8207 = vmatprep.mubr.bf16.mxu0 %v9937_v4 }
  0x9e   : > { %8208 = vmatmul.mubr.bf16.gmra.mrb[28].mxu0 %v9945_v11 }
  0x9f   : > { %8227 = vmatprep.mubr.bf16.mxu0 %v829_v12  ;;  %v817_v12 = vld [vmem:[%s9724_s29 + $0xf2] sm:$0xff] }
  0xa0   : > { %v10018_v19 = vpack.c.bf16 %v818_v13, %v817_v12  ;;  %v9411_v12 = vld [vmem:[%s11522_s1 + $0x140] sm:$0xff]  }
  0xa1   : > { %v6898_v13 = vld [vmem:[%s9724_s29 + $0x180] sm:$0xff] }
  0xa6   : > { %8228 = vmatmul.mubr.bf16.vlgmr.msra.gmra.mrb[0].mxu0 %v9952_v21 }
  0xa7   : > { %8260 = vmatpush3.bf16.msra.mxu0 %v9395_v47  ;;  %8231 = vmatprep.mubr.bf16.mxu0 %v9957_v23  ;;  %v9984_v47 = vpack.c.bf16 %v808_v43, %v807_v39  ;;  %v824_v39 = vld [vmem:[%s9724_s29 + $0x142] sm:$0xff]  ;;  %v825_v43 = vld [vmem:[%s9724_s29 + $0x152] sm:$0xff] }
  0xa8   : > { %8261 = vmatprep.subr.bf16.mxu0 %v9396_v22 }
  0xab   : > { %8262 = vmatpush3.bf16.msra.mxu0 %v9396_v22  ;;  %v819_v22 = vld [vmem:[%s9724_s29 + $0x10a] sm:$0xff] }
  0xac   : > { %8263 = vmatprep.subr.bf16.mxu0 %v9397_v34  ;;  %v10026_v31 = vpack.c.bf16 %v820_v26, %v819_v22  ;;  %v9412_v26 = vld [vmem:[%s11522_s1 + $0x148] sm:$0xff]  }
  0xae   : > { %8232 = vmatmul.mubr.bf16.gmra.mrb[4].mxu0 %v9968_v35 }
  0xaf   : > { %8235 = vmatprep.mubr.bf16.mxu0 %v9973_v37  ;;  %8264 = vmatpush3.bf16.msra.mxu0 %v9397_v34  ;;  %v10028_v34 = vpack.c.bf16 %v822_v29, %v821_v27  ;;  %v9413_v27 = vld [vmem:[%s11522_s1 + $0x150] sm:$0xff]  }
  0xb0   : > { %8265 = vmatprep.subr.bf16.mxu0 %v9398_v36 }
  0xb3   : > { %8266 = vmatpush3.bf16.msra.mxu0 %v9398_v36  ;;  %v823_v36 = vld [vmem:[%s9724_s29 + $0x13a] sm:$0xff] }
  0xb4   : > { %8267 = vmatprep.subr.bf16.mxu0 %v9399_v46  ;;  %v10036_v45 = vpack.c.bf16 %v824_v39, %v823_v36  ;;  %v7099_v36 = vld [vmem:[%s9724_s29 + $0x81] sm:$0xff]  ;;  %v7100_v39 = vld [vmem:[%s9724_s29 + $0x91] sm:$0xff] }
  0xb6   : > { %8236 = vmatmul.mubr.bf16.gmra.mrb[8].mxu0 %v9984_v47 }
  0xb7   : > { %8239 = vmatprep.mubr.bf16.mxu0 %v9989_v53  ;;  %8268 = vmatpush3.bf16.msra.mxu0 %v9399_v46  ;;  %v10038_v46 = vpack.c.bf16 %v826_v44, %v825_v43  ;;  %v7101_v43 = vld [vmem:[%s9724_s29 + $0x99] sm:$0xff]  ;;  %v9437_v44 = vld [vmem:[%s11522_s1 + $0x210] sm:$0xff]  }
  0xb8   : > { %8269 = vmatprep.subr.bf16.mxu0 %v9400_v52 }
  0xbb   : > { %8270 = vmatpush3.bf16.msra.mxu0 %v9400_v52  ;;  %v827_v52 = vld [vmem:[%s9724_s29 + $0x16a] sm:$0xff] }
  0xbc   : > { %8271 = vmatprep.subr.bf16.mxu0 %v9401_v0  ;;  %v10044_v57 = vpack.c.bf16 %v828_v56, %v827_v52  ;;  %v9438_v52 = vld [vmem:[%s11522_s1 + $0x218] sm:$0xff]   ;;  %v7102_v56 = vld [vmem:[%s9724_s29 + $0xa9] sm:$0xff] }
  0xbe   : > { %8240 = vmatmul.mubr.bf16.gmra.mrb[12].mxu0 %v10000_v1 }
  0xbf   : > { %8243 = vmatprep.mubr.bf16.mxu0 %v10005_v6  ;;  %8272 = vmatpush3.bf16.msra.mxu0 %v9401_v0  ;;  %v9407_v0 = vld [vmem:[%s11522_s1 + $0x120] sm:$0xff]  }
  0xc0   : > { %8273 = vmatprep.subr.bf16.mxu0 %v9402_v5 }
  0xc3   : > { %8274 = vmatpush3.bf16.msra.mxu0 %v9402_v5  ;;  %v9408_v5 = vld [vmem:[%s11522_s1 + $0x128] sm:$0xff]  }
  0xc4   : > { %8307 = vmatprep.subr.bf16.mxu0 %v9403_v14 }
  0xc6   : > { %8244 = vmatmul.mubr.bf16.gmra.mrb[16].mxu0 %v10016_v15 }
  0xc7   : > { %8247 = vmatprep.mubr.bf16.mxu0 %v10018_v19 }
  0xce   : > { %8248 = vmatmul.mubr.bf16.gmra.mrb[20].mxu0 %v10026_v31 }
  0xcf   : > { %8251 = vmatprep.mubr.bf16.mxu0 %v10028_v34 }
  0xd6   : > { %8252 = vmatmul.mubr.bf16.gmra.mrb[24].mxu0 %v10036_v45 }
  0xd7   : > { %8255 = vmatprep.mubr.bf16.mxu0 %v10038_v46 }
  0xde   : > { %8256 = vmatmul.mubr.bf16.gmra.mrb[28].mxu0 %v10044_v57 }
  0xdf   : > { %8275 = vmatprep.mubr.bf16.mxu0 %v9851_v8  ;;  %v9406_v8 = vld [vmem:[%s11522_s1 + $0x118] sm:$0xff]  }
  0xe6   : > { %8276 = vmatmul.mubr.bf16.vlgmr.msra.gmra.mrb[0].mxu0 %v9856_v10 }
  0xe7   : > { %8308 = vmatpush3.bf16.msra.mxu0 %v9403_v14  ;;  %8279 = vmatprep.mubr.bf16.mxu0 %v9867_v18  ;;  %v6899_v14 = vld [vmem:[%s9724_s29 + $0x188] sm:$0xff] }
  0xe8   : > { %8309 = vmatprep.subr.bf16.mxu0 %v9404_v62  ;;  %v10088_v22 = vpack.c.bf16 %v6899_v14, %v6898_v13  ;;  %v7108_v13 = vld [vmem:[%s9724_s29 + $0xf1] sm:$0xff]  ;;  %v7109_v14 = vld [vmem:[%s9724_s29 + $0xf9] sm:$0xff] }
  0xeb   : > { %8310 = vmatpush3.bf16.msra.mxu0 %v9404_v62  ;;  %v7104_v62 = vld [vmem:[%s9724_s29 + $0xc1] sm:$0xff] }
  0xec   : > { %8311 = vmatprep.subr.bf16.mxu0 %v9405_v63 }
  0xee   : > { %8280 = vmatmul.mubr.bf16.gmra.mrb[4].mxu0 %v9872_v20 }
  0xef   : > { %8283 = vmatprep.mubr.bf16.mxu0 %v9883_v28  ;;  %8312 = vmatpush3.bf16.msra.mxu0 %v9405_v63  ;;  %v7105_v63 = vld [vmem:[%s9724_s29 + $0xc9] sm:$0xff] }
  0xf0   : > { %8313 = vmatprep.subr.bf16.mxu0 %v9406_v8 }
  0xf3   : > { %8314 = vmatpush3.bf16.msra.mxu0 %v9406_v8  ;;  %v9439_v8 = vld [vmem:[%s11522_s1 + $0x220] sm:$0xff]  }
  0xf4   : > { %8315 = vmatprep.subr.bf16.mxu0 %v9407_v0 }
  0xf6   : > { %8284 = vmatmul.mubr.bf16.gmra.mrb[8].mxu0 %v9888_v30 }
  0xf7   : > { %8287 = vmatprep.mubr.bf16.mxu0 %v9899_v38  ;;  %8316 = vmatpush3.bf16.msra.mxu0 %v9407_v0 }
  0xf8   : > { %8317 = vmatprep.subr.bf16.mxu0 %v9408_v5 }
  0xfb   : > { %8318 = vmatpush3.bf16.msra.mxu0 %v9408_v5  ;;  %v2367_v5 = vpack.c.bf16 %v7105_v63, %v7104_v62 }
  0xfc   : > { %8319 = vmatprep.subr.bf16.mxu0 %v9409_v7 }
  0xfe   : > { %8288 = vmatmul.mubr.bf16.gmra.mrb[12].mxu0 %v9904_v41 }
  0xff   : > { %8291 = vmatprep.mubr.bf16.mxu0 %v9915_v50  ;;  %8320 = vmatpush3.bf16.msra.mxu0 %v9409_v7  ;;  %v9440_v7 = vld [vmem:[%s11522_s1 + $0x228] sm:$0xff]  }
 0x100   : > { %8321 = vmatprep.subr.bf16.mxu0 %v9410_v9 }
 0x103   : > { %8322 = vmatpush3.bf16.msra.mxu0 %v9410_v9  ;;  %v7106_v9 = vld [vmem:[%s9724_s29 + $0xd9] sm:$0xff] }
 0x104   : > { %8355 = vmatprep.subr.bf16.mxu0 %v9411_v12 }
 0x106   : > { %8292 = vmatmul.mubr.bf16.gmra.mrb[16].mxu0 %v9917_v51 }
 0x107   : > { %8295 = vmatprep.mubr.bf16.mxu0 %v9925_v58 }
 0x10e   : > { %8296 = vmatmul.mubr.bf16.gmra.mrb[20].mxu0 %v9927_v59 }
 0x10f   : > { %8299 = vmatprep.mubr.bf16.mxu0 %v9935_v3 }
 0x116   : > { %8300 = vmatmul.mubr.bf16.gmra.mrb[24].mxu0 %v9937_v4 }
 0x117   : > { %8303 = vmatprep.mubr.bf16.mxu0 %v9945_v11 }
 0x11e   : > { %8304 = vmatmul.mubr.bf16.gmra.mrb[28].mxu0 %v10088_v22 }
 0x11f   : > { %8323 = vmatprep.mubr.bf16.mxu0 %v9750_v16  ;;  %v9414_v16 = vld [vmem:[%s11522_s1 + $0x158] sm:$0xff]  }
 0x126   : > { %8324 = vmatmul.mubr.bf16.vlgmr.msra.gmra.mrb[0].mxu0 %v9752_v17  ;;  %v9415_v17 = vld [vmem:[%s11522_s1 + $0x160] sm:$0xff]  }
 0x127   : > { %8356 = vmatpush3.bf16.msra.mxu0 %v9411_v12  ;;  %8327 = vmatprep.mubr.bf16.mxu0 %v9766_v24  ;;  %v9416_v24 = vld [vmem:[%s11522_s1 + $0x168] sm:$0xff]  }
 0x128   : > { %8357 = vmatprep.subr.bf16.mxu0 %v9412_v26  ;;  %v7107_v12 = vld [vmem:[%s9724_s29 + $0xe1] sm:$0xff] }
 0x12b   : > { %8358 = vmatpush3.bf16.msra.mxu0 %v9412_v26  ;;  %v2368_v26 = vpack.c.bf16 %v7107_v12, %v7106_v9 }
 0x12c   : > { %8359 = vmatprep.subr.bf16.mxu0 %v9413_v27 }
 0x12e   : > { %8328 = vmatmul.mubr.bf16.gmra.mrb[4].mxu0 %v9768_v25  ;;  %v9417_v25 = vld [vmem:[%s11522_s1 + $0x170] sm:$0xff]  }
 0x12f   : > { %8331 = vmatprep.mubr.bf16.mxu0 %v9782_v32  ;;  %8360 = vmatpush3.bf16.msra.mxu0 %v9413_v27  ;;  %v9418_v32 = vld [vmem:[%s11522_s1 + $0x178] sm:$0xff]   ;;  %v2369_v27 = vpack.c.bf16 %v7109_v14, %v7108_v13  ;;  %v7174_v13 = vld [vmem:[%s9724_s29 + $0x16a] sm:$0xff] }
 0x130   : > { %8361 = vmatprep.subr.bf16.mxu0 %v9414_v16  ;;  %v7175_v14 = vld [vmem:[%s9724_s29 + $0x172] sm:$0xff] }
 0x133   : > { %8362 = vmatpush3.bf16.msra.mxu0 %v9414_v16  ;;  %v9442_v16 = vld [vmem:[%s11522_s1 + $0x238] sm:$0xff]  }
 0x134   : > { %8363 = vmatprep.subr.bf16.mxu0 %v9415_v17 }
 0x136   : > { %8332 = vmatmul.mubr.bf16.gmra.mrb[8].mxu0 %v9784_v33  ;;  %v9419_v33 = vld [vmem:[%s11522_s1 + $0x180] sm:$0xff]  }
 0x137   : > { %8335 = vmatprep.mubr.bf16.mxu0 %v9798_v40  ;;  %8364 = vmatpush3.bf16.msra.mxu0 %v9415_v17  ;;  %v6954_v40 = vld [vmem:[%s9724_s29 + $0x181] sm:$0xff]  ;;  %v7110_v17 = vld [vmem:[%s9724_s29 + $0x109] sm:$0xff] }
 0x138   : > { %8365 = vmatprep.subr.bf16.mxu0 %v9416_v24 }
 0x13b   : > { %8366 = vmatpush3.bf16.msra.mxu0 %v9416_v24  ;;  %v7111_v24 = vld [vmem:[%s9724_s29 + $0x111] sm:$0xff] }
 0x13c   : > { %8367 = vmatprep.subr.bf16.mxu0 %v9417_v25 }
 0x13e   : > { %8336 = vmatmul.mubr.bf16.gmra.mrb[12].mxu0 %v9803_v42  ;;  %v6955_v42 = vld [vmem:[%s9724_s29 + $0x189] sm:$0xff] }
 0x13f   : > { %8339 = vmatprep.mubr.bf16.mxu0 %v9814_v48  ;;  %8368 = vmatpush3.bf16.msra.mxu0 %v9417_v25  ;;  %v10132_v48 = vpack.c.bf16 %v6955_v42, %v6954_v40  ;;  %v7112_v25 = vld [vmem:[%s9724_s29 + $0x121] sm:$0xff]  ;;  %v7114_v42 = vld [vmem:[%s9724_s29 + $0x139] sm:$0xff] }
 0x140   : > { %8369 = vmatprep.subr.bf16.mxu0 %v9418_v32 }
 0x143   : > { %8370 = vmatpush3.bf16.msra.mxu0 %v9418_v32  ;;  %v7113_v32 = vld [vmem:[%s9724_s29 + $0x129] sm:$0xff] }
 0x144   : > { %8403 = vmatprep.subr.bf16.mxu0 %v9419_v33  ;;  %v2371_v40 = vpack.c.bf16 %v7113_v32, %v7112_v25  ;;  %v9457_v25 = vld [vmem:[%s11522_s1 + $0x50] sm:$0xff]   ;;  %v9458_v32 = vld [vmem:[%s11522_s1 + $0x58] sm:$0xff]  }
 0x145   : > { %3256 = vrot.lane.b32.xlu1 %v9457_v25, %s9664_s17 }
 0x146   : > { %8340 = vmatmul.mubr.bf16.gmra.mrb[16].mxu0 %v9816_v49  ;;  %v9420_v49 = vld [vmem:[%s11522_s1 + $0x188] sm:$0xff]  }
 0x147   : > { %8343 = vmatprep.mubr.bf16.mxu0 %v9824_v54  ;;  %v9421_v54 = vld [vmem:[%s11522_s1 + $0x190] sm:$0xff]  }
 0x149   : > { %3258 = vrot.lane.b32.xlu1 %v9458_v32, %s9664_s17 }
 0x14e   : > { %8344 = vmatmul.mubr.bf16.gmra.mrb[20].mxu0 %v9826_v55  ;;  %v9422_v55 = vld [vmem:[%s11522_s1 + $0x198] sm:$0xff]  }
 0x14f   : > { %8347 = vmatprep.mubr.bf16.mxu0 %v9834_v60  ;;  %v9423_v60 = vld [vmem:[%s11522_s1 + $0x1a0] sm:$0xff]  }
 0x156   : > { %8348 = vmatmul.mubr.bf16.gmra.mrb[24].mxu0 %v9836_v61  ;;  %v9424_v61 = vld [vmem:[%s11522_s1 + $0x1a8] sm:$0xff]  }
 0x157   : > { %8351 = vmatprep.mubr.bf16.mxu0 %v9844_v2  ;;  %v9425_v2 = vld [vmem:[%s11522_s1 + $0x1b0] sm:$0xff]  }
 0x15e   : > { %8352 = vmatmul.mubr.bf16.gmra.mrb[28].mxu0 %v10132_v48 }
 0x15f   : > { %8371 = vmatprep.mubr.bf16.mxu0 %v9952_v21  ;;  %v9426_v21 = vld [vmem:[%s11522_s1 + $0x1b8] sm:$0xff]  }
 0x166   : > { %8372 = vmatmul.mubr.bf16.vlgmr.msra.gmra.mrb[0].mxu0 %v9957_v23  ;;  %v9427_v23 = vld [vmem:[%s11522_s1 + $0x1c0] sm:$0xff]  }
 0x167   : > { %8404 = vmatpush3.bf16.msra.mxu0 %v9419_v33  ;;  %8375 = vmatprep.mubr.bf16.mxu0 %v9968_v35  ;;  %v7010_v35 = vld [vmem:[%s9724_s29 + $0x182] sm:$0xff]  ;;  %v2370_v33 = vpack.c.bf16 %v7111_v24, %v7110_v17 }
 0x168   : > { %8405 = vmatprep.subr.bf16.mxu0 %v9420_v49  ;;  %v9445_v17 = vld [vmem:[%s11523_s2 + $0x4] ss:$8 sps:$4 sm:$0xff]  }
 0x169   : > { %3106 = vmatprep.mubr.bf16.mxu1 %v9445_v17  ;;  %v9455_v24 = vld [vmem:[%s11522_s1 + $0x40] sm:$0xff]   ;;  %v9481_v17 = vld [vmem:[%s11522_s1 + $0xd0] sm:$0xff]  }
 0x16a   : > { %3252 = vrot.lane.b32.xlu0 %v9455_v24, %s9664_s17  ;;  %v9482_v24 = vld [vmem:[%s11522_s1 + $0xd8] sm:$0xff]  }
 0x16b   : > { %8406 = vmatpush3.bf16.msra.mxu0 %v9420_v49  ;;  %v7115_v49 = vld [vmem:[%s9724_s29 + $0x141] sm:$0xff] }
 0x16c   : > { %8407 = vmatprep.subr.bf16.mxu0 %v9421_v54 }
 0x16e   : > { %8376 = vmatmul.mubr.bf16.gmra.mrb[4].mxu0 %v9973_v37  ;;  %v7011_v37 = vld [vmem:[%s9724_s29 + $0x18a] sm:$0xff] }
 0x16f   : > { %8379 = vmatprep.mubr.bf16.mxu0 %v9984_v47  ;;  %8408 = vmatpush3.bf16.msra.mxu0 %v9421_v54  ;;  %v10176_v47 = vpack.c.bf16 %v7011_v37, %v7010_v35  ;;  %v7116_v54 = vld [vmem:[%s9724_s29 + $0x151] sm:$0xff]  ;;  %v7122_v35 = vld [vmem:[%s9724_s29 + $0x199] sm:$0xff]  ;;  %v7123_v37 = vld [vmem:[%s9724_s29 + $0x1a1] sm:$0xff] }
 0x170   : > { %8409 = vmatprep.subr.bf16.mxu0 %v9422_v55 }
 0x173   : > { %8410 = vmatpush3.bf16.msra.mxu0 %v9422_v55  ;;  %v7117_v55 = vld [vmem:[%s9724_s29 + $0x159] sm:$0xff] }
 0x174   : > { %8411 = vmatprep.subr.bf16.mxu0 %v9423_v60 }
 0x176   : > { %8380 = vmatmul.mubr.bf16.gmra.mrb[8].mxu0 %v9989_v53  ;;  %v9428_v53 = vld [vmem:[%s11522_s1 + $0x1c8] sm:$0xff]  }
 0x177   : > { %8383 = vmatprep.mubr.bf16.mxu0 %v10000_v1  ;;  %8412 = vmatpush3.bf16.msra.mxu0 %v9423_v60  ;;  %v9429_v1 = vld [vmem:[%s11522_s1 + $0x1d0] sm:$0xff]   ;;  %v2372_v60 = vpack.c.bf16 %v7115_v49, %v7114_v42  ;;  %v9462_v49 = vld [vmem:[%s11522_s1 + $0x78] sm:$0xff]  }
 0x178   : > { %8413 = vmatprep.subr.bf16.mxu0 %v9424_v61  ;;  %v9461_v42 = vld [vmem:[%s11522_s1 + $0x70] sm:$0xff]  }
 0x17b   : > { %8414 = vmatpush3.bf16.msra.mxu0 %v9424_v61  ;;  %v2373_v61 = vpack.c.bf16 %v7117_v55, %v7116_v54  ;;  %v9463_v54 = vld [vmem:[%s11522_s1] sm:$0xff]   ;;  %v9464_v55 = vld [vmem:[%s11522_s1 + $0x8] sm:$0xff]  }
 0x17c   : > { %8415 = vmatprep.subr.bf16.mxu0 %v9425_v2 }
 0x17e   : > { %8384 = vmatmul.mubr.bf16.gmra.mrb[12].mxu0 %v10005_v6  ;;  %v7093_v6 = vld [vmem:[%s9724_s29 + $0x39] sm:$0xff] }
 0x17f   : > { %8387 = vmatprep.mubr.bf16.mxu0 %v10016_v15  ;;  %8416 = vmatpush3.bf16.msra.mxu0 %v9425_v2  ;;  %v7118_v2 = vld [vmem:[%s9724_s29 + $0x169] sm:$0xff] }
 0x180   : > { %8417 = vmatprep.subr.bf16.mxu0 %v9426_v21 }
 0x183   : > { %8418 = vmatpush3.bf16.msra.mxu0 %v9426_v21  ;;  %v7119_v21 = vld [vmem:[%s9724_s29 + $0x171] sm:$0xff] }
 0x184   : > { %8451 = vmatprep.subr.bf16.mxu0 %v9427_v23 }
 0x186   : > { %8388 = vmatmul.mubr.bf16.gmra.mrb[16].mxu0 %v10018_v19  ;;  %v7096_v19 = vld [vmem:[%s9724_s29 + $0x61] sm:$0xff] }
 0x187   : > { %8391 = vmatprep.mubr.bf16.mxu0 %v10026_v31  ;;  %v9436_v31 = vld [vmem:[%s11522_s1 + $0x208] sm:$0xff]  }
 0x18e   : > { %8392 = vmatmul.mubr.bf16.gmra.mrb[20].mxu0 %v10028_v34  ;;  %v7098_v34 = vld [vmem:[%s9724_s29 + $0x79] sm:$0xff] }
 0x18f   : > { %8395 = vmatprep.mubr.bf16.mxu0 %v10036_v45  ;;  %v2364_v45 = vpack.c.bf16 %v7099_v36, %v7098_v34  ;;  %v7162_v34 = vld [vmem:[%s9724_s29 + $0xda] sm:$0xff]  ;;  %v7163_v36 = vld [vmem:[%s9724_s29 + $0xe2] sm:$0xff] }
 0x196   : > { %8396 = vmatmul.mubr.bf16.gmra.mrb[24].mxu0 %v10038_v46  ;;  %v2365_v46 = vpack.c.bf16 %v7101_v43, %v7100_v39  ;;  %v7164_v39 = vld [vmem:[%s9724_s29 + $0xf2] sm:$0xff]  ;;  %v7165_v43 = vld [vmem:[%s9724_s29 + $0xfa] sm:$0xff] }
 0x197   : > { %8399 = vmatprep.mubr.bf16.mxu0 %v10044_v57  ;;  %v7103_v57 = vld [vmem:[%s9724_s29 + $0xb1] sm:$0xff] }
 0x198   : > { %v2366_v0 = vpack.c.bf16 %v7103_v57, %v7102_v56  ;;  %v7168_v56 = vld [vmem:[%s9724_s29 + $0x122] sm:$0xff]  ;;  %v7169_v57 = vld [vmem:[%s9724_s29 + $0x12a] sm:$0xff] }
 0x199   : > { %v2677_v63 = vpack.c.bf16 %v7169_v57, %v7168_v56 }
 0x19e   : > { %8400 = vmatmul.mubr.bf16.gmra.mrb[28].mxu0 %v10176_v47 }
 0x19f   : > { %8419 = vmatprep.mubr.bf16.mxu0 %v9856_v10  ;;  %v9430_v10 = vld [vmem:[%s11522_s1 + $0x1d8] sm:$0xff]  }
 0x1a6   : > { %8420 = vmatmul.mubr.bf16.vlgmr.msra.gmra.mrb[0].mxu0 %v9867_v18  ;;  %v9431_v18 = vld [vmem:[%s11522_s1 + $0x1e0] sm:$0xff]  }
 0x1a7   : > { %8452 = vmatpush3.bf16.msra.mxu0 %v9427_v23  ;;  %8423 = vmatprep.mubr.bf16.mxu0 %v9872_v20  ;;  %v9432_v20 = vld [vmem:[%s11522_s1 + $0x1e8] sm:$0xff]   ;;  %v2374_v23 = vpack.c.bf16 %v7119_v21, %v7118_v2  ;;  %v9467_v2 = vld [vmem:[%s11522_s1 + $0x20] sm:$0xff]  }
 0x1a8   : > { %8453 = vmatprep.subr.bf16.mxu0 %v9428_v53  ;;  %v9468_v21 = vld [vmem:[%s11522_s1 + $0x28] sm:$0xff]  }
 0x1ab   : > { %8454 = vmatpush3.bf16.msra.mxu0 %v9428_v53  ;;  %v7148_v53 = vld [vmem:[%s9724_s29 + $0x32] sm:$0xff] }
 0x1ac   : > { %8455 = vmatprep.subr.bf16.mxu0 %v9429_v1 }
 0x1ae   : > { %8424 = vmatmul.mubr.bf16.gmra.mrb[4].mxu0 %v9883_v28  ;;  %v9433_v28 = vld [vmem:[%s11522_s1 + $0x1f0] sm:$0xff]  }
 0x1af   : > { %8427 = vmatprep.mubr.bf16.mxu0 %v9888_v30  ;;  %8456 = vmatpush3.bf16.msra.mxu0 %v9429_v1  ;;  %v9434_v30 = vld [vmem:[%s11522_s1 + $0x1f8] sm:$0xff]  }
 0x1b0   : > { %8457 = vmatprep.subr.bf16.mxu0 %v9430_v10  ;;  %v7149_v1 = vld [vmem:[%s9724_s29 + $0x3a] sm:$0xff] }
 0x1b3   : > { %8458 = vmatpush3.bf16.msra.mxu0 %v9430_v10  ;;  %v2376_v10 = vpack.c.bf16 %v7123_v37, %v7122_v35  ;;  %v9470_v35 = vld [vmem:[%s11522_s1 + $0x38] sm:$0xff]   ;;  %v10371_v37 = vld [vmem:[%s11525_s4] ss:$0 sm:$0xff] }
 0x1b4   : > { %8459 = vmatprep.subr.bf16.mxu0 %v9431_v18 }
 0x1b6   : > { %8428 = vmatmul.mubr.bf16.gmra.mrb[8].mxu0 %v9899_v38  ;;  %v9435_v38 = vld [vmem:[%s11522_s1 + $0x200] sm:$0xff]  }
 0x1b7   : > { %8431 = vmatprep.mubr.bf16.mxu0 %v9904_v41  ;;  %8460 = vmatpush3.bf16.msra.mxu0 %v9431_v18  ;;  %v7066_v41 = vld [vmem:[%s9724_s29 + $0x198] sm:$0xff]  ;;  %v2667_v18 = vpack.c.bf16 %v7149_v1, %v7148_v53  ;;  %v9471_v1 = vld [vmem:[%s11522_s1 + $0x80] sm:$0xff]  }
 0x1b8   : > { %8461 = vmatprep.subr.bf16.mxu0 %v9432_v20 }
 0x1bb   : > { %8462 = vmatpush3.bf16.msra.mxu0 %v9432_v20  ;;  %v7150_v20 = vld [vmem:[%s9724_s29 + $0x4a] sm:$0xff] }
 0x1bc   : > { %8463 = vmatprep.subr.bf16.mxu0 %v9433_v28 }
 0x1be   : > { %8432 = vmatmul.mubr.bf16.gmra.mrb[12].mxu0 %v9915_v50  ;;  %v7067_v50 = vld [vmem:[%s9724_s29 + $0x1a0] sm:$0xff] }
 0x1bf   : > { %8435 = vmatprep.mubr.bf16.mxu0 %v9917_v51  ;;  %8464 = vmatpush3.bf16.msra.mxu0 %v9433_v28  ;;  %v7092_v51 = vld [vmem:[%s9724_s29 + $0x31] sm:$0xff]  ;;  %v2070_v15 = vpack.c.bf16 %v7067_v50, %v7066_v41  ;;  %v7154_v50 = vld [vmem:[%s9724_s29 + $0x7a] sm:$0xff] }
 0x1c0   : > { %8465 = vmatprep.subr.bf16.mxu0 %v9434_v30  ;;  %v7151_v28 = vld [vmem:[%s9724_s29 + $0x52] sm:$0xff] }
 0x1c3   : > { %8466 = vmatpush3.bf16.msra.mxu0 %v9434_v30  ;;  %v7152_v30 = vld [vmem:[%s9724_s29 + $0x62] sm:$0xff] }
 0x1c4   : > { %8499 = vmatprep.subr.bf16.mxu0 %v9435_v38 }
 0x1c6   : > { %8436 = vmatmul.mubr.bf16.gmra.mrb[16].mxu0 %v9925_v58  ;;  %v2361_v58 = vpack.c.bf16 %v7093_v6, %v7092_v51  ;;  %v7155_v51 = vld [vmem:[%s9724_s29 + $0x82] sm:$0xff]  ;;  %v7156_v6 = vld [vmem:[%s9724_s29 + $0x92] sm:$0xff] }
 0x1c7   : > { %8439 = vmatprep.mubr.bf16.mxu0 %v9927_v59  ;;  %v7094_v59 = vld [vmem:[%s9724_s29 + $0x49] sm:$0xff] }
 0x1ce   : > { %8440 = vmatmul.mubr.bf16.gmra.mrb[20].mxu0 %v9935_v3  ;;  %v7095_v3 = vld [vmem:[%s9724_s29 + $0x51] sm:$0xff] }
 0x1cf   : > { %8443 = vmatprep.mubr.bf16.mxu0 %v9937_v4  ;;  %v7097_v4 = vld [vmem:[%s9724_s29 + $0x69] sm:$0xff]  ;;  %v2362_v29 = vpack.c.bf16 %v7095_v3, %v7094_v59 }
 0x1d0   : > { %v7158_v3 = vld [vmem:[%s9724_s29 + $0xaa] sm:$0xff] }
 0x1d6   : > { %8444 = vmatmul.mubr.bf16.gmra.mrb[24].mxu0 %v9945_v11  ;;  %v2363_v11 = vpack.c.bf16 %v7097_v4, %v7096_v19  ;;  %v7159_v19 = vld [vmem:[%s9724_s29 + $0xb2] sm:$0xff]  ;;  %v7160_v4 = vld [vmem:[%s9724_s29 + $0xc2] sm:$0xff] }
 0x1d7   : > { %8447 = vmatprep.mubr.bf16.mxu0 %v10088_v22  ;;  %v9441_v22 = vld [vmem:[%s11522_s1 + $0x230] sm:$0xff]  }
 0x1de   : > { %8448 = vmatmul.mubr.bf16.gmra.mrb[28].mxu0 %v2070_v15  ;;  %v7157_v15 = vld [vmem:[%s9724_s29 + $0x9a] sm:$0xff] }
 0x1df   : > { %8467 = vmatprep.mubr.bf16.mxu0 %v2361_v58  ;;  %v2670_v58 = vpack.c.bf16 %v7155_v51, %v7154_v50  ;;  %v2671_v59 = vpack.c.bf16 %v7157_v15, %v7156_v6  ;;  %v9473_v50 = vld [vmem:[%s11522_s1 + $0x90] sm:$0xff]   ;;  %v9474_v51 = vld [vmem:[%s11522_s1 + $0x98] sm:$0xff]  }
 0x1e6   : > { %8468 = vmatmul.mubr.bf16.vlgmr.msra.gmra.mrb[0].mxu0 %v2362_v29  ;;  %v7161_v29 = vld [vmem:[%s9724_s29 + $0xca] sm:$0xff] }
 0x1e7   : > { %8500 = vmatpush3.bf16.msra.mxu0 %v9435_v38  ;;  %8471 = vmatprep.mubr.bf16.mxu0 %v2363_v11  ;;  %v7153_v38 = vld [vmem:[%s9724_s29 + $0x6a] sm:$0xff]  ;;  %v2672_v11 = vpack.c.bf16 %v7159_v19, %v7158_v3 }
 0x1e8   : > { %8501 = vmatprep.subr.bf16.mxu0 %v9436_v31  ;;  %v2669_v41 = vpack.c.bf16 %v7153_v38, %v7152_v30 }
 0x1eb   : > { %8502 = vmatpush3.bf16.msra.mxu0 %v9436_v31  ;;  %v2673_v31 = vpack.c.bf16 %v7161_v29, %v7160_v4  ;;  %v9475_v29 = vld [vmem:[%s11522_s1 + $0xa0] sm:$0xff]  }
 0x1ec   : > { %8503 = vmatprep.subr.bf16.mxu0 %v9437_v44 }
 0x1ee   : > { %8472 = vmatmul.mubr.bf16.gmra.mrb[4].mxu0 %v2364_v45  ;;  %v2675_v45 = vpack.c.bf16 %v7165_v43, %v7164_v39 }
 0x1ef   : > { %8475 = vmatprep.mubr.bf16.mxu0 %v2365_v46  ;;  %8504 = vmatpush3.bf16.msra.mxu0 %v9437_v44  ;;  %v2674_v44 = vpack.c.bf16 %v7163_v36, %v7162_v34  ;;  %v7166_v46 = vld [vmem:[%s9724_s29 + $0x10a] sm:$0xff] }
 0x1f0   : > { %8505 = vmatprep.subr.bf16.mxu0 %v9438_v52 }
 0x1f3   : > { %8506 = vmatpush3.bf16.msra.mxu0 %v9438_v52  ;;  %v7167_v52 = vld [vmem:[%s9724_s29 + $0x112] sm:$0xff] }
 0x1f4   : > { %8507 = vmatprep.subr.bf16.mxu0 %v9439_v8  ;;  %v2676_v62 = vpack.c.bf16 %v7167_v52, %v7166_v46  ;;  %v9477_v46 = vld [vmem:[%s11522_s1 + $0xb0] sm:$0xff]   ;;  %v9478_v52 = vld [vmem:[%s11522_s1 + $0xb8] sm:$0xff]  }
 0x1f6   : > { %8476 = vmatmul.mubr.bf16.gmra.mrb[8].mxu0 %v2366_v0  ;;  %v7171_v0 = vld [vmem:[%s9724_s29 + $0x142] sm:$0xff] }
 0x1f7   : > { %8479 = vmatprep.mubr.bf16.mxu0 %v2367_v5  ;;  %8508 = vmatpush3.bf16.msra.mxu0 %v9439_v8  ;;  %v7170_v8 = vld [vmem:[%s9724_s29 + $0x13a] sm:$0xff]  ;;  %v7172_v5 = vld [vmem:[%s9724_s29 + $0x152] sm:$0xff] }
 0x1f8   : > { %8509 = vmatprep.subr.bf16.mxu0 %v9440_v7  ;;  %v2678_v9 = vpack.c.bf16 %v7171_v0, %v7170_v8 }
 0x1fb   : > { %8510 = vmatpush3.bf16.msra.mxu0 %v9440_v7  ;;  %v7173_v7 = vld [vmem:[%s9724_s29 + $0x15a] sm:$0xff] }
 0x1fc   : > { %8511 = vmatprep.subr.bf16.mxu0 %v9441_v22  ;;  %v2679_v12 = vpack.c.bf16 %v7173_v7, %v7172_v5  ;;  %v9479_v7 = vld [vmem:[%s11522_s1 + $0xc0] sm:$0xff]  }
 0x1fe   : > { %8480 = vmatmul.mubr.bf16.gmra.mrb[12].mxu0 %v2368_v26  ;;  %v7178_v26 = vld [vmem:[%s9724_s29 + $0x19a] sm:$0xff] }
 0x1ff   : > { %8483 = vmatprep.mubr.bf16.mxu0 %v2369_v27  ;;  %8512 = vmatpush3.bf16.msra.mxu0 %v9441_v22  ;;  %v2680_v22 = vpack.c.bf16 %v7175_v14, %v7174_v13  ;;  %v7179_v27 = vld [vmem:[%s9724_s29 + $0x1a2] sm:$0xff] }
 0x200   : > { %8513 = vmatprep.subr.bf16.mxu0 %v9442_v16 }
 0x203   : > { %8514 = vmatpush3.bf16.msra.mxu0 %v9442_v16  ;;  %v2682_v16 = vpack.c.bf16 %v7179_v27, %v7178_v26 }
 0x206   : > { %8484 = vmatmul.mubr.bf16.gmra.mrb[16].mxu0 %v2370_v33  ;;  %v9459_v33 = vld [vmem:[%s11522_s1 + $0x60] sm:$0xff]  }
 0x207   : > { %8487 = vmatprep.mubr.bf16.mxu0 %v2371_v40  ;;  %v9460_v40 = vld [vmem:[%s11522_s1 + $0x68] sm:$0xff]  }
 0x208   : > { %3262 = vrot.lane.b32.xlu1 %v9460_v40, %s9664_s17 }
 0x20c   : > { %3266 = vrot.lane.b32.xlu1 %v9462_v49, %s9664_s17 }
 0x20e   : > { %8488 = vmatmul.mubr.bf16.gmra.mrb[20].mxu0 %v2372_v60  ;;  %v9465_v60 = vld [vmem:[%s11522_s1 + $0x10] sm:$0xff]  }
 0x20f   : > { %8491 = vmatprep.mubr.bf16.mxu0 %v2373_v61  ;;  %v9466_v61 = vld [vmem:[%s11522_s1 + $0x18] sm:$0xff]  }
 0x210   : > { %3383 = vrot.lane.b32.xlu1 %v9464_v55, %s9664_s17  ;;  %v9484_v55 = vld [vmem:[%s11522_s1 + $0xe8] sm:$0xff]  }
 0x214   : > { %3387 = vrot.lane.b32.xlu1 %v9466_v61, %s9664_s17 }
 0x216   : > { %8492 = vmatmul.mubr.bf16.gmra.mrb[24].mxu0 %v2374_v23  ;;  %v9469_v23 = vld [vmem:[%s11522_s1 + $0x30] sm:$0xff]  }
 0x217   : > { %8495 = vmatprep.mubr.bf16.mxu0 %v10132_v48  ;;  %v2668_v48 = vpack.c.bf16 %v7151_v28, %v7150_v20 }
 0x218   : > { %3391 = vrot.lane.b32.xlu1 %v9468_v21, %s9664_s17 }
 0x21c   : > { %3395 = vrot.lane.b32.xlu1 %v9470_v35, %s9664_s17 }
 0x21e   : > { %8496 = vmatmul.mubr.bf16.gmra.mrb[28].mxu0 %v2376_v10  ;;  %v9472_v10 = vld [vmem:[%s11522_s1 + $0x88] sm:$0xff]  }
 0x21f   : > { %8515 = vmatprep.mubr.bf16.mxu0 %v2667_v18 }
 0x220   : > { %3540 = vrot.lane.b32.xlu1 %v9472_v10, %s9664_s17  ;;  %v9486_v10 = vld [vmem:[%s11522_s1 + $0xf8] sm:$0xff]  }
 0x224   : > { %3544 = vrot.lane.b32.xlu1 %v9474_v51, %s9664_s17 }
 0x226   : > { %8516 = vmatmul.mubr.bf16.vlgmr.msra.gmra.mrb[0].mxu0 %v2668_v48 }
 0x227   : > { %8519 = vmatprep.mubr.bf16.mxu0 %v2669_v41 }
 0x22e   : > { %8520 = vmatmul.mubr.bf16.gmra.mrb[4].mxu0 %v2670_v58 }
 0x22f   : > { %8523 = vmatprep.mubr.bf16.mxu0 %v2671_v59 }
 0x236   : > { %8524 = vmatmul.mubr.bf16.gmra.mrb[8].mxu0 %v2672_v11  ;;  %v9476_v11 = vld [vmem:[%s11522_s1 + $0xa8] sm:$0xff]  }
 0x237   : > { %8527 = vmatprep.mubr.bf16.mxu0 %v2673_v31  ;;  %3548 = vrot.lane.b32.xlu1 %v9476_v11, %s9664_s17 }
 0x23b   : > { %3552 = vrot.lane.b32.xlu1 %v9478_v52, %s9664_s17 }
 0x23e   : > { %8528 = vmatmul.mubr.bf16.gmra.mrb[12].mxu0 %v2674_v44 }
 0x23f   : > { %8531 = vmatprep.mubr.bf16.mxu0 %v2675_v45 }
 0x246   : > { %8532 = vmatmul.mubr.bf16.gmra.mrb[16].mxu0 %v2676_v62 }
 0x247   : > { %8535 = vmatprep.mubr.bf16.mxu0 %v2677_v63 }
 0x24e   : > { %8536 = vmatmul.mubr.bf16.gmra.mrb[20].mxu0 %v2678_v9  ;;  %v9480_v9 = vld [vmem:[%s11522_s1 + $0xc8] sm:$0xff]  }
 0x24f   : > { %8539 = vmatprep.mubr.bf16.mxu0 %v2679_v12  ;;  %3705 = vrot.lane.b32.xlu1 %v9480_v9, %s9664_s17 }
 0x253   : > { %3709 = vrot.lane.b32.xlu1 %v9482_v24, %s9664_s17 }
 0x256   : > { %8540 = vmatmul.mubr.bf16.gmra.mrb[24].mxu0 %v2680_v22 }
 0x257   : > { %8543 = vmatprep.mubr.bf16.mxu0 %v10176_v47  ;;  %v9456_v47 = vld [vmem:[%s11522_s1 + $0x48] sm:$0xff]   ;;  %3713 = vrot.lane.b32.xlu1 %v9484_v55, %s9664_s17 }
 0x258   : > { %3254 = vrot.lane.b32.xlu0 %v9456_v47, %s9664_s17 }
 0x25b   : > { %3717 = vrot.lane.b32.xlu1 %v9486_v10, %s9664_s17 }
 0x25c   : > { %3260 = vrot.lane.b32.xlu0 %v9459_v33, %s9664_s17 }
 0x25e   : > { %8544 = vmatmul.mubr.bf16.gmra.mrb[28].mxu0 %v2682_v16 }
 0x260   : > { %3264 = vrot.lane.b32.xlu0 %v9461_v42, %s9664_s17 }
 0x264   : > { %3381 = vrot.lane.b32.xlu0 %v9463_v54, %s9664_s17  ;;  %v9483_v54 = vld [vmem:[%s11522_s1 + $0xe0] sm:$0xff]  }
 0x268   : > { %3385 = vrot.lane.b32.xlu0 %v9465_v60, %s9664_s17 }
 0x26c   : > { %3389 = vrot.lane.b32.xlu0 %v9467_v2, %s9664_s17 }
 0x270   : > { %3393 = vrot.lane.b32.xlu0 %v9469_v23, %s9664_s17 }
 0x274   : > { %3538 = vrot.lane.b32.xlu0 %v9471_v1, %s9664_s17  ;;  %v9485_v1 = vld [vmem:[%s11522_s1 + $0xf0] sm:$0xff]  }
 0x278   : > { %3542 = vrot.lane.b32.xlu0 %v9473_v50, %s9664_s17 }
 0x27c   : > { %3546 = vrot.lane.b32.xlu0 %v9475_v29, %s9664_s17 }
 0x280   : > { %3550 = vrot.lane.b32.xlu0 %v9477_v46, %s9664_s17 }
 0x284   : > { %3703 = vrot.lane.b32.xlu0 %v9479_v7, %s9664_s17 }
 0x288   : > { %3707 = vrot.lane.b32.xlu0 %v9481_v17, %s9664_s17 }
 0x28c   : > { %3711 = vrot.lane.b32.xlu0 %v9483_v54, %s9664_s17 }
 0x290   : > { %3715 = vrot.lane.b32.xlu0 %v9485_v1, %s9664_s17 }
 0x2f9   : > { %v8517_v53 = vpop.f32.mrb[0].mxu0 }
 0x2fa   : > { %v2948_v18 = vadd.f32 %v8517_v53, %v10371_v37  ;;  %v2782_v20 = vpop.f32.mrb[1].mxu0 }
 0x2fb   : > { %v2946_v28 = vadd.f32 %v10371_v37, %v2782_v20  ;;  %v8518_v30 = vpop.f32.mrb[2].mxu0 }
 0x2fc   : > { %v2949_v38 = vadd.f32 %v8518_v30, %v10371_v37  ;;  %v2785_v48 = vpop.f32.mrb[3].mxu0  ;;  %v2980_v6 = vmax.f32 %v2948_v18, 0.0 }
 0x2fd   : > { %v2947_v41 = vadd.f32 %v10371_v37, %v2785_v48  ;;  %v2978_v58 = vmax.f32 %v2946_v28, 0.0 }
 0x2fe   : > { %v2981_v15 = vmax.f32 %v2949_v38, 0.0 }
 0x2ff   : > { %v2979_v59 = vmax.f32 %v2947_v41, 0.0 }
 0x300   : > { %v10393_v3 = vpack.c.bf16 %v2981_v15, %v2980_v6 }
 0x301   : > { %v8521_v19 = vpop.f32.mrb[4].mxu0  ;;  %v10395_v4 = vpack.c.bf16 %v2979_v59, %v2978_v58 }
 0x302   : > { %v2952_v31 = vadd.f32 %v8521_v19, %v10371_v37  ;;  %v2798_v34 = vpop.f32.mrb[5].mxu0 }
 0x303   : > { %v2950_v36 = vadd.f32 %v10371_v37, %v2798_v34  ;;  %v8522_v39 = vpop.f32.mrb[6].mxu0 }
 0x304   : > { %v2953_v43 = vadd.f32 %v8522_v39, %v10371_v37  ;;  %v2801_v44 = vpop.f32.mrb[7].mxu0  ;;  %v2984_v56 = vmax.f32 %v2952_v31, 0.0 }
 0x305   : > { %v2951_v45 = vadd.f32 %v10371_v37, %v2801_v44  ;;  %v2982_v62 = vmax.f32 %v2950_v36, 0.0 }
 0x306   : > { %v2985_v57 = vmax.f32 %v2953_v43, 0.0 }
 0x307   : > { %v2983_v63 = vmax.f32 %v2951_v45, 0.0 }
 0x308   : > { %v10417_v8 = vpack.c.bf16 %v2985_v57, %v2984_v56 }
 0x309   : > { %v10419_v0 = vpack.c.bf16 %v2983_v63, %v2982_v62  ;;  %v8525_v5 = vpop.f32.mrb[8].mxu0 }
 0x30a   : > { %v2956_v12 = vadd.f32 %v8525_v5, %v10371_v37  ;;  %v2814_v13 = vpop.f32.mrb[9].mxu0 }
 0x30b   : > { %v2954_v14 = vadd.f32 %v10371_v37, %v2814_v13  ;;  %v8526_v22 = vpop.f32.mrb[10].mxu0 }
 0x30c   : > { %v2957_v26 = vadd.f32 %v8526_v22, %v10371_v37  ;;  %v2817_v27 = vpop.f32.mrb[11].mxu0  ;;  %v2988_v25 = vmax.f32 %v2956_v12, 0.0 }
 0x30d   : > { %v2955_v16 = vadd.f32 %v10371_v37, %v2817_v27  ;;  %v2986_v32 = vmax.f32 %v2954_v14, 0.0 }
 0x30e   : > { %v2989_v47 = vmax.f32 %v2957_v26, 0.0 }
 0x30f   : > { %v2987_v33 = vmax.f32 %v2955_v16, 0.0 }
 0x310   : > { %v10441_v40 = vpack.c.bf16 %v2989_v47, %v2988_v25 }
 0x311   : > { %v10443_v42 = vpack.c.bf16 %v2987_v33, %v2986_v32  ;;  %v8529_v49 = vpop.f32.mrb[12].mxu0 }
 0x312   : > { %v2960_v60 = vadd.f32 %v8529_v49, %v10371_v37  ;;  %v2830_v61 = vpop.f32.mrb[13].mxu0 }
 0x313   : > { %v2958_v2 = vadd.f32 %v10371_v37, %v2830_v61  ;;  %v8530_v21 = vpop.f32.mrb[14].mxu0 }
 0x314   : > { %v2961_v23 = vadd.f32 %v8530_v21, %v10371_v37  ;;  %v2833_v35 = vpop.f32.mrb[15].mxu0  ;;  %v2992_v18 = vmax.f32 %v2960_v60, 0.0 }
 0x315   : > { %v2959_v53 = vadd.f32 %v10371_v37, %v2833_v35  ;;  %v2990_v28 = vmax.f32 %v2958_v2, 0.0 }
 0x316   : > { %v2993_v20 = vmax.f32 %v2961_v23, 0.0 }
 0x317   : > { %v2991_v30 = vmax.f32 %v2959_v53, 0.0 }
 0x318   : > { %v10465_v38 = vpack.c.bf16 %v2993_v20, %v2992_v18  ;;  %v9443_v20 = vld [vmem:[%s11523_s2] ss:$8 sps:$4 sm:$0xff]  }
 0x319   : > { %v10467_v48 = vpack.c.bf16 %v2991_v30, %v2990_v28  ;;  %v8533_v41 = vpop.f32.mrb[16].mxu0  ;;  %v9451_v28 = vld [vmem:[%s11523_s2 + $0x20] ss:$8 sps:$4 sm:$0xff]   ;;  %v3253_v30 = vpop.permute.xlu0 %3252 }
 0x31a   : > { %v2964_v50 = vadd.f32 %v8533_v41, %v10371_v37  ;;  %v2846_v51 = vpop.f32.mrb[17].mxu0 }
 0x31b   : > { %v2962_v6 = vadd.f32 %v10371_v37, %v2846_v51  ;;  %v8534_v15 = vpop.f32.mrb[18].mxu0 }
 0x31c   : > { %v2965_v58 = vadd.f32 %v8534_v15, %v10371_v37  ;;  %v2849_v59 = vpop.f32.mrb[19].mxu0  ;;  %v2996_v29 = vmax.f32 %v2964_v50, 0.0  ;;  %v9454_v50 = vld [vmem:[%s11523_s2 + $0x30] ss:$8 sps:$4 sm:$0xff]   ;;  %v9665_v15 = vmov 0.0  }
 0x31d   : > { %v2963_v19 = vadd.f32 %v10371_v37, %v2849_v59  ;;  %v2994_v31 = vmax.f32 %v2962_v6, 0.0  ;;  %v3255_v41 = vpop.permute.xlu0 %3254  ;;  %v9487_v6 = vld [vmem:[%s11522_s1 + $0x100] sm:$0xff]   ;;  %226 = vst [vmem:[#allocation2 + $0x10] sm:$0xff] %v9665_v15  ;;  %227 = vst [vmem:[#allocation2 + $0x18] sm:$0x3] %v9665_v15  ;;  %8935 = vmatprep.subr.bf16.mxu0 %v9665_v15  ;;  %v9488_v59 = vld [vmem:[%s11522_s1 + $0x108] sm:$0xff]   ;;  %8951 = vmatprep.mubr.msk.bf16.mxu0 %vm9667_vm1, %v9665_v15 }
 0x31e   : > { %v2997_v11 = vmax.f32 %v2965_v58, 0.0  ;;  %224 = vst [vmem:[#allocation2] sm:$0xff] %v9665_v15  ;;  %225 = vst [vmem:[#allocation2 + $0x8] sm:$0x3] %v9665_v15  ;;  %3868 = vrot.lane.b32.xlu0 %v9487_v6, %s9664_s17  ;;  %3870 = vrot.lane.b32.xlu1 %v9488_v59, %s9664_s17 }
 0x31f   : > { %v2995_v34 = vmax.f32 %v2963_v19, 0.0  ;;  %228 = vst [vmem:[#allocation2 + $0x20] sm:$0xff] %v9665_v15  ;;  %229 = vst [vmem:[#allocation2 + $0x28] sm:$0x3] %v9665_v15 }
 0x320   : > { %v3027_v36 = vpack.c.bf16 %v2997_v11, %v2996_v29  ;;  %230 = vst [vmem:[#allocation2 + $0x30] sm:$0xff] %v9665_v15  ;;  %231 = vst [vmem:[#allocation2 + $0x38] sm:$0x3] %v9665_v15  ;;  %v9489_v29 = vld [vmem:[%s11522_s1 + $0x110] sm:$0xff]  }
 0x321   : > { %v8537_v39 = vpop.f32.mrb[20].mxu0  ;;  %v3026_v43 = vpack.c.bf16 %v2995_v34, %v2994_v31  ;;  %232 = vst [vmem:[#allocation2 + $0x40] sm:$0xff] %v9665_v15  ;;  %233 = vst [vmem:[#allocation2 + $0x48] sm:$0x3] %v9665_v15  ;;  %v3261_v58 = vpop.permute.xlu0 %3260  ;;  %v9490_v31 = vld [vmem:[%s11522_s1 + $0x118] sm:$0xff]  }
 0x322   : > { %v2968_v44 = vadd.f32 %v8537_v39, %v10371_v37  ;;  %v2862_v45 = vpop.f32.mrb[21].mxu0  ;;  %234 = vst [vmem:[#allocation2 + $0x50] sm:$0xff] %v9665_v15  ;;  %235 = vst [vmem:[#allocation2 + $0x58] sm:$0x3] %v9665_v15  ;;  %3872 = vrot.lane.b32.xlu0 %v9489_v29, %s9664_s17  ;;  %3874 = vrot.lane.b32.xlu1 %v9490_v31, %s9664_s17 }
 0x323   : > { %v2966_v46 = vadd.f32 %v10371_v37, %v2862_v45  ;;  %v8538_v52 = vpop.f32.mrb[22].mxu0  ;;  %7854 = vmatprep.subr.bf16.mxu1 %v3026_v43  ;;  %236 = vst [vmem:[#allocation2 + $0x60] sm:$0xff] %v9665_v15  ;;  %237 = vst [vmem:[#allocation2 + $0x68] sm:$0x3] %v9665_v15  ;;  %v9492_v43 = vld [vmem:[%s11522_s1 + $0x128] sm:$0xff]   ;;  %v9494_v45 = vld [vmem:[%s11522_s1 + $0x138] sm:$0xff]  }
 0x324   : > { %v2969_v56 = vadd.f32 %v8538_v52, %v10371_v37  ;;  %v2865_v57 = vpop.f32.mrb[23].mxu0  ;;  %7855 = vmatpush3.bf16.msra.mxu1 %v10395_v4  ;;  %v3000_v63 = vmax.f32 %v2968_v44, 0.0  ;;  %238 = vst [vmem:[#allocation2 + $0x70] sm:$0xff] %v9665_v15  ;;  %239 = vst [vmem:[#allocation2 + $0x78] sm:$0x3] %v9665_v15  ;;  %v9493_v44 = vld [vmem:[%s11522_s1 + $0x130] sm:$0xff]  }
 0x325   : > { %v2967_v62 = vadd.f32 %v10371_v37, %v2865_v57  ;;  %7856 = vmatprep.subr.bf16.mxu1 %v3027_v36  ;;  %v2998_v7 = vmax.f32 %v2966_v46, 0.0  ;;  %240 = vst [vmem:[#allocation2 + $0x80] sm:$0xff] %v9665_v15  ;;  %241 = vst [vmem:[#allocation2 + $0x88] sm:$0x3] %v9665_v15  ;;  %v3265_v11 = vpop.permute.xlu0 %3264  ;;  %v9491_v36 = vld [vmem:[%s11522_s1 + $0x120] sm:$0xff]   ;;  %v9496_v52 = vld [vmem:[%s11522_s1 + $0x148] sm:$0xff]  }
 0x326   : > { %v3001_v5 = vmax.f32 %v2969_v56, 0.0  ;;  %242 = vst [vmem:[#allocation2 + $0x90] sm:$0xff] %v9665_v15  ;;  %243 = vst [vmem:[#allocation2 + $0x98] sm:$0x3] %v9665_v15  ;;  %3876 = vrot.lane.b32.xlu0 %v9491_v36, %s9664_s17  ;;  %3878 = vrot.lane.b32.xlu1 %v9492_v43, %s9664_s17  ;;  %v9495_v46 = vld [vmem:[%s11522_s1 + $0x140] sm:$0xff]   ;;  %v9497_v56 = vld [vmem:[%s11522_s1 + $0x150] sm:$0xff]  }
 0x327   : > { %v2999_v9 = vmax.f32 %v2967_v62, 0.0  ;;  %244 = vst [vmem:[#allocation3] sm:$0x3f] %v9665_v15  ;;  %245 = vst [vmem:[#allocation3 + $0x8] sm:$0x3f] %v9665_v15  ;;  %v9498_v57 = vld [vmem:[%s11522_s1 + $0x158] sm:$0xff]  }
 0x328   : > { %v3029_v12 = vpack.c.bf16 %v3001_v5, %v3000_v63  ;;  %7857 = vmatpush3.bf16.msra.mxu1 %v10393_v3  ;;  %246 = vst [vmem:[#allocation3 + $0x10] sm:$0x3f] %v9665_v15  ;;  %247 = vst [vmem:[#allocation3 + $0x18] sm:$0x3f] %v9665_v15  ;;  %v9499_v62 = vld [vmem:[%s11522_s1 + $0x160] sm:$0xff]   ;;  %v9500_v63 = vld [vmem:[%s11522_s1 + $0x168] sm:$0xff]  }
 0x329   : > { %v3028_v13 = vpack.c.bf16 %v2999_v9, %v2998_v7  ;;  %v8541_v14 = vpop.f32.mrb[24].mxu0  ;;  %248 = vst [vmem:[#allocation3 + $0x20] sm:$0x3f] %v9665_v15  ;;  %249 = vst [vmem:[#allocation3 + $0x28] sm:$0x3f] %v9665_v15  ;;  %v10563_v39 = vpop.permute.xlu0 %3381  ;;  %v9501_v5 = vld [vmem:[%s11522_s1 + $0x170] sm:$0xff]  }
 0x32a   : > { %v2972_v22 = vadd.f32 %v8541_v14, %v10371_v37  ;;  %v2878_v26 = vpop.f32.mrb[25].mxu0  ;;  %3880 = vrot.lane.b32.xlu0 %v9493_v44, %s9664_s17  ;;  %3882 = vrot.lane.b32.xlu1 %v9494_v45, %s9664_s17  ;;  %v9502_v7 = vld [vmem:[%s11522_s1 + $0x178] sm:$0xff]   ;;  %v9503_v9 = vld [vmem:[%s11522_s1 + $0x180] sm:$0xff]  }
 0x32b   : > { %v2970_v27 = vadd.f32 %v10371_v37, %v2878_v26  ;;  %v8542_v16 = vpop.f32.mrb[26].mxu0  ;;  %7858 = vmatprep.subr.bf16.mxu1 %v3028_v13  ;;  %v9505_v13 = vld [vmem:[%s11522_s1 + $0x190] sm:$0xff]   ;;  %v9506_v14 = vld [vmem:[%s11522_s1 + $0x198] sm:$0xff]   ;;  %v9508_v26 = vld [vmem:[%s11522_s1 + $0x1a8] sm:$0xff]  }
 0x32c   : > { %v2973_v4 = vadd.f32 %v8542_v16, %v10371_v37  ;;  %v2881_v17 = vpop.f32.mrb[27].mxu0  ;;  %7859 = vmatpush3.bf16.msra.mxu1 %v10419_v0  ;;  %v3004_v25 = vmax.f32 %v2972_v22, 0.0  ;;  %v9507_v22 = vld [vmem:[%s11522_s1 + $0x1a0] sm:$0xff]   ;;  %v9510_v16 = vld [vmem:[%s11522_s1 + $0x1b8] sm:$0xff]  }
 0x32d   : > { %v2971_v24 = vadd.f32 %v10371_v37, %v2881_v17  ;;  %7860 = vmatprep.subr.bf16.mxu1 %v3029_v12  ;;  %v3002_v3 = vmax.f32 %v2970_v27, 0.0  ;;  %v9504_v12 = vld [vmem:[%s11522_s1 + $0x188] sm:$0xff]   ;;  %v9509_v27 = vld [vmem:[%s11522_s1 + $0x1b0] sm:$0xff]  }
 0x32e   : > { %v3005_v47 = vmax.f32 %v2973_v4, 0.0  ;;  %4033 = vrot.lane.b32.xlu0 %v9495_v46, %s9664_s17  ;;  %4035 = vrot.lane.b32.xlu1 %v9496_v52, %s9664_s17  ;;  %v9511_v4 = vld [vmem:[%s11522_s1 + $0x1c0] sm:$0xff]   ;;  %v9512_v17 = vld [vmem:[%s11522_s1 + $0x1c8] sm:$0xff]  }
 0x32f   : > { %v3003_v32 = vmax.f32 %v2971_v24, 0.0  ;;  %v9513_v24 = vld [vmem:[%s11522_s1 + $0x1d0] sm:$0xff]   ;;  %v9524_v46 = vld [vmem:[%s11522_s1 + $0x228] sm:$0xff]  }
 0x330   : > { %v3031_v33 = vpack.c.bf16 %v3005_v47, %v3004_v25  ;;  %7861 = vmatpush3.bf16.msra.mxu1 %v10417_v8  ;;  %v9514_v25 = vld [vmem:[%s11522_s1 + $0x1d8] sm:$0xff]   ;;  %v9515_v47 = vld [vmem:[%s11522_s1 + $0x1e0] sm:$0xff]  }
 0x331   : > { %v3030_v49 = vpack.c.bf16 %v3003_v32, %v3002_v3  ;;  %v8545_v54 = vpop.f32.mrb[28].mxu0  ;;  %v9516_v3 = vld [vmem:[%s11522_s1 + $0x1e8] sm:$0xff]   ;;  %v9517_v32 = vld [vmem:[%s11522_s1 + $0x1f0] sm:$0xff]  }
 0x332   : > { %v2976_v55 = vadd.f32 %v8545_v54, %v10371_v37  ;;  %v2894_v60 = vpop.f32.mrb[29].mxu0  ;;  %4037 = vrot.lane.b32.xlu0 %v9497_v56, %s9664_s17  ;;  %4039 = vrot.lane.b32.xlu1 %v9498_v57, %s9664_s17  ;;  %v9519_v54 = vld [vmem:[%s11522_s1 + $0x200] sm:$0xff]   ;;  %v9525_v57 = vld [vmem:[%s11522_s1 + $0x230] sm:$0xff]  }
 0x333   : > { %v2974_v61 = vadd.f32 %v10371_v37, %v2894_v60  ;;  %v8546_v2 = vpop.f32.mrb[30].mxu0  ;;  %7862 = vmatprep.subr.bf16.mxu1 %v3030_v49 }
 0x334   : > { %v2977_v0 = vadd.f32 %v8546_v2, %v10371_v37  ;;  %v2897_v21 = vpop.f32.mrb[31].mxu0  ;;  %7863 = vmatpush3.bf16.msra.mxu1 %v10443_v42  ;;  %v3008_v35 = vmax.f32 %v2976_v55, 0.0  ;;  %v9449_v42 = vld [vmem:[%s11523_s2 + $0x24] ss:$8 sps:$4 sm:$0xff]  }
 0x335   : > { %v2975_v23 = vadd.f32 %v10371_v37, %v2897_v21  ;;  %7864 = vmatprep.subr.bf16.mxu1 %v3031_v33  ;;  %v3006_v8 = vmax.f32 %v2974_v61, 0.0  ;;  %v9446_v37 = vld [vmem:[%s11523_s2 + $0x14] ss:$8 sps:$4 sm:$0xff]   ;;  %v9520_v21 = vld [vmem:[%s11522_s1 + $0x208] sm:$0xff]  }
 0x336   : > { %v3009_v53 = vmax.f32 %v2977_v0, 0.0  ;;  %4041 = vrot.lane.b32.xlu0 %v9499_v62, %s9664_s17  ;;  %4043 = vrot.lane.b32.xlu1 %v9500_v63, %s9664_s17  ;;  %v9518_v33 = vld [vmem:[%s11522_s1 + $0x1f8] sm:$0xff]   ;;  %v3386_v63 = vpop.permute.xlu0 %3385 }
 0x337   : > { %v3007_v1 = vmax.f32 %v2975_v23, 0.0 }
 0x338   : > { %v3033_v10 = vpack.c.bf16 %v3009_v53, %v3008_v35  ;;  %7865 = vmatpush3.bf16.msra.mxu1 %v10441_v40  ;;  %v9448_v40 = vld [vmem:[%s11523_s2 + $0x10] ss:$8 sps:$4 sm:$0xff]  }
 0x339   : > { %v3032_v18 = vpack.c.bf16 %v3007_v1, %v3006_v8  ;;  %v9521_v35 = vld [vmem:[%s11522_s1 + $0x210] sm:$0xff]   ;;  %v3184_v8 = vld [vmem:[#allocation2 + $0x1] sm:$0xff] }
 0x33a   : > { %4045 = vrot.lane.b32.xlu0 %v9501_v5, %s9664_s17  ;;  %4047 = vrot.lane.b32.xlu1 %v9502_v7, %s9664_s17 }
 0x33b   : > { %7866 = vmatprep.subr.bf16.mxu1 %v3032_v18 }
 0x33c   : > { %7867 = vmatpush3.bf16.msra.mxu1 %v10467_v48  ;;  %v3257_v48 = vpop.permute.xlu1 %3256 }
 0x33d   : > { %7868 = vmatprep.subr.bf16.mxu1 %v3033_v10 }
 0x33e   : > { %4198 = vrot.lane.b32.xlu0 %v9503_v9, %s9664_s17  ;;  %4200 = vrot.lane.b32.xlu1 %v9504_v12, %s9664_s17 }
 0x340   : > { %7869 = vmatpush3.bf16.msra.mxu1 %v10465_v38  ;;  %v9452_v38 = vld [vmem:[%s11523_s2 + $0x34] ss:$8 sps:$4 sm:$0xff]   ;;  %v3259_v51 = vpop.permute.xlu1 %3258 }
 0x341   : > { %8547 = vmatprep.subr.bf16.mxu1 %v3253_v30 }
 0x342   : > { %4202 = vrot.lane.b32.xlu0 %v9505_v13, %s9664_s17  ;;  %4204 = vrot.lane.b32.xlu1 %v9506_v14, %s9664_s17 }
 0x343   : > { %3107 = vmatmul.mubr.bf16.vlgmr.msra.gmra.mrb[0].mxu1 %v9443_v20 }
 0x344   : > { %3114 = vmatprep.mubr.bf16.mxu1 %v9446_v37  ;;  %8548 = vmatpush3.bf16.msra.mxu1 %v3253_v30  ;;  %v3263_v19 = vpop.permute.xlu1 %3262 }
 0x345   : > { %8549 = vmatprep.subr.bf16.mxu1 %v3255_v41 }
 0x346   : > { %4206 = vrot.lane.b32.xlu0 %v9507_v22, %s9664_s17  ;;  %4208 = vrot.lane.b32.xlu1 %v9508_v26, %s9664_s17 }
 0x348   : > { %8550 = vmatpush3.bf16.msra.mxu1 %v3255_v41  ;;  %v3267_v34 = vpop.permute.xlu1 %3266 }
 0x349   : > { %8551 = vmatprep.subr.bf16.mxu1 %v3257_v48 }
 0x34a   : > { %4210 = vrot.lane.b32.xlu0 %v9509_v27, %s9664_s17  ;;  %4212 = vrot.lane.b32.xlu1 %v9510_v16, %s9664_s17 }
 0x34b   : > { %3115 = vmatmul.mubr.bf16.gmra.mrb[4].mxu1 %v9448_v40 }
 0x34c   : > { %3122 = vmatprep.mubr.bf16.mxu1 %v9449_v42  ;;  %8552 = vmatpush3.bf16.msra.mxu1 %v3257_v48  ;;  %v9522_v42 = vld [vmem:[%s11522_s1 + $0x218] sm:$0xff]  }
 0x34d   : > { %8553 = vmatprep.subr.bf16.mxu1 %v3259_v51 }
 0x34e   : > { %4363 = vrot.lane.b32.xlu0 %v9511_v4, %s9664_s17  ;;  %4365 = vrot.lane.b32.xlu1 %v9512_v17, %s9664_s17  ;;  %v9526_v4 = vld [vmem:[%s11522_s1 + $0x238] sm:$0xff]  }
 0x350   : > { %8554 = vmatpush3.bf16.msra.mxu1 %v3259_v51  ;;  %v9523_v51 = vld [vmem:[%s11522_s1 + $0x220] sm:$0xff]  }
 0x351   : > { %8555 = vmatprep.subr.bf16.mxu1 %v3261_v58 }
 0x352   : > { %4367 = vrot.lane.b32.xlu0 %v9513_v24, %s9664_s17  ;;  %4369 = vrot.lane.b32.xlu1 %v9514_v25, %s9664_s17  ;;  %v3390_v24 = vpop.permute.xlu0 %3389 }
 0x353   : > { %3123 = vmatmul.mubr.bf16.gmra.mrb[8].mxu1 %v9451_v28 }
 0x354   : > { %3130 = vmatprep.mubr.bf16.mxu1 %v9452_v38  ;;  %8556 = vmatpush3.bf16.msra.mxu1 %v3261_v58 }
 0x355   : > { %8557 = vmatprep.subr.bf16.mxu1 %v3263_v19 }
 0x356   : > { %4371 = vrot.lane.b32.xlu0 %v9515_v47, %s9664_s17  ;;  %4373 = vrot.lane.b32.xlu1 %v9516_v3, %s9664_s17 }
 0x358   : > { %8558 = vmatpush3.bf16.msra.mxu1 %v3263_v19 }
 0x359   : > { %8559 = vmatprep.subr.bf16.mxu1 %v3265_v11 }
 0x35a   : > { %4375 = vrot.lane.b32.xlu0 %v9517_v32, %s9664_s17  ;;  %4377 = vrot.lane.b32.xlu1 %v9518_v33, %s9664_s17 }
 0x35b   : > { %3131 = vmatmul.mubr.bf16.gmra.mrb[12].mxu1 %v9454_v50 }
 0x35c   : > { %8560 = vmatpush3.bf16.msra.mxu1 %v3265_v11 }
 0x35d   : > { %8561 = vmatprep.subr.bf16.mxu1 %v3267_v34 }
 0x35e   : > { %4528 = vrot.lane.b32.xlu0 %v9519_v54, %s9664_s17  ;;  %4530 = vrot.lane.b32.xlu1 %v9520_v21, %s9664_s17 }
 0x360   : > { %8562 = vmatpush3.bf16.msra.mxu1 %v3267_v34  ;;  %v3384_v34 = vpop.permute.xlu1 %3383 }
 0x361   : > { %8571 = vmatprep.subr.bf16.mxu1 %v10563_v39 }
 0x362   : > { %4532 = vrot.lane.b32.xlu0 %v9521_v35, %s9664_s17  ;;  %4534 = vrot.lane.b32.xlu1 %v9522_v42, %s9664_s17 }
 0x364   : > { %v3388_v14 = vpop.permute.xlu1 %3387 }
 0x366   : > { %4536 = vrot.lane.b32.xlu0 %v9523_v51, %s9664_s17  ;;  %4538 = vrot.lane.b32.xlu1 %v9524_v46, %s9664_s17 }
 0x368   : > { %v3392_v33 = vpop.permute.xlu1 %3391 }
 0x36a   : > { %4540 = vrot.lane.b32.xlu0 %v9525_v57, %s9664_s17  ;;  %4542 = vrot.lane.b32.xlu1 %v9526_v4, %s9664_s17 }
 0x36c   : > { %v3396_v54 = vpop.permute.xlu1 %3395 }
 0x370   : > { %v3541_v35 = vpop.permute.xlu1 %3540 }
 0x416   : > { %v7870_v49 = vpop.f32.mrb[0].mxu1 }
 0x417   : > { %v7871_v55 = vpop.f32.mrb[1].mxu1 }
 0x418   : > { %v7872_v60 = vadd.f32 %v7871_v55, %v7870_v49  ;;  %v7873_v61 = vpop.f32.mrb[2].mxu1  ;;  %v3394_v49 = vpop.permute.xlu0 %3393 }
 0x419   : > { %v7874_v2 = vpop.f32.mrb[3].mxu1 }
 0x41a   : > { %3141 = vst.msk [vmem:[#allocation2 + $0x11] sm:$0xff] %vm3140_vm0, %v7872_v60  ;;  %v7875_v0 = vadd.f32 %v7874_v2, %v7873_v61 }
 0x41c   : > { %3143 = vst.msk [vmem:[#allocation2 + $0x21] sm:$0xff] %vm3140_vm0, %v7875_v0  ;;  %v3539_v55 = vpop.permute.xlu0 %3538 }
 0x41e   : > { %v7876_v23 = vpop.f32.mrb[4].mxu1 }
 0x41f   : > { %v7877_v53 = vpop.f32.mrb[5].mxu1 }
 0x420   : > { %v7878_v1 = vadd.f32 %v7877_v53, %v7876_v23  ;;  %v7879_v10 = vpop.f32.mrb[6].mxu1  ;;  %v3543_v53 = vpop.permute.xlu0 %3542 }
 0x421   : > { %v7880_v18 = vpop.f32.mrb[7].mxu1  ;;  %v10688_v20 = vld [vmem:[#allocation2 + $0x11] sm:$0xff] }
 0x422   : > { %3145 = vst.msk [vmem:[#allocation2 + $0x31] sm:$0xff] %vm3140_vm0, %v7878_v1  ;;  %v7881_v37 = vadd.f32 %v7880_v18, %v7879_v10  ;;  %v3192_v40 = vpack.c.bf16 %v10688_v20, %v3184_v8  ;;  %v10697_v30 = vld [vmem:[#allocation2 + $0x12] sm:$0xff]  ;;  %v3470_v10 = vld [vmem:[#allocation2 + $0x2] sm:$0xff] }
 0x423   : > { %v10695_v28 = vld [vmem:[#allocation2 + $0x21] sm:$0xff]  ;;  %v10762_v25 = vld [vmem:[#allocation2 + $0x10] sm:$0xff] }
 0x424   : > { %v10699_v38 = vld [vmem:[#allocation2 + $0x22] sm:$0xff]  ;;  %3147 = vst.msk [vmem:[#allocation2 + $0x41] sm:$0xff] %vm3140_vm0, %v7881_v37  ;;  %8563 = vmatprep.mubr.bf16.mxu1 %v3192_v40  ;;  %v3808_v48 = vpack.c.bf16 %v10695_v28, %v10688_v20  ;;  %v3164_v32 = vpack.c.bf16 %v10762_v25, %v9665_v15  ;;  %v3478_v37 = vpack.c.bf16 %v10697_v30, %v3470_v10  ;;  %v3545_v40 = vpop.permute.xlu1 %3544  ;;  %v3547_v42 = vpop.permute.xlu0 %3546 }
 0x425   : > { %v3973_v41 = vpack.c.bf16 %v10699_v38, %v10697_v30  ;;  %v3158_v2 = vld [vmem:[#allocation2 + $0x20] sm:$0xff] }
 0x426   : > { %v7882_v50 = vpop.f32.mrb[8].mxu1  ;;  %v3643_v57 = vpack.c.bf16 %v3158_v2, %v10762_v25 }
 0x427   : > { %v7883_v6 = vpop.f32.mrb[9].mxu1 }
 0x428   : > { %v7884_v58 = vadd.f32 %v7883_v6, %v7882_v50  ;;  %v7885_v59 = vpop.f32.mrb[10].mxu1  ;;  %v3549_v50 = vpop.permute.xlu1 %3548 }
 0x429   : > { %v10711_v19 = vld [vmem:[#allocation2 + $0x31] sm:$0xff]  ;;  %v7886_v29 = vpop.f32.mrb[11].mxu1  ;;  %v3551_v51 = vpop.permute.xlu0 %3550 }
 0x42a   : > { %3149 = vst.msk [vmem:[#allocation2 + $0x51] sm:$0xff] %vm3140_vm0, %v7884_v58  ;;  %v10716_v11 = vpack.c.bf16 %v10711_v19, %v10695_v28  ;;  %v7887_v31 = vadd.f32 %v7886_v29, %v7885_v59  ;;  %v10720_v43 = vld [vmem:[#allocation2 + $0x32] sm:$0xff] }
 0x42b   : > { %v10718_v36 = vld [vmem:[#allocation2 + $0x41] sm:$0xff]  ;;  %v10773_v60 = vld [vmem:[#allocation2 + $0x30] sm:$0xff]  ;;  %v10800_v59 = vpack.c.bf16 %v10720_v43, %v10699_v38 }
 0x42c   : > { %v10722_v44 = vld [vmem:[#allocation2 + $0x42] sm:$0xff]  ;;  %8564 = vmatmul.mubr.bf16.vlgmr.msra.gmra.mrb[16].mxu1 %v10716_v11  ;;  %3151 = vst.msk [vmem:[#allocation2 + $0x61] sm:$0xff] %vm3140_vm0, %v7887_v31  ;;  %v3809_v45 = vpack.c.bf16 %v10718_v36, %v10711_v19  ;;  %v10778_v0 = vpack.c.bf16 %v10773_v60, %v3158_v2  ;;  %v3553_v6 = vpop.permute.xlu1 %3552 }
 0x42d   : > { %v3974_v52 = vpack.c.bf16 %v10722_v44, %v10720_v43  ;;  %8572 = vmatpush3.bf16.msra.mxu1 %v10563_v39  ;;  %v10780_v21 = vld [vmem:[#allocation2 + $0x40] sm:$0xff]  ;;  %v3704_v58 = vpop.permute.xlu0 %3703  ;;  %v9527_v19 = vld [vmem:[%s11522_s1 + $0x48] sm:$0xff]  }
 0x42e   : > { %v7888_v56 = vpop.f32.mrb[12].mxu1  ;;  %8573 = vmatprep.subr.bf16.mxu1 %v3384_v34  ;;  %4812 = vrot.lane.b32.xlu1 %v9527_v19, %s9666_s22  ;;  %v9573_v19 = vld [vmem:[%s11522_s1 + $0x90] sm:$0xff]  }
 0x42f   : > { %v7889_v62 = vpop.f32.mrb[13].mxu1 }
 0x430   : > { %v7890_v5 = vadd.f32 %v7889_v62, %v7888_v56  ;;  %v7891_v7 = vpop.f32.mrb[14].mxu1  ;;  %v3706_v31 = vpop.permute.xlu1 %3705 }
 0x431   : > { %8574 = vmatpush3.bf16.msra.mxu1 %v3384_v34  ;;  %v10739_v9 = vld [vmem:[#allocation2 + $0x51] sm:$0xff]  ;;  %v7892_v12 = vpop.f32.mrb[15].mxu1  ;;  %v3708_v34 = vpop.permute.xlu0 %3707 }
 0x432   : > { %3153 = vst.msk [vmem:[#allocation2 + $0x71] sm:$0xff] %vm3140_vm0, %v7890_v5  ;;  %8575 = vmatprep.subr.bf16.mxu1 %v3386_v63  ;;  %v10744_v39 = vpack.c.bf16 %v10739_v9, %v10718_v36  ;;  %v7893_v13 = vadd.f32 %v7892_v12, %v7891_v7  ;;  %v10748_v26 = vld [vmem:[#allocation2 + $0x52] sm:$0xff] }
 0x433   : > { %v10746_v22 = vld [vmem:[#allocation2 + $0x61] sm:$0xff]  ;;  %v10775_v61 = vld [vmem:[#allocation2 + $0x50] sm:$0xff]  ;;  %v10804_v29 = vpack.c.bf16 %v10748_v26, %v10722_v44  ;;  %v9528_v36 = vld [vmem:[%s11522_s1 + $0x58] sm:$0xff]  }
 0x434   : > { %v10750_v27 = vld [vmem:[#allocation2 + $0x62] sm:$0xff]  ;;  %8567 = vmatprep.mubr.bf16.mxu1 %v10744_v39  ;;  %3155 = vst.msk [vmem:[#allocation2 + $0x81] sm:$0xff] %vm3140_vm0, %v7893_v13  ;;  %v3810_v16 = vpack.c.bf16 %v10746_v22, %v10739_v9  ;;  %v10784_v23 = vpack.c.bf16 %v10775_v61, %v10780_v21  ;;  %v3710_v62 = vpop.permute.xlu1 %3709  ;;  %4816 = vrot.lane.b32.xlu1 %v9528_v36, %s9666_s22 }
 0x435   : > { %v3975_v17 = vpack.c.bf16 %v10750_v27, %v10748_v26  ;;  %8576 = vmatpush3.bf16.msra.mxu1 %v3386_v63  ;;  %v10788_v8 = vld [vmem:[#allocation2 + $0x60] sm:$0xff]  ;;  %v3712_v63 = vpop.permute.xlu0 %3711  ;;  %v9548_v36 = vld [vmem:[%s11522_s1 + $0x148] sm:$0xff]  }
 0x436   : > { %8577 = vmatprep.subr.bf16.mxu1 %v3388_v14  ;;  %v3645_v4 = vpack.c.bf16 %v10788_v8, %v10775_v61 }
 0x438   : > { %v3714_v5 = vpop.permute.xlu1 %3713 }
 0x439   : > { %8578 = vmatpush3.bf16.msra.mxu1 %v3388_v14  ;;  %v10764_v47 = vld [vmem:[#allocation2 + $0x71] sm:$0xff]  ;;  %v3716_v7 = vpop.permute.xlu0 %3715  ;;  %v3644_v14 = vpack.c.bf16 %v10780_v21, %v10773_v60 }
 0x43a   : > { %8579 = vmatprep.subr.bf16.mxu1 %v3390_v24  ;;  %v10768_v3 = vpack.c.bf16 %v10764_v47, %v10746_v22  ;;  %v10790_v1 = vld [vmem:[#allocation2 + $0x70] sm:$0xff] }
 0x43b   : > { %v10794_v18 = vpack.c.bf16 %v10790_v1, %v10788_v8  ;;  %v10808_v46 = vld [vmem:[#allocation2 + $0x72] sm:$0xff]  ;;  %v10833_v28 = vld [vmem:[#allocation2 + $0x81] sm:$0xff] }
 0x43c   : > { %8568 = vmatmul.mubr.bf16.gmra.mrb[20].mxu1 %v10768_v3  ;;  %v10812_v56 = vpack.c.bf16 %v10808_v46, %v10750_v27  ;;  %v3718_v12 = vpop.permute.xlu1 %3717 }
 0x43d   : > { %8580 = vmatpush3.bf16.msra.mxu1 %v3390_v24  ;;  %8587 = vmatprep.mubr.bf16.mxu1 %v3164_v32  ;;  %v3869_v13 = vpop.permute.xlu0 %3868  ;;  %v10820_v32 = vld [vmem:[#allocation2 + $0x80] sm:$0xff] }
 0x43e   : > { %8581 = vmatprep.subr.bf16.mxu1 %v3392_v33 }
 0x440   : > { %v3871_v24 = vpop.permute.xlu1 %3870 }
 0x441   : > { %8582 = vmatpush3.bf16.msra.mxu1 %v3392_v33  ;;  %v3873_v25 = vpop.permute.xlu0 %3872  ;;  %v3646_v33 = vpack.c.bf16 %v10820_v32, %v10790_v1  ;;  %v4141_v1 = vpack.c.bf16 %v9665_v15, %v10820_v32  ;;  %v9541_v32 = vld [vmem:[%s11522_s1 + $0xd8] sm:$0xff]  }
 0x442   : > { %8583 = vmatprep.subr.bf16.mxu1 %v3394_v49 }
 0x445   : > { %8584 = vmatpush3.bf16.msra.mxu1 %v3394_v49  ;;  %v3875_v49 = vpop.permute.xlu1 %3874 }
 0x446   : > { %8585 = vmatprep.subr.bf16.mxu1 %v3396_v54 }
 0x449   : > { %8586 = vmatpush3.bf16.msra.mxu1 %v3396_v54  ;;  %v3877_v54 = vpop.permute.xlu0 %3876 }
 0x44a   : > { %8595 = vmatprep.subr.bf16.mxu1 %v3539_v55 }
 0x44c   : > { %8588 = vmatmul.mubr.bf16.vlgmr.msra.gmra.mrb[16].mxu1 %v10778_v0 }
 0x44d   : > { %8591 = vmatprep.mubr.bf16.mxu1 %v10784_v23  ;;  %8596 = vmatpush3.bf16.msra.mxu1 %v3539_v55  ;;  %v3879_v55 = vpop.permute.xlu1 %3878  ;;  %v3881_v60 = vpop.permute.xlu0 %3880 }
 0x44e   : > { %8597 = vmatprep.subr.bf16.mxu1 %v3541_v35 }
 0x451   : > { %8598 = vmatpush3.bf16.msra.mxu1 %v3541_v35  ;;  %v3883_v61 = vpop.permute.xlu1 %3882  ;;  %v4034_v2 = vpop.permute.xlu0 %4033 }
 0x452   : > { %8599 = vmatprep.subr.bf16.mxu1 %v3543_v53 }
 0x454   : > { %8592 = vmatmul.mubr.bf16.gmra.mrb[20].mxu1 %v10794_v18 }
 0x455   : > { %8600 = vmatpush3.bf16.msra.mxu1 %v3543_v53  ;;  %8611 = vmatprep.mubr.bf16.mxu1 %v3478_v37  ;;  %v4036_v21 = vpop.permute.xlu1 %4035  ;;  %v4038_v20 = vpop.permute.xlu0 %4037 }
 0x456   : > { %8601 = vmatprep.subr.bf16.mxu1 %v3545_v40 }
 0x459   : > { %8602 = vmatpush3.bf16.msra.mxu1 %v3545_v40  ;;  %v4040_v35 = vpop.permute.xlu1 %4039 }
 0x45a   : > { %8603 = vmatprep.subr.bf16.mxu1 %v3547_v42 }
 0x45d   : > { %8604 = vmatpush3.bf16.msra.mxu1 %v3547_v42  ;;  %v4044_v9 = vpop.permute.xlu1 %4043 }
 0x45e   : > { %8605 = vmatprep.subr.bf16.mxu1 %v3549_v50 }
 0x461   : > { %8606 = vmatpush3.bf16.msra.mxu1 %v3549_v50  ;;  %v4048_v30 = vpop.permute.xlu1 %4047 }
 0x462   : > { %8607 = vmatprep.subr.bf16.mxu1 %v3551_v51 }
 0x465   : > { %8608 = vmatpush3.bf16.msra.mxu1 %v3551_v51  ;;  %v4302_v51 = vld [vmem:[#allocation2 + $0x91] sm:$0xff] }
 0x466   : > { %8609 = vmatprep.subr.bf16.mxu1 %v3553_v6 }
 0x469   : > { %8610 = vmatpush3.bf16.msra.mxu1 %v3553_v6  ;;  %v4306_v6 = vpack.c.bf16 %v4302_v51, %v10833_v28  ;;  %v7413_v51 = vld [vmem:[%s11525_s4 + $0x1] ss:$0 sm:$0xff] }
 0x46a   : > { %8619 = vmatprep.subr.bf16.mxu1 %v3704_v58 }
 0x46c   : > { %8612 = vmatmul.mubr.bf16.vlgmr.msra.gmra.mrb[16].mxu1 %v10800_v59 }
 0x46d   : > { %8615 = vmatprep.mubr.bf16.mxu1 %v10804_v29  ;;  %8620 = vmatpush3.bf16.msra.mxu1 %v3704_v58 }
 0x46e   : > { %8621 = vmatprep.subr.bf16.mxu1 %v3706_v31 }
 0x471   : > { %8622 = vmatpush3.bf16.msra.mxu1 %v3706_v31 }
 0x472   : > { %8623 = vmatprep.subr.bf16.mxu1 %v3708_v34 }
 0x474   : > { %8616 = vmatmul.mubr.bf16.gmra.mrb[20].mxu1 %v10812_v56 }
 0x475   : > { %8624 = vmatpush3.bf16.msra.mxu1 %v3708_v34  ;;  %8635 = vmatprep.mubr.bf16.mxu1 %v3643_v57  ;;  %v9529_v57 = vld [vmem:[%s11522_s1 + $0x68] sm:$0xff]  }
 0x476   : > { %8625 = vmatprep.subr.bf16.mxu1 %v3710_v62  ;;  %4820 = vrot.lane.b32.xlu1 %v9529_v57, %s9666_s22 }
 0x479   : > { %8626 = vmatpush3.bf16.msra.mxu1 %v3710_v62  ;;  %v9530_v62 = vld [vmem:[%s11522_s1 + $0x78] sm:$0xff]  }
 0x47a   : > { %8627 = vmatprep.subr.bf16.mxu1 %v3712_v63  ;;  %4824 = vrot.lane.b32.xlu1 %v9530_v62, %s9666_s22 }
 0x47d   : > { %8628 = vmatpush3.bf16.msra.mxu1 %v3712_v63  ;;  %v9533_v63 = vld [vmem:[%s11522_s1 + $0x28] sm:$0xff]  }
 0x47e   : > { %8629 = vmatprep.subr.bf16.mxu1 %v3714_v5 }
 0x481   : > { %8630 = vmatpush3.bf16.msra.mxu1 %v3714_v5  ;;  %v9534_v5 = vld [vmem:[%s11522_s1 + $0x38] sm:$0xff]  }
 0x482   : > { %8631 = vmatprep.subr.bf16.mxu1 %v3716_v7 }
 0x485   : > { %8632 = vmatpush3.bf16.msra.mxu1 %v3716_v7  ;;  %v9535_v7 = vld [vmem:[%s11522_s1 + $0x88] sm:$0xff]  }
 0x486   : > { %8633 = vmatprep.subr.bf16.mxu1 %v3718_v12 }
 0x489   : > { %8634 = vmatpush3.bf16.msra.mxu1 %v3718_v12  ;;  %v9537_v12 = vld [vmem:[%s11522_s1 + $0x98] sm:$0xff]  }
 0x48a   : > { %8643 = vmatprep.subr.bf16.mxu1 %v3869_v13 }
 0x48c   : > { %8636 = vmatmul.mubr.bf16.vlgmr.msra.gmra.mrb[16].mxu1 %v3644_v14  ;;  %v9556_v14 = vld [vmem:[%s11522_s1 + $0x40] sm:$0xff]  }
 0x48d   : > { %8639 = vmatprep.mubr.bf16.mxu1 %v3645_v4  ;;  %8644 = vmatpush3.bf16.msra.mxu1 %v3869_v13  ;;  %v9538_v13 = vld [vmem:[%s11522_s1 + $0xa8] sm:$0xff]   ;;  %v9559_v4 = vld [vmem:[%s11522_s1 + $0x50] sm:$0xff]  }
 0x48e   : > { %8645 = vmatprep.subr.bf16.mxu1 %v3871_v24  ;;  %4810 = vrot.lane.b32.xlu0 %v9556_v14, %s9666_s22 }
 0x491   : > { %8646 = vmatpush3.bf16.msra.mxu1 %v3871_v24  ;;  %v9540_v24 = vld [vmem:[%s11522_s1 + $0xc8] sm:$0xff]  }
 0x492   : > { %8647 = vmatprep.subr.bf16.mxu1 %v3873_v25  ;;  %4814 = vrot.lane.b32.xlu0 %v9559_v4, %s9666_s22 }
 0x494   : > { %8640 = vmatmul.mubr.bf16.gmra.mrb[20].mxu1 %v3646_v33  ;;  %v9565_v33 = vld [vmem:[%s11522_s1 + $0x70] sm:$0xff]  }
 0x495   : > { %8648 = vmatpush3.bf16.msra.mxu1 %v3873_v25  ;;  %8659 = vmatprep.mubr.bf16.mxu1 %v3808_v48  ;;  %v3811_v48 = vpack.c.bf16 %v10833_v28, %v10764_v47  ;;  %v10854_v47 = vld [vmem:[#allocation2 + $0x82] sm:$0xff] }
 0x496   : > { %8649 = vmatprep.subr.bf16.mxu1 %v3875_v49  ;;  %v3976_v53 = vpack.c.bf16 %v10854_v47, %v10808_v46  ;;  %v9562_v25 = vld [vmem:[%s11522_s1 + $0x60] sm:$0xff]   ;;  %v9546_v28 = vld [vmem:[%s11522_s1 + $0x128] sm:$0xff]  }
 0x497   : > { %4818 = vrot.lane.b32.xlu0 %v9562_v25, %s9666_s22 }
 0x499   : > { %8650 = vmatpush3.bf16.msra.mxu1 %v3875_v49  ;;  %v9542_v49 = vld [vmem:[%s11522_s1 + $0xe8] sm:$0xff]  }
 0x49a   : > { %8651 = vmatprep.subr.bf16.mxu1 %v3877_v54 }
 0x49b   : > { %4822 = vrot.lane.b32.xlu0 %v9565_v33, %s9666_s22 }
 0x49d   : > { %8652 = vmatpush3.bf16.msra.mxu1 %v3877_v54  ;;  %v9568_v54 = vld [vmem:[%s11522_s1] sm:$0xff]  }
 0x49e   : > { %8653 = vmatprep.subr.bf16.mxu1 %v3879_v55 }
 0x49f   : > { %4915 = vrot.lane.b32.xlu0 %v9568_v54, %s9666_s22 }
 0x4a1   : > { %8654 = vmatpush3.bf16.msra.mxu1 %v3879_v55  ;;  %v9543_v55 = vld [vmem:[%s11522_s1 + $0xf8] sm:$0xff]  }
 0x4a2   : > { %8655 = vmatprep.subr.bf16.mxu1 %v3881_v60 }
 0x4a5   : > { %8656 = vmatpush3.bf16.msra.mxu1 %v3881_v60  ;;  %v9569_v60 = vld [vmem:[%s11522_s1 + $0x10] sm:$0xff]  }
 0x4a6   : > { %8657 = vmatprep.subr.bf16.mxu1 %v3883_v61  ;;  %4919 = vrot.lane.b32.xlu0 %v9569_v60, %s9666_s22 }
 0x4a9   : > { %8658 = vmatpush3.bf16.msra.mxu1 %v3883_v61  ;;  %v9544_v61 = vld [vmem:[%s11522_s1 + $0x108] sm:$0xff]  }
 0x4aa   : > { %8667 = vmatprep.subr.bf16.mxu1 %v4034_v2 }
 0x4ac   : > { %8660 = vmatmul.mubr.bf16.vlgmr.msra.gmra.mrb[16].mxu1 %v3809_v45  ;;  %v4042_v45 = vpop.permute.xlu0 %4041 }
 0x4ad   : > { %8663 = vmatprep.mubr.bf16.mxu1 %v3810_v16  ;;  %8668 = vmatpush3.bf16.msra.mxu1 %v4034_v2  ;;  %v9570_v2 = vld [vmem:[%s11522_s1 + $0x20] sm:$0xff]  }
 0x4ae   : > { %8669 = vmatprep.subr.bf16.mxu1 %v4036_v21  ;;  %4923 = vrot.lane.b32.xlu0 %v9570_v2, %s9666_s22 }
 0x4b0   : > { %v4046_v22 = vpop.permute.xlu0 %4045 }
 0x4b1   : > { %8670 = vmatpush3.bf16.msra.mxu1 %v4036_v21  ;;  %v9545_v21 = vld [vmem:[%s11522_s1 + $0x118] sm:$0xff]  }
 0x4b2   : > { %8671 = vmatprep.subr.bf16.mxu1 %v4038_v20 }
 0x4b4   : > { %8664 = vmatmul.mubr.bf16.gmra.mrb[20].mxu1 %v3811_v48  ;;  %v4199_v38 = vpop.permute.xlu0 %4198  ;;  %v9572_v48 = vld [vmem:[%s11522_s1 + $0x80] sm:$0xff]  }
 0x4b5   : > { %8672 = vmatpush3.bf16.msra.mxu1 %v4038_v20  ;;  %8683 = vmatprep.mubr.bf16.mxu1 %v3973_v41  ;;  %v4201_v41 = vpop.permute.xlu1 %4200  ;;  %v9571_v20 = vld [vmem:[%s11522_s1 + $0x30] sm:$0xff]  }
 0x4b6   : > { %8673 = vmatprep.subr.bf16.mxu1 %v4040_v35  ;;  %4927 = vrot.lane.b32.xlu0 %v9571_v20, %s9666_s22 }
 0x4b8   : > { %v4203_v16 = vpop.permute.xlu0 %4202 }
 0x4b9   : > { %8674 = vmatpush3.bf16.msra.mxu1 %v4040_v35  ;;  %v4205_v8 = vpop.permute.xlu1 %4204  ;;  %v9547_v35 = vld [vmem:[%s11522_s1 + $0x138] sm:$0xff]  }
 0x4ba   : > { %8675 = vmatprep.subr.bf16.mxu1 %v4042_v45  ;;  %5049 = vrot.lane.b32.xlu0 %v9572_v48, %s9666_s22 }
 0x4bc   : > { %v4207_v43 = vpop.permute.xlu0 %4206 }
 0x4bd   : > { %8676 = vmatpush3.bf16.msra.mxu1 %v4042_v45  ;;  %v4209_v44 = vpop.permute.xlu1 %4208  ;;  %v9574_v45 = vld [vmem:[%s11522_s1 + $0xa0] sm:$0xff]  }
 0x4be   : > { %8677 = vmatprep.subr.bf16.mxu1 %v4044_v9  ;;  %5053 = vrot.lane.b32.xlu0 %v9573_v19, %s9666_s22 }
 0x4c1   : > { %8678 = vmatpush3.bf16.msra.mxu1 %v4044_v9  ;;  %v4213_v26 = vpop.permute.xlu1 %4212  ;;  %v9549_v9 = vld [vmem:[%s11522_s1 + $0x158] sm:$0xff]  }
 0x4c2   : > { %8679 = vmatprep.subr.bf16.mxu1 %v4046_v22  ;;  %5057 = vrot.lane.b32.xlu0 %v9574_v45, %s9666_s22 }
 0x4c5   : > { %8680 = vmatpush3.bf16.msra.mxu1 %v4046_v22  ;;  %v9575_v22 = vld [vmem:[%s11522_s1 + $0xb0] sm:$0xff]  }
 0x4c6   : > { %8681 = vmatprep.subr.bf16.mxu1 %v4048_v30  ;;  %5061 = vrot.lane.b32.xlu0 %v9575_v22, %s9666_s22 }
 0x4c9   : > { %8682 = vmatpush3.bf16.msra.mxu1 %v4048_v30  ;;  %v9550_v30 = vld [vmem:[%s11522_s1 + $0x168] sm:$0xff]  }
 0x4ca   : > { %8691 = vmatprep.subr.bf16.mxu1 %v4199_v38 }
 0x4cc   : > { %8684 = vmatmul.mubr.bf16.vlgmr.msra.gmra.mrb[16].mxu1 %v3974_v52  ;;  %v4211_v52 = vpop.permute.xlu0 %4210 }
 0x4cd   : > { %8687 = vmatprep.mubr.bf16.mxu1 %v3975_v17  ;;  %8692 = vmatpush3.bf16.msra.mxu1 %v4199_v38  ;;  %v4366_v17 = vpop.permute.xlu1 %4365  ;;  %v9576_v38 = vld [vmem:[%s11522_s1 + $0xc0] sm:$0xff]  }
 0x4ce   : > { %8693 = vmatprep.subr.bf16.mxu1 %v4201_v41  ;;  %5185 = vrot.lane.b32.xlu0 %v9576_v38, %s9666_s22 }
 0x4d0   : > { %v4364_v27 = vpop.permute.xlu0 %4363 }
 0x4d1   : > { %8694 = vmatpush3.bf16.msra.mxu1 %v4201_v41  ;;  %v4370_v10 = vpop.permute.xlu1 %4369  ;;  %v9551_v41 = vld [vmem:[%s11522_s1 + $0x178] sm:$0xff]  }
 0x4d2   : > { %8695 = vmatprep.subr.bf16.mxu1 %v4203_v16 }
 0x4d4   : > { %8688 = vmatmul.mubr.bf16.gmra.mrb[20].mxu1 %v3976_v53  ;;  %v9578_v53 = vld [vmem:[%s11522_s1 + $0xe0] sm:$0xff]  }
 0x4d5   : > { %8696 = vmatpush3.bf16.msra.mxu1 %v4203_v16  ;;  %8707 = vmatprep.mubr.bf16.mxu1 %v10778_v0  ;;  %v4368_v0 = vpop.permute.xlu0 %4367  ;;  %v9577_v16 = vld [vmem:[%s11522_s1 + $0xd0] sm:$0xff]  }
 0x4d6   : > { %8697 = vmatprep.subr.bf16.mxu1 %v4205_v8  ;;  %5189 = vrot.lane.b32.xlu0 %v9577_v16, %s9666_s22 }
 0x4d9   : > { %8698 = vmatpush3.bf16.msra.mxu1 %v4205_v8  ;;  %v4372_v37 = vpop.permute.xlu0 %4371  ;;  %v9553_v8 = vld [vmem:[%s11522_s1 + $0x198] sm:$0xff]  }
 0x4da   : > { %8699 = vmatprep.subr.bf16.mxu1 %v4207_v43  ;;  %5193 = vrot.lane.b32.xlu0 %v9578_v53, %s9666_s22 }
 0x4dd   : > { %8700 = vmatpush3.bf16.msra.mxu1 %v4207_v43  ;;  %v9554_v43 = vld [vmem:[%s11522_s1 + $0x1a8] sm:$0xff]  }
 0x4de   : > { %8701 = vmatprep.subr.bf16.mxu1 %v4209_v44 }
 0x4e1   : > { %8702 = vmatpush3.bf16.msra.mxu1 %v4209_v44  ;;  %v9579_v44 = vld [vmem:[%s11522_s1 + $0xf0] sm:$0xff]  }
 0x4e2   : > { %8703 = vmatprep.subr.bf16.mxu1 %v4211_v52  ;;  %5197 = vrot.lane.b32.xlu0 %v9579_v44, %s9666_s22 }
 0x4e5   : > { %8704 = vmatpush3.bf16.msra.mxu1 %v4211_v52  ;;  %v9555_v52 = vld [vmem:[%s11522_s1 + $0x1b8] sm:$0xff]  }
 0x4e6   : > { %8705 = vmatprep.subr.bf16.mxu1 %v4213_v26 }
 0x4e9   : > { %8706 = vmatpush3.bf16.msra.mxu1 %v4213_v26  ;;  %v9557_v26 = vld [vmem:[%s11522_s1 + $0x200] sm:$0xff]  }
 0x4ea   : > { %8715 = vmatprep.subr.bf16.mxu1 %v4364_v27 }
 0x4ec   : > { %8708 = vmatmul.mubr.bf16.vlgmr.msra.gmra.mrb[16].mxu1 %v10784_v23  ;;  %v4374_v23 = vpop.permute.xlu1 %4373 }
 0x4ed   : > { %8711 = vmatprep.mubr.bf16.mxu1 %v10794_v18  ;;  %8716 = vmatpush3.bf16.msra.mxu1 %v4364_v27  ;;  %v4376_v18 = vpop.permute.xlu0 %4375 }
 0x4ee   : > { %8717 = vmatprep.subr.bf16.mxu1 %v4366_v17 }
 0x4f0   : > { %v4378_v40 = vpop.permute.xlu1 %4377 }
 0x4f1   : > { %8718 = vmatpush3.bf16.msra.mxu1 %v4366_v17  ;;  %v4529_v42 = vpop.permute.xlu0 %4528  ;;  %v9580_v17 = vld [vmem:[%s11522_s1 + $0x100] sm:$0xff]  }
 0x4f2   : > { %8719 = vmatprep.subr.bf16.mxu1 %v4368_v0  ;;  %5321 = vrot.lane.b32.xlu0 %v9580_v17, %s9666_s22 }
 0x4f4   : > { %8712 = vmatmul.mubr.bf16.gmra.mrb[20].mxu1 %v4141_v1  ;;  %v4531_v50 = vpop.permute.xlu1 %4530 }
 0x4f5   : > { %8720 = vmatpush3.bf16.msra.mxu1 %v4368_v0  ;;  %8731 = vmatprep.mubr.bf16.mxu1 %v10716_v11  ;;  %v4533_v11 = vpop.permute.xlu0 %4532  ;;  %v9558_v0 = vld [vmem:[%s11522_s1 + $0x208] sm:$0xff]  }
 0x4f6   : > { %8721 = vmatprep.subr.bf16.mxu1 %v4370_v10 }
 0x4f8   : > { %v4535_v58 = vpop.permute.xlu1 %4534 }
 0x4f9   : > { %8722 = vmatpush3.bf16.msra.mxu1 %v4370_v10  ;;  %v4537_v31 = vpop.permute.xlu0 %4536  ;;  %v9560_v10 = vld [vmem:[%s11522_s1 + $0x210] sm:$0xff]  }
 0x4fa   : > { %8723 = vmatprep.subr.bf16.mxu1 %v4372_v37 }
 0x4fd   : > { %8724 = vmatpush3.bf16.msra.mxu1 %v4372_v37  ;;  %v9561_v37 = vld [vmem:[%s11522_s1 + $0x218] sm:$0xff]  }
 0x4fe   : > { %8725 = vmatprep.subr.bf16.mxu1 %v4374_v23 }
 0x501   : > { %8726 = vmatpush3.bf16.msra.mxu1 %v4374_v23 }
 0x502   : > { %8727 = vmatprep.subr.bf16.mxu1 %v4376_v18 }
 0x505   : > { %8728 = vmatpush3.bf16.msra.mxu1 %v4376_v18  ;;  %v9563_v18 = vld [vmem:[%s11522_s1 + $0x220] sm:$0xff]  }
 0x506   : > { %8729 = vmatprep.subr.bf16.mxu1 %v4378_v40 }
 0x509   : > { %8730 = vmatpush3.bf16.msra.mxu1 %v4378_v40 }
 0x50a   : > { %8739 = vmatprep.subr.bf16.mxu1 %v4529_v42 }
 0x50c   : > { %8732 = vmatmul.mubr.bf16.vlgmr.msra.gmra.mrb[16].mxu1 %v10744_v39  ;;  %v4539_v39 = vpop.permute.xlu1 %4538 }
 0x50d   : > { %8735 = vmatprep.mubr.bf16.mxu1 %v10768_v3  ;;  %8740 = vmatpush3.bf16.msra.mxu1 %v4529_v42  ;;  %v4541_v3 = vpop.permute.xlu0 %4540  ;;  %v9564_v42 = vld [vmem:[%s11522_s1 + $0x228] sm:$0xff]  }
 0x50e   : > { %8741 = vmatprep.subr.bf16.mxu1 %v4531_v50 }
 0x510   : > { %v4543_v34 = vpop.permute.xlu1 %4542 }
 0x511   : > { %8742 = vmatpush3.bf16.msra.mxu1 %v4531_v50 }
 0x512   : > { %8743 = vmatprep.subr.bf16.mxu1 %v4533_v11 }
 0x514   : > { %8736 = vmatmul.mubr.bf16.gmra.mrb[20].mxu1 %v4306_v6  ;;  %v11047_v27 = vpop.permute.xlu1 %4812 }
 0x515   : > { %8744 = vmatpush3.bf16.msra.mxu1 %v4533_v11  ;;  %8755 = vmatprep.mubr.bf16.mxu1 %v10800_v59  ;;  %v4467_v59 = vld [vmem:[#allocation2 + $0x92] sm:$0xff] }
 0x516   : > { %8745 = vmatprep.subr.bf16.mxu1 %v4535_v58  ;;  %v4471_v46 = vpack.c.bf16 %v4467_v59, %v10854_v47  ;;  %v9552_v47 = vld [vmem:[%s11522_s1 + $0x188] sm:$0xff]   ;;  %v9566_v11 = vld [vmem:[%s11522_s1 + $0x230] sm:$0xff]  }
 0x518   : > { %v11058_v1 = vpop.permute.xlu1 %4816 }
 0x519   : > { %8746 = vmatpush3.bf16.msra.mxu1 %v4535_v58 }
 0x51a   : > { %8747 = vmatprep.subr.bf16.mxu1 %v4537_v31 }
 0x51c   : > { %v11067_v23 = vpop.permute.xlu1 %4820 }
 0x51d   : > { %8748 = vmatpush3.bf16.msra.mxu1 %v4537_v31  ;;  %v9567_v31 = vld [vmem:[%s11522_s1 + $0x238] sm:$0xff]  }
 0x51e   : > { %8749 = vmatprep.subr.bf16.mxu1 %v4539_v39 }
 0x520   : > { %v11073_v40 = vpop.permute.xlu1 %4824 }
 0x521   : > { %8750 = vmatpush3.bf16.msra.mxu1 %v4539_v39 }
 0x522   : > { %8751 = vmatprep.subr.bf16.mxu1 %v4541_v3 }
 0x525   : > { %8752 = vmatpush3.bf16.msra.mxu1 %v4541_v3 }
 0x526   : > { %8753 = vmatprep.subr.bf16.mxu1 %v4543_v34 }
 0x529   : > { %8754 = vmatpush3.bf16.msra.mxu1 %v4543_v34 }
 0x52a   : > { %8763 = vmatprep.subr.bf16.mxu1 %v9665_v15 }
 0x52c   : > { %8756 = vmatmul.mubr.bf16.vlgmr.msra.gmra.mrb[16].mxu1 %v10804_v29  ;;  %v9531_v29 = vld [vmem:[%s11522_s1 + $0x8] sm:$0xff]  }
 0x52d   : > { %8759 = vmatprep.mubr.bf16.mxu1 %v10812_v56  ;;  %4917 = vrot.lane.b32.xlu1 %v9531_v29, %s9666_s22  ;;  %v9532_v56 = vld [vmem:[%s11522_s1 + $0x18] sm:$0xff]  }
 0x531   : > { %4921 = vrot.lane.b32.xlu1 %v9532_v56, %s9666_s22 }
 0x534   : > { %8760 = vmatmul.mubr.bf16.gmra.mrb[20].mxu1 %v4471_v46 }
 0x535   : > { %4925 = vrot.lane.b32.xlu1 %v9533_v63, %s9666_s22  ;;  %8771 = vmatprep.mubr.msk.bf16.mxu1 %vm9667_vm1, %v9665_v15  ;;  %v9539_v15 = vld [vmem:[%s11522_s1 + $0xb8] sm:$0xff]  }
 0x539   : > { %4929 = vrot.lane.b32.xlu1 %v9534_v5, %s9666_s22 }
 0x53d   : > { %5051 = vrot.lane.b32.xlu1 %v9535_v7, %s9666_s22 }
 0x541   : > { %5055 = vrot.lane.b32.xlu1 %v9537_v12, %s9666_s22 }
 0x545   : > { %5059 = vrot.lane.b32.xlu1 %v9538_v13, %s9666_s22 }
 0x549   : > { %5063 = vrot.lane.b32.xlu1 %v9539_v15, %s9666_s22 }
 0x54d   : > { %5187 = vrot.lane.b32.xlu1 %v9540_v24, %s9666_s22 }
 0x551   : > { %5191 = vrot.lane.b32.xlu1 %v9541_v32, %s9666_s22 }
 0x555   : > { %5195 = vrot.lane.b32.xlu1 %v9542_v49, %s9666_s22 }
 0x559   : > { %5199 = vrot.lane.b32.xlu1 %v9543_v55, %s9666_s22  ;;  %v11101_v55 = vld [vmem:[#allocation2] sm:$0xff] }
 0x55d   : > { %5323 = vrot.lane.b32.xlu1 %v9544_v61, %s9666_s22 }
 0x561   : > { %5327 = vrot.lane.b32.xlu1 %v9545_v21, %s9666_s22 }
 0x565   : > { %5331 = vrot.lane.b32.xlu1 %v9546_v28, %s9666_s22 }
 0x569   : > { %5335 = vrot.lane.b32.xlu1 %v9547_v35, %s9666_s22 }
 0x56d   : > { %5459 = vrot.lane.b32.xlu1 %v9548_v36, %s9666_s22  ;;  %v9536_v36 = vld [vmem:[%s11523_s2 + $0x40] ss:$8 sps:$4 sm:$0xff]  }
 0x571   : > { %5463 = vrot.lane.b32.xlu1 %v9549_v9, %s9666_s22  ;;  %v4811_v9 = vpop.permute.xlu0 %4810 }
 0x575   : > { %5467 = vrot.lane.b32.xlu1 %v9550_v30, %s9666_s22  ;;  %v4815_v38 = vpop.permute.xlu0 %4814 }
 0x579   : > { %5471 = vrot.lane.b32.xlu1 %v9551_v41, %s9666_s22 }
 0x57d   : > { %5595 = vrot.lane.b32.xlu1 %v9552_v47, %s9666_s22  ;;  %v4819_v47 = vpop.permute.xlu0 %4818 }
 0x581   : > { %5599 = vrot.lane.b32.xlu1 %v9553_v8, %s9666_s22 }
 0x585   : > { %5603 = vrot.lane.b32.xlu1 %v9554_v43, %s9666_s22 }
 0x589   : > { %5607 = vrot.lane.b32.xlu1 %v9555_v52, %s9666_s22 }
 0x58d   : > { %5865 = vrot.lane.b32.xlu1 %v9557_v26, %s9666_s22 }
 0x591   : > { %5867 = vrot.lane.b32.xlu1 %v9558_v0, %s9666_s22 }
 0x595   : > { %5869 = vrot.lane.b32.xlu1 %v9560_v10, %s9666_s22 }
 0x599   : > { %5871 = vrot.lane.b32.xlu1 %v9561_v37, %s9666_s22 }
 0x59d   : > { %5873 = vrot.lane.b32.xlu1 %v9563_v18, %s9666_s22 }
 0x59f   : > { %v11079_v50 = vpop.permute.xlu1 %4917 }
 0x5a1   : > { %5875 = vrot.lane.b32.xlu1 %v9564_v42, %s9666_s22 }
 0x5a3   : > { %v11088_v6 = vpop.permute.xlu1 %4921 }
 0x5a5   : > { %5877 = vrot.lane.b32.xlu1 %v9566_v11, %s9666_s22 }
 0x5a7   : > { %v11094_v46 = vpop.permute.xlu1 %4925 }
 0x5a9   : > { %5879 = vrot.lane.b32.xlu1 %v9567_v31, %s9666_s22 }
 0x5ab   : > { %v11097_v12 = vpop.permute.xlu1 %4929 }
 0x5af   : > { %v11099_v33 = vpop.permute.xlu1 %5051 }
 0x5b3   : > { %v11104_v28 = vpop.permute.xlu1 %5055 }
 0x5b7   : > { %v11107_v19 = vpop.permute.xlu1 %5059 }
 0x5bb   : > { %v11113_v45 = vpop.permute.xlu1 %5063 }
 0x5bf   : > { %v11116_v22 = vpop.permute.xlu1 %5187 }
 0x5c3   : > { %v11121_v30 = vpop.permute.xlu1 %5191 }
 0x5c7   : > { %v11125_v41 = vpop.permute.xlu1 %5195 }
 0x5cb   : > { %v11128_v16 = vpop.permute.xlu1 %5199 }
 0x5cf   : > { %v11132_v53 = vpop.permute.xlu1 %5323 }
 0x5d3   : > { %v11135_v8 = vpop.permute.xlu1 %5327 }
 0x5d7   : > { %v11139_v43 = vpop.permute.xlu1 %5331 }
 0x5db   : > { %v11141_v44 = vpop.permute.xlu1 %5335 }
 0x5df   : > { %v11143_v52 = vpop.permute.xlu1 %5459 }
 0x5e3   : > { %v11145_v26 = vpop.permute.xlu1 %5463 }
 0x5ff   : > { %v8757_v58 = vpop.f32.mrb[16].mxu1 }
 0x600   : > { %v4632_v39 = vadd.f32 %v8757_v58, %v7413_v51  ;;  %v4586_v3 = vpop.f32.mrb[17].mxu1  ;;  %v9581_v58 = vld [vmem:[%s11522_s1 + $0x110] sm:$0xff]  }
 0x601   : > { %v4630_v34 = vadd.f32 %v7413_v51, %v4586_v3  ;;  %v8758_v59 = vpop.f32.mrb[18].mxu1  ;;  %5325 = vrot.lane.b32.xlu0 %v9581_v58, %s9666_s22  ;;  %v9582_v3 = vld [vmem:[%s11522_s1 + $0x120] sm:$0xff]  }
 0x602   : > { %v4633_v57 = vadd.f32 %v8758_v59, %v7413_v51  ;;  %v4589_v62 = vpop.f32.mrb[19].mxu1  ;;  %v4640_v56 = vmax.f32 %v4632_v39, 0.0  ;;  %v4823_v39 = vpop.permute.xlu0 %4822 }
 0x603   : > { %v4631_v29 = vadd.f32 %v7413_v51, %v4589_v62  ;;  %v4638_v5 = vmax.f32 %v4630_v34, 0.0  ;;  %v9588_v62 = vld [vmem:[%s11522_s1 + $0x140] sm:$0xff]  }
 0x604   : > { %v4641_v63 = vmax.f32 %v4633_v57, 0.0  ;;  %v9587_v57 = vld [vmem:[%s11522_s1 + $0x130] sm:$0xff]  }
 0x605   : > { %v4639_v7 = vmax.f32 %v4631_v29, 0.0  ;;  %5329 = vrot.lane.b32.xlu0 %v9582_v3, %s9666_s22  ;;  %v9590_v29 = vld [vmem:[%s11522_s1 + $0x160] sm:$0xff]  }
 0x606   : > { %v4649_v13 = vpack.c.bf16 %v4641_v63, %v4640_v56  ;;  %v9593_v56 = vld [vmem:[%s11522_s1 + $0x170] sm:$0xff]   ;;  %v9594_v63 = vld [vmem:[%s11522_s1 + $0x180] sm:$0xff]  }
 0x607   : > { %v4648_v14 = vpack.c.bf16 %v4639_v7, %v4638_v5  ;;  %v8761_v15 = vpop.f32.mrb[20].mxu1  ;;  %v9595_v5 = vld [vmem:[%s11522_s1 + $0x190] sm:$0xff]   ;;  %v9596_v7 = vld [vmem:[%s11522_s1 + $0x1a0] sm:$0xff]  }
 0x608   : > { %v4636_v4 = vadd.f32 %v8761_v15, %v7413_v51  ;;  %v4602_v24 = vpop.f32.mrb[21].mxu1  ;;  %v9601_v15 = vld [vmem:[%s11522_s1 + $0x1c8] sm:$0xff]  }
 0x609   : > { %v4634_v25 = vadd.f32 %v7413_v51, %v4602_v24  ;;  %v8762_v32 = vpop.f32.mrb[22].mxu1  ;;  %8764 = vmatpush3.bf16.msra.mxu1 %v4648_v14  ;;  %5333 = vrot.lane.b32.xlu0 %v9587_v57, %s9666_s22  ;;  %v9600_v14 = vld [vmem:[%s11522_s1 + $0x1c0] sm:$0xff]   ;;  %v9603_v24 = vld [vmem:[%s11522_s1 + $0x1d8] sm:$0xff]  }
 0x60a   : > { %v4637_v49 = vadd.f32 %v8762_v32, %v7413_v51  ;;  %v4605_v54 = vpop.f32.mrb[23].mxu1  ;;  %8765 = vmatprep.subr.bf16.mxu1 %v11101_v55  ;;  %v4644_v61 = vmax.f32 %v4636_v4, 0.0  ;;  %v9602_v4 = vld [vmem:[%s11522_s1 + $0x1d0] sm:$0xff]   ;;  %v9607_v32 = vld [vmem:[%s11522_s1 + $0x1e8] sm:$0xff]  }
 0x60b   : > { %v4635_v60 = vadd.f32 %v7413_v51, %v4605_v54  ;;  %v4642_v21 = vmax.f32 %v4634_v25, 0.0  ;;  %v9604_v25 = vld [vmem:[%s11522_s1 + $0x1e0] sm:$0xff]   ;;  %v9609_v54 = vld [vmem:[%s11522_s1 + $0x1f8] sm:$0xff]  }
 0x60c   : > { %v4645_v2 = vmax.f32 %v4637_v49, 0.0  ;;  %v9608_v49 = vld [vmem:[%s11522_s1 + $0x1f0] sm:$0xff]  }
 0x60d   : > { %v4643_v20 = vmax.f32 %v4635_v60, 0.0  ;;  %8766 = vmatpush3.bf16.msra.mxu1 %v4649_v13  ;;  %5457 = vrot.lane.b32.xlu0 %v9588_v62, %s9666_s22  ;;  %v9599_v13 = vld [vmem:[%s11522_s1 + $0x1b0] sm:$0xff]  }
 0x60e   : > { %v4651_v48 = vpack.c.bf16 %v4645_v2, %v4644_v61  ;;  %8767 = vmatprep.subr.bf16.mxu1 %v11101_v55 }
 0x60f   : > { %v4650_v35 = vpack.c.bf16 %v4643_v20, %v4642_v21 }
 0x611   : > { %8768 = vmatpush3.bf16.msra.mxu1 %v4650_v35 }
 0x612   : > { %8769 = vmatprep.subr.bf16.mxu1 %v11101_v55 }
 0x615   : > { %8770 = vmatpush3.bf16.msra.mxu1 %v4651_v48 }
 0x616   : > { %8775 = vmatprep.subr.bf16.mxu1 %v11101_v55 }
 0x618   : > { %8772 = vmatmul.mubr.msk.bf16.vlgmr.msra.gmra.mrb[24].mxu1 %vm4657_vm2, %v9536_v36 }
 0x619   : > { %8776 = vmatpush3.bf16.msra.mxu1 %v4811_v9  ;;  %8791 = vmatprep.mubr.msk.bf16.mxu1 %vm9667_vm1, %v11101_v55  ;;  %v4916_v9 = vpop.permute.xlu0 %4915 }
 0x61a   : > { %8777 = vmatprep.subr.bf16.mxu1 %v11101_v55 }
 0x61d   : > { %8778 = vmatpush3.bf16.msra.mxu1 %v11047_v27  ;;  %v11147_v27 = vpop.permute.xlu1 %5467 }
 0x61e   : > { %8779 = vmatprep.subr.bf16.mxu1 %v11101_v55 }
 0x621   : > { %8780 = vmatpush3.bf16.msra.mxu1 %v4815_v38  ;;  %v11149_v17 = vpop.permute.xlu1 %5471 }
 0x622   : > { %8781 = vmatprep.subr.bf16.mxu1 %v11101_v55 }
 0x625   : > { %8782 = vmatpush3.bf16.msra.mxu1 %v11058_v1  ;;  %v11151_v0 = vpop.permute.xlu1 %5595 }
 0x626   : > { %8783 = vmatprep.subr.bf16.mxu1 %v11101_v55 }
 0x629   : > { %8784 = vmatpush3.bf16.msra.mxu1 %v4819_v47  ;;  %v11153_v1 = vpop.permute.xlu1 %5599 }
 0x62a   : > { %8785 = vmatprep.subr.bf16.mxu1 %v11101_v55 }
 0x62d   : > { %8786 = vmatpush3.bf16.msra.mxu1 %v11067_v23  ;;  %v11155_v10 = vpop.permute.xlu1 %5603 }
 0x62e   : > { %8787 = vmatprep.subr.bf16.mxu1 %v11101_v55 }
 0x631   : > { %v11157_v37 = vpop.permute.xlu1 %5607  ;;  %8788 = vmatpush3.bf16.msra.mxu1 %v4823_v39 }
 0x632   : > { %8789 = vmatprep.subr.bf16.mxu1 %v11101_v55 }
 0x635   : > { %v5866_v23 = vpop.permute.xlu1 %5865  ;;  %8790 = vmatpush3.bf16.msra.mxu1 %v11073_v40  ;;  %v9589_v40 = vld [vmem:[%s11522_s1 + $0x150] sm:$0xff]  }
 0x636   : > { %8936 = vmatpush3.bf16.msra.mxu0 %v5866_v23  ;;  %8795 = vmatprep.subr.bf16.mxu1 %v11101_v55  ;;  %v4920_v23 = vpop.permute.xlu0 %4919 }
 0x637   : > { %8937 = vmatprep.subr.bf16.mxu0 %v11101_v55  ;;  %5461 = vrot.lane.b32.xlu0 %v9589_v40, %s9666_s22 }
 0x639   : > { %v5868_v18 = vpop.permute.xlu1 %5867 }
 0x63a   : > { %8938 = vmatpush3.bf16.msra.mxu0 %v5868_v18  ;;  %v4924_v18 = vpop.permute.xlu0 %4923 }
 0x63b   : > { %8939 = vmatprep.subr.bf16.mxu0 %v11101_v55  ;;  %5465 = vrot.lane.b32.xlu0 %v9590_v29, %s9666_s22 }
 0x63d   : > { %v5870_v42 = vpop.permute.xlu1 %5869 }
 0x63e   : > { %8940 = vmatpush3.bf16.msra.mxu0 %v5870_v42  ;;  %v4928_v42 = vpop.permute.xlu0 %4927 }
 0x63f   : > { %8941 = vmatprep.subr.bf16.mxu0 %v11101_v55  ;;  %5469 = vrot.lane.b32.xlu0 %v9593_v56, %s9666_s22 }
 0x641   : > { %v5872_v11 = vpop.permute.xlu1 %5871 }
 0x642   : > { %8942 = vmatpush3.bf16.msra.mxu0 %v5872_v11 }
 0x643   : > { %8943 = vmatprep.subr.bf16.mxu0 %v11101_v55  ;;  %5593 = vrot.lane.b32.xlu0 %v9594_v63, %s9666_s22 }
 0x645   : > { %v5874_v51 = vpop.permute.xlu1 %5873 }
 0x646   : > { %8944 = vmatpush3.bf16.msra.mxu0 %v5874_v51  ;;  %v5050_v51 = vpop.permute.xlu0 %5049 }
 0x647   : > { %8945 = vmatprep.subr.bf16.mxu0 %v11101_v55  ;;  %5597 = vrot.lane.b32.xlu0 %v9595_v5, %s9666_s22 }
 0x649   : > { %v5876_v31 = vpop.permute.xlu1 %5875 }
 0x64a   : > { %8946 = vmatpush3.bf16.msra.mxu0 %v5876_v31 }
 0x64b   : > { %8947 = vmatprep.subr.bf16.mxu0 %v11101_v55  ;;  %5601 = vrot.lane.b32.xlu0 %v9596_v7, %s9666_s22 }
 0x64d   : > { %v5878_v34 = vpop.permute.xlu1 %5877 }
 0x64e   : > { %8948 = vmatpush3.bf16.msra.mxu0 %v5878_v34 }
 0x64f   : > { %8949 = vmatprep.subr.bf16.mxu0 %v11101_v55  ;;  %5605 = vrot.lane.b32.xlu0 %v9599_v13, %s9666_s22 }
 0x651   : > { %v5880_v59 = vpop.permute.xlu1 %5879 }
 0x652   : > { %8950 = vmatpush3.bf16.msra.mxu0 %v5880_v59 }
 0x653   : > { %8967 = vmatprep.subr.bf16.mxu0 %v11101_v55  ;;  %5729 = vrot.lane.b32.xlu0 %v9600_v14, %s9666_s22 }
 0x657   : > { %5731 = vrot.lane.b32.xlu0 %v9601_v15, %s9666_s22 }
 0x65b   : > { %5733 = vrot.lane.b32.xlu0 %v9602_v4, %s9666_s22 }
 0x65f   : > { %5735 = vrot.lane.b32.xlu0 %v9603_v24, %s9666_s22 }
 0x663   : > { %5737 = vrot.lane.b32.xlu0 %v9604_v25, %s9666_s22 }
 0x667   : > { %5739 = vrot.lane.b32.xlu0 %v9607_v32, %s9666_s22 }
 0x66b   : > { %5741 = vrot.lane.b32.xlu0 %v9608_v49, %s9666_s22 }
 0x66f   : > { %5743 = vrot.lane.b32.xlu0 %v9609_v54, %s9666_s22 }
 0x6eb   : > { %v4695_v60 = vpop.f32.mrb[24].mxu1 }
 0x6ec   : > { %4704 = vst.msk [vmem:[#allocation3 + $0x9] sm:$0xf] %vm4703_vm3, %v4695_v60  ;;  %v8773_v61 = vpop.f32.mrb[25].mxu1 }
 0x6ed   : > { %4707 = vst.msk [vmem:[#allocation3 + $0xd] sm:$0xf0] %vm4706_vm4, %v4695_v60  ;;  %v4698_v2 = vpop.f32.mrb[26].mxu1 }
 0x6ee   : > { %4709 = vst.msk [vmem:[#allocation3 + $0x19] sm:$0xf] %vm4703_vm3, %v4698_v2  ;;  %v8774_v21 = vpop.f32.mrb[27].mxu1 }
 0x6ef   : > { %4711 = vst.msk [vmem:[#allocation3 + $0x1d] sm:$0xf0] %vm4706_vm4, %v4698_v2 }
 0x6f3   : > { %v9583_v20 = vld [vmem:[#allocation3 + $0x1] ss:$8 sps:$4 sm:$0xff]  }
 0x6f4   : > { %v9591_v11 = vld [vmem:[#allocation3] ss:$8 sps:$4 sm:$0xff]  }
 0x6f5   : > { %v9584_v48 = vld [vmem:[#allocation3 + $0x11] ss:$8 sps:$4 sm:$0xff]   ;;  %v9597_v31 = vld [vmem:[#allocation3 + $0x2] ss:$8 sps:$4 sm:$0xff]  }
 0x6f6   : > { %v9585_v35 = vld [vmem:[#allocation3 + $0x12] ss:$8 sps:$4 sm:$0xff]   ;;  %v9586_v36 = vld [vmem:[#allocation3 + $0x22] ss:$8 sps:$4 sm:$0xff]   ;;  %v4753_v38 = vpack.c.bf16 %v9584_v48, %v9583_v20 }
 0x6f7   : > { %v5808_v47 = vpack.c.bf16 %v9586_v36, %v9585_v35  ;;  %v9605_v34 = vld [vmem:[#allocation3 + $0x8] ss:$8 sps:$4 sm:$0xff]  }
 0x6f8   : > { %8792 = vmatmul.mubr.bf16.vlgmr.msra.gmra.mrb[28].mxu1 %v4753_v38  ;;  %v9610_v62 = vld [vmem:[#allocation3 + $0x9] ss:$8 sps:$4 sm:$0xff]  }
 0x6f9   : > { %8796 = vmatpush3.bf16.msra.mxu1 %v4916_v9  ;;  %8952 = vmatmul.mubr.bf16.vlgmr.msra.gmra.mrb[32].mxu0 %v5808_v47  ;;  %v9612_v56 = vld [vmem:[#allocation3 + $0xa] ss:$8 sps:$4 sm:$0xff]  }
 0x6fa   : > { %8797 = vmatprep.subr.bf16.mxu1 %v11101_v55  ;;  %8811 = vmatprep.mubr.msk.bf16.mxu1 %vm9667_vm1, %v11101_v55  ;;  %v9615_v14 = vld [vmem:[#allocation3 + $0x20] ss:$8 sps:$4 sm:$0xff]   ;;  %v9616_v48 = vld [vmem:[#allocation3 + $0x11] ss:$8 sps:$4 sm:$0xff]  }
 0x6fb   : > { %8969 = vmatprep.mubr.msk.bf16.mxu0 %vm9667_vm1, %v11101_v55  ;;  %v9617_v35 = vld [vmem:[#allocation3 + $0x21] ss:$8 sps:$4 sm:$0xff]  }
 0x6fc   : > { %v5672_v36 = vpack.c.bf16 %v9617_v35, %v9616_v48 }
 0x6fd   : > { %8798 = vmatpush3.bf16.msra.mxu1 %v11079_v50  ;;  %v9592_v50 = vld [vmem:[#allocation3 + $0x10] ss:$8 sps:$4 sm:$0xff]  }
 0x6fe   : > { %8799 = vmatprep.subr.bf16.mxu1 %v11101_v55 }
 0x701   : > { %8800 = vmatpush3.bf16.msra.mxu1 %v4920_v23 }
 0x702   : > { %8801 = vmatprep.subr.bf16.mxu1 %v11101_v55 }
 0x705   : > { %8802 = vmatpush3.bf16.msra.mxu1 %v11088_v6  ;;  %v4724_v6 = vpack.c.bf16 %v9592_v50, %v9591_v11 }
 0x706   : > { %8803 = vmatprep.subr.bf16.mxu1 %v11101_v55 }
 0x709   : > { %8804 = vmatpush3.bf16.msra.mxu1 %v4924_v18 }
 0x70a   : > { %8805 = vmatprep.subr.bf16.mxu1 %v11101_v55 }
 0x70d   : > { %8806 = vmatpush3.bf16.msra.mxu1 %v11094_v46  ;;  %v5054_v46 = vpop.permute.xlu0 %5053 }
 0x70e   : > { %8807 = vmatprep.subr.bf16.mxu1 %v11101_v55 }
 0x711   : > { %8808 = vmatpush3.bf16.msra.mxu1 %v4928_v42 }
 0x712   : > { %8809 = vmatprep.subr.bf16.mxu1 %v11101_v55 }
 0x715   : > { %8810 = vmatpush3.bf16.msra.mxu1 %v11097_v12  ;;  %v5058_v12 = vpop.permute.xlu0 %5057 }
 0x716   : > { %8815 = vmatprep.subr.bf16.mxu1 %v11101_v55 }
 0x718   : > { %8812 = vmatmul.mubr.bf16.vlgmr.msra.gmra.mrb[32].mxu1 %v4724_v6 }
 0x719   : > { %8816 = vmatpush3.bf16.msra.mxu1 %v5050_v51  ;;  %8831 = vmatprep.mubr.msk.bf16.mxu1 %vm9667_vm1, %v11101_v55  ;;  %v5062_v58 = vpop.permute.xlu0 %5061 }
 0x71a   : > { %8817 = vmatprep.subr.bf16.mxu1 %v11101_v55 }
 0x71d   : > { %8818 = vmatpush3.bf16.msra.mxu1 %v11099_v33  ;;  %v9598_v33 = vld [vmem:[#allocation3 + $0x12] ss:$8 sps:$4 sm:$0xff]   ;;  %v5186_v39 = vpop.permute.xlu0 %5185 }
 0x71e   : > { %8819 = vmatprep.subr.bf16.mxu1 %v11101_v55 }
 0x721   : > { %8820 = vmatpush3.bf16.msra.mxu1 %v5054_v46 }
 0x722   : > { %8821 = vmatprep.subr.bf16.mxu1 %v11101_v55 }
 0x725   : > { %8822 = vmatpush3.bf16.msra.mxu1 %v11104_v28  ;;  %v4992_v28 = vpack.c.bf16 %v9598_v33, %v9597_v31 }
 0x726   : > { %8823 = vmatprep.subr.bf16.mxu1 %v11101_v55 }
 0x729   : > { %8824 = vmatpush3.bf16.msra.mxu1 %v5058_v12 }
 0x72a   : > { %8825 = vmatprep.subr.bf16.mxu1 %v11101_v55 }
 0x72d   : > { %8826 = vmatpush3.bf16.msra.mxu1 %v11107_v19  ;;  %v5190_v19 = vpop.permute.xlu0 %5189 }
 0x72e   : > { %8827 = vmatprep.subr.bf16.mxu1 %v11101_v55 }
 0x731   : > { %8828 = vmatpush3.bf16.msra.mxu1 %v5062_v58 }
 0x732   : > { %8829 = vmatprep.subr.bf16.mxu1 %v11101_v55 }
 0x735   : > { %8830 = vmatpush3.bf16.msra.mxu1 %v11113_v45  ;;  %v5194_v45 = vpop.permute.xlu0 %5193 }
 0x736   : > { %8835 = vmatprep.subr.bf16.mxu1 %v11101_v55 }
 0x738   : > { %8832 = vmatmul.mubr.bf16.vlgmr.msra.gmra.mrb[36].mxu1 %v4992_v28 }
 0x739   : > { %8836 = vmatpush3.bf16.msra.mxu1 %v5186_v39  ;;  %8851 = vmatprep.mubr.msk.bf16.mxu1 %vm9667_vm1, %v11101_v55  ;;  %v5198_v3 = vpop.permute.xlu0 %5197 }
 0x73a   : > { %8837 = vmatprep.subr.bf16.mxu1 %v11101_v55 }
 0x73d   : > { %8838 = vmatpush3.bf16.msra.mxu1 %v11116_v22  ;;  %v9606_v22 = vld [vmem:[#allocation3 + $0x18] ss:$8 sps:$4 sm:$0xff]   ;;  %v5322_v59 = vpop.permute.xlu0 %5321 }
 0x73e   : > { %8839 = vmatprep.subr.bf16.mxu1 %v11101_v55 }
 0x741   : > { %8840 = vmatpush3.bf16.msra.mxu1 %v5190_v19 }
 0x742   : > { %8841 = vmatprep.subr.bf16.mxu1 %v11101_v55 }
 0x745   : > { %8842 = vmatpush3.bf16.msra.mxu1 %v11121_v30  ;;  %v5128_v30 = vpack.c.bf16 %v9606_v22, %v9605_v34 }
 0x746   : > { %8843 = vmatprep.subr.bf16.mxu1 %v11101_v55 }
 0x749   : > { %8844 = vmatpush3.bf16.msra.mxu1 %v5194_v45  ;;  %v11351_v45 = vld [vmem:[%s11524_s3 + $0x8] sm:$0xff]  }
 0x74a   : > { %8845 = vmatprep.subr.bf16.mxu1 %v11101_v55  ;;  %8968 = vmatpush3.bf16.msra.mxu0 %v11351_v45 }
 0x74b   : > { %8979 = vmatprep.subr.bf16.mxu0 %v11101_v55 }
 0x74d   : > { %8846 = vmatpush3.bf16.msra.mxu1 %v11125_v41  ;;  %v5326_v41 = vpop.permute.xlu0 %5325 }
 0x74e   : > { %8847 = vmatprep.subr.bf16.mxu1 %v11101_v55 }
 0x751   : > { %8848 = vmatpush3.bf16.msra.mxu1 %v5198_v3  ;;  %v9668_v3 = vmov 0  }
 0x752   : > { %8849 = vmatprep.subr.bf16.mxu1 %v11101_v55  ;;  %8970 = vmatmul.mubr.bf16.vlgmr.msra.gmra.mrb[36].mxu0 %v9668_v3 }
 0x753   : > { %8980 = vmatpush3.bf16.msra.mxu0 %v11351_v45  ;;  %8981 = vmatprep.mubr.msk.bf16.mxu0 %vm9667_vm1, %v11101_v55 }
 0x754   : > { %8991 = vmatprep.subr.bf16.mxu0 %v11101_v55 }
 0x755   : > { %8850 = vmatpush3.bf16.msra.mxu1 %v11128_v16  ;;  %v5330_v16 = vpop.permute.xlu0 %5329 }
 0x756   : > { %8855 = vmatprep.subr.bf16.mxu1 %v11101_v55 }
 0x758   : > { %8852 = vmatmul.mubr.bf16.vlgmr.msra.gmra.mrb[40].mxu1 %v5128_v30 }
 0x759   : > { %8856 = vmatpush3.bf16.msra.mxu1 %v5322_v59  ;;  %8871 = vmatprep.mubr.msk.bf16.mxu1 %vm9667_vm1, %v11101_v55  ;;  %v5334_v57 = vpop.permute.xlu0 %5333 }
 0x75a   : > { %8857 = vmatprep.subr.bf16.mxu1 %v11101_v55 }
 0x75d   : > { %8858 = vmatpush3.bf16.msra.mxu1 %v11132_v53  ;;  %v9611_v53 = vld [vmem:[#allocation3 + $0x19] ss:$8 sps:$4 sm:$0xff]   ;;  %v5458_v40 = vpop.permute.xlu0 %5457 }
 0x75e   : > { %8859 = vmatprep.subr.bf16.mxu1 %v11101_v55 }
 0x761   : > { %8860 = vmatpush3.bf16.msra.mxu1 %v5326_v41 }
 0x762   : > { %8861 = vmatprep.subr.bf16.mxu1 %v11101_v55 }
 0x765   : > { %8862 = vmatpush3.bf16.msra.mxu1 %v11135_v8  ;;  %v5264_v8 = vpack.c.bf16 %v9611_v53, %v9610_v62 }
 0x766   : > { %8863 = vmatprep.subr.bf16.mxu1 %v11101_v55 }
 0x769   : > { %8864 = vmatpush3.bf16.msra.mxu1 %v5330_v16 }
 0x76a   : > { %8865 = vmatprep.subr.bf16.mxu1 %v11101_v55 }
 0x76d   : > { %8866 = vmatpush3.bf16.msra.mxu1 %v11139_v43  ;;  %v5462_v43 = vpop.permute.xlu0 %5461 }
 0x76e   : > { %8867 = vmatprep.subr.bf16.mxu1 %v11101_v55 }
 0x771   : > { %8868 = vmatpush3.bf16.msra.mxu1 %v5334_v57 }
 0x772   : > { %8869 = vmatprep.subr.bf16.mxu1 %v11101_v55 }
 0x775   : > { %8870 = vmatpush3.bf16.msra.mxu1 %v11141_v44  ;;  %v5466_v44 = vpop.permute.xlu0 %5465 }
 0x776   : > { %8875 = vmatprep.subr.bf16.mxu1 %v11101_v55 }
 0x778   : > { %8872 = vmatmul.mubr.bf16.vlgmr.msra.gmra.mrb[44].mxu1 %v5264_v8 }
 0x779   : > { %8876 = vmatpush3.bf16.msra.mxu1 %v5458_v40  ;;  %8891 = vmatprep.mubr.msk.bf16.mxu1 %vm9667_vm1, %v11101_v55  ;;  %v5470_v29 = vpop.permute.xlu0 %5469 }
 0x77a   : > { %8877 = vmatprep.subr.bf16.mxu1 %v11101_v55 }
 0x77d   : > { %8878 = vmatpush3.bf16.msra.mxu1 %v11143_v52  ;;  %v9613_v52 = vld [vmem:[#allocation3 + $0x1a] ss:$8 sps:$4 sm:$0xff]   ;;  %v5594_v63 = vpop.permute.xlu0 %5593 }
 0x77e   : > { %8879 = vmatprep.subr.bf16.mxu1 %v11101_v55 }
 0x781   : > { %8880 = vmatpush3.bf16.msra.mxu1 %v5462_v43 }
 0x782   : > { %8881 = vmatprep.subr.bf16.mxu1 %v11101_v55 }
 0x785   : > { %8882 = vmatpush3.bf16.msra.mxu1 %v11145_v26  ;;  %v5400_v26 = vpack.c.bf16 %v9613_v52, %v9612_v56 }
 0x786   : > { %8883 = vmatprep.subr.bf16.mxu1 %v11101_v55 }
 0x789   : > { %8884 = vmatpush3.bf16.msra.mxu1 %v5466_v44 }
 0x78a   : > { %8885 = vmatprep.subr.bf16.mxu1 %v11101_v55 }
 0x78d   : > { %8886 = vmatpush3.bf16.msra.mxu1 %v11147_v27  ;;  %v5598_v27 = vpop.permute.xlu0 %5597 }
 0x78e   : > { %8887 = vmatprep.subr.bf16.mxu1 %v11101_v55 }
 0x791   : > { %8888 = vmatpush3.bf16.msra.mxu1 %v5470_v29  ;;  %v5602_v5 = vpop.permute.xlu0 %5601 }
 0x792   : > { %8889 = vmatprep.subr.bf16.mxu1 %v11101_v55 }
 0x795   : > { %8890 = vmatpush3.bf16.msra.mxu1 %v11149_v17  ;;  %v5606_v17 = vpop.permute.xlu0 %5605 }
 0x796   : > { %8895 = vmatprep.subr.bf16.mxu1 %v11101_v55 }
 0x798   : > { %8892 = vmatmul.mubr.bf16.vlgmr.msra.gmra.mrb[48].mxu1 %v5400_v26 }
 0x799   : > { %8896 = vmatpush3.bf16.msra.mxu1 %v5594_v63  ;;  %8911 = vmatprep.mubr.msk.bf16.mxu1 %vm9667_vm1, %v11101_v55  ;;  %v5730_v7 = vpop.permute.xlu0 %5729 }
 0x79a   : > { %8897 = vmatprep.subr.bf16.mxu1 %v11101_v55 }
 0x79d   : > { %8898 = vmatpush3.bf16.msra.mxu1 %v11151_v0  ;;  %v5732_v13 = vpop.permute.xlu0 %5731  ;;  %v9614_v0 = vld [vmem:[#allocation3 + $0x10] ss:$8 sps:$4 sm:$0xff]  }
 0x79e   : > { %8899 = vmatprep.subr.bf16.mxu1 %v11101_v55 }
 0x7a1   : > { %8900 = vmatpush3.bf16.msra.mxu1 %v5598_v27  ;;  %v5734_v15 = vpop.permute.xlu0 %5733 }
 0x7a2   : > { %8901 = vmatprep.subr.bf16.mxu1 %v11101_v55 }
 0x7a5   : > { %8902 = vmatpush3.bf16.msra.mxu1 %v11153_v1  ;;  %v5536_v1 = vpack.c.bf16 %v9615_v14, %v9614_v0  ;;  %v5736_v4 = vpop.permute.xlu0 %5735 }
 0x7a6   : > { %8903 = vmatprep.subr.bf16.mxu1 %v11101_v55 }
 0x7a9   : > { %8904 = vmatpush3.bf16.msra.mxu1 %v5602_v5 }
 0x7aa   : > { %8905 = vmatprep.subr.bf16.mxu1 %v11101_v55 }
 0x7ad   : > { %8906 = vmatpush3.bf16.msra.mxu1 %v11155_v10  ;;  %v5738_v10 = vpop.permute.xlu0 %5737 }
 0x7ae   : > { %8907 = vmatprep.subr.bf16.mxu1 %v11101_v55 }
 0x7b1   : > { %8908 = vmatpush3.bf16.msra.mxu1 %v5606_v17 }
 0x7b2   : > { %8909 = vmatprep.subr.bf16.mxu1 %v11101_v55 }
 0x7b5   : > { %8910 = vmatpush3.bf16.msra.mxu1 %v11157_v37  ;;  %v5740_v37 = vpop.permute.xlu0 %5739 }
 0x7b6   : > { %8915 = vmatprep.subr.bf16.mxu1 %v11101_v55 }
 0x7b8   : > { %8912 = vmatmul.mubr.bf16.vlgmr.msra.gmra.mrb[52].mxu1 %v5536_v1 }
 0x7b9   : > { %8916 = vmatpush3.bf16.msra.mxu1 %v5730_v7  ;;  %8931 = vmatprep.mubr.msk.bf16.mxu1 %vm9667_vm1, %v11101_v55  ;;  %v5742_v25 = vpop.permute.xlu0 %5741  ;;  %v7616_v7 = vld [vmem:[%s11525_s4 + $0x2] ss:$0 sm:$0xff] }
 0x7ba   : > { %8917 = vmatprep.subr.bf16.mxu1 %v11101_v55 }
 0x7bd   : > { %8918 = vmatpush3.bf16.msra.mxu1 %v5732_v13  ;;  %v5744_v20 = vpop.permute.xlu0 %5743 }
 0x7be   : > { %8919 = vmatprep.subr.bf16.mxu1 %v11101_v55 }
 0x7c1   : > { %8920 = vmatpush3.bf16.msra.mxu1 %v5734_v15 }
 0x7c2   : > { %8921 = vmatprep.subr.bf16.mxu1 %v11101_v55 }
 0x7c5   : > { %8922 = vmatpush3.bf16.msra.mxu1 %v5736_v4 }
 0x7c6   : > { %8923 = vmatprep.subr.bf16.mxu1 %v11101_v55 }
 0x7c9   : > { %8924 = vmatpush3.bf16.msra.mxu1 %v5738_v10 }
 0x7ca   : > { %8925 = vmatprep.subr.bf16.mxu1 %v11101_v55 }
 0x7cb   : > { %v4868_v24 = vpop.f32.mrb[28].mxu1 }
 0x7cc   : > { %v11339_v32 = vpop.f32.mrb[32].mxu0  ;;  %v8793_v49 = vpop.f32.mrb[29].mxu1 }
 0x7cd   : > { %8926 = vmatpush3.bf16.msra.mxu1 %v5740_v37  ;;  %v8953_v54 = vpop.f32.mrb[33].mxu0  ;;  %v4871_v60 = vpop.f32.mrb[30].mxu1  ;;  %v5941_v49 = vld [vmem:[%s11523_s2 + $0x50] sm:$0x3] }
 0x7ce   : > { %v11341_v61 = vpop.f32.mrb[34].mxu0  ;;  %v8794_v2 = vpop.f32.mrb[31].mxu1  ;;  %8927 = vmatprep.subr.bf16.mxu1 %v11101_v55  ;;  %v11377_v54 = vld [vmem:[%s11525_s4 + $0x4] sm:$0x1] }
 0x7cf   : > { %v8954_v21 = vpop.f32.mrb[35].mxu0 }
 0x7d1   : > { %8928 = vmatpush3.bf16.msra.mxu1 %v5742_v25 }
 0x7d2   : > { %8929 = vmatprep.subr.bf16.mxu1 %v11101_v55 }
 0x7d5   : > { %8930 = vmatpush3.bf16.msra.mxu1 %v5744_v20 }
 0x7d6   : > { %8955 = vmatprep.subr.bf16.mxu1 %v11101_v55 }
 0x7d8   : > { %8932 = vmatmul.mubr.bf16.vlgmr.msra.gmra.mrb[56].mxu1 %v5672_v36 }
 0x7d9   : > { %8957 = vmatprep.mubr.msk.bf16.mxu1 %vm9667_vm1, %v11101_v55 }
 0x7eb   : > { %v4973_v9 = vpop.f32.mrb[32].mxu1 }
 0x7ec   : > { %v4974_v38 = vadd.f32 %v4973_v9, %v4868_v24  ;;  %v8813_v47 = vpop.f32.mrb[33].mxu1 }
 0x7ed   : > { %v4976_v23 = vpop.f32.mrb[34].mxu1  ;;  %v7618_v47 = vld [vmem:[%s11525_s4 + $0x3] ss:$0 sm:$0xff] }
 0x7ee   : > { %v4977_v18 = vadd.f32 %v4976_v23, %v4871_v60  ;;  %v8814_v42 = vpop.f32.mrb[35].mxu1 }
 0x80b   : > { %v5107_v50 = vpop.f32.mrb[36].mxu1 }
 0x80c   : > { %v5114_v11 = vadd.f32 %v5107_v50, %v4974_v38  ;;  %v8833_v51 = vpop.f32.mrb[37].mxu1 }
 0x80d   : > { %v5110_v6 = vpop.f32.mrb[38].mxu1 }
 0x80e   : > { %v5115_v46 = vadd.f32 %v5110_v6, %v4977_v18  ;;  %v8834_v12 = vpop.f32.mrb[39].mxu1 }
 0x825   : > { %v6103_v60 = vpop.f32.mrb[36].mxu0 }
 0x826   : > { %v8971_v2 = vpop.f32.mrb[37].mxu0 }
 0x827   : > { %v6106_v21 = vpop.f32.mrb[38].mxu0  ;;  %v11442_v2 = vld [vmem:[%s11525_s4 + $0x5] sm:$0x1] }
 0x828   : > { %v8972_v20 = vpop.f32.mrb[39].mxu0 }
 0x82b   : > { %v5243_v58 = vpop.f32.mrb[40].mxu1 }
 0x82c   : > { %v5250_v33 = vadd.f32 %v5243_v58, %v5114_v11  ;;  %v8853_v31 = vpop.f32.mrb[41].mxu1 }
 0x82d   : > { %v5246_v39 = vpop.f32.mrb[42].mxu1 }
 0x82e   : > { %v5251_v28 = vadd.f32 %v5246_v39, %v5115_v46  ;;  %v8854_v19 = vpop.f32.mrb[43].mxu1 }
 0x82f   : > { %v11400_v19 = vld [vmem:[%s11524_s3 + $0x10] sm:$0xff]  }
 0x84b   : > { %v5379_v22 = vpop.f32.mrb[44].mxu1 }
 0x84c   : > { %v5386_v34 = vadd.f32 %v5379_v22, %v5250_v33  ;;  %v8873_v59 = vpop.f32.mrb[45].mxu1 }
 0x84d   : > { %v5382_v30 = vpop.f32.mrb[46].mxu1 }
 0x84e   : > { %v5387_v41 = vadd.f32 %v5382_v30, %v5251_v28  ;;  %v8874_v16 = vpop.f32.mrb[47].mxu1 }
 0x86b   : > { %v5515_v57 = vpop.f32.mrb[48].mxu1 }
 0x86c   : > { %v5522_v53 = vadd.f32 %v5515_v57, %v5386_v34  ;;  %v8893_v62 = vpop.f32.mrb[49].mxu1 }
 0x86d   : > { %v5518_v40 = vpop.f32.mrb[50].mxu1 }
 0x86e   : > { %v5523_v8 = vadd.f32 %v5518_v40, %v5387_v41  ;;  %v8894_v43 = vpop.f32.mrb[51].mxu1 }
 0x88b   : > { %v5651_v44 = vpop.f32.mrb[52].mxu1 }
 0x88c   : > { %v5658_v29 = vadd.f32 %v5651_v44, %v5522_v53  ;;  %v8913_v52 = vpop.f32.mrb[53].mxu1 }
 0x88d   : > { %v5654_v56 = vpop.f32.mrb[54].mxu1 }
 0x88e   : > { %v5659_v63 = vadd.f32 %v5654_v56, %v5523_v8  ;;  %v8914_v26 = vpop.f32.mrb[55].mxu1 }
 0x8ab   : > { %v5787_v27 = vpop.f32.mrb[56].mxu1 }
 0x8ac   : > { %v5794_v5 = vadd.f32 %v5787_v27, %v5658_v29  ;;  %v8933_v17 = vpop.f32.mrb[57].mxu1 }
 0x8ad   : > { %v5790_v13 = vpop.f32.mrb[58].mxu1 }
 0x8ae   : > { %v5930_v0 = vadd.f32 %v11339_v32, %v5794_v5  ;;  %v5795_v14 = vadd.f32 %v5790_v13, %v5659_v63  ;;  %v8934_v15 = vpop.f32.mrb[59].mxu1  ;;  %v9619_v32 = vld [vmem:[%s11524_s3] sm:$0xff]  }
 0x8b0   : > { %v5937_v1 = vadd.f32 %v7616_v7, %v5930_v0  ;;  %v5931_v4 = vadd.f32 %v11341_v61, %v5795_v14  ;;  %v6104_v61 = vadd.f32 %v6103_v60, %v11377_v54 }
 0x8b2   : > { %v5938_v10 = vadd.f32 %v7616_v7, %v5931_v4  ;;  %v5939_v37 = vmax.f32 %v5937_v1, 0.0  ;;  %6115 = vrot.lane.b32.xlu0 %v6104_v61, %s9669_s25 }
 0x8b4   : > { %v5940_v24 = vmax.f32 %v5938_v10, 0.0 }
 0x8b6   : > { %v5942_v25 = vpack.c.bf16 %v5940_v24, %v5939_v37 }
 0x8b8   : > { %8956 = vmatpush3.bf16.msra.mxu1 %v5942_v25 }
 0x8b9   : > { %8961 = vmatprep.subr.bf16.mxu1 %v11101_v55 }
 0x8bb   : > { %8958 = vmatmul.mubr.msk.bf16.vlgmr.msra.gmra.mrb[60].mxu1 %vm5943_vm5, %v5941_v49 }
 0x8bc   : > { %8963 = vmatprep.mubr.msk.bf16.mxu1 %vm9667_vm1, %v11101_v55  ;;  %8962 = vmatpush3.bf16.msra.mxu1 %v9619_v32 }
 0x8bd   : > { %8973 = vmatprep.subr.bf16.mxu1 %v11101_v55 }
 0x924   : > { %v6116_v58 = vpop.permute.xlu0 %6115 }
 0x98e   : > { %v11382_v48 = vpop.f32.mrb[60].mxu1 }
 0x98f   : > { %v6003_v35 = vpack.c.bf16 %v11382_v48, %v11382_v48  ;;  %v8959_v36 = vpop.f32.mrb[61].mxu1 }
 0x990   : > { %v5984_v9 = vpop.f32.mrb[62].mxu1 }
 0x991   : > { %8964 = vmatmul.mubr.msk.bf16.vlgmr.msra.gmra.mrb[64].mxu1 %vm5943_vm5, %v6003_v35  ;;  %v8960_v38 = vpop.f32.mrb[63].mxu1 }
 0x992   : > { %8975 = vmatprep.mubr.msk.bf16.mxu1 %vm9667_vm1, %v11101_v55  ;;  %8974 = vmatpush3.bf16.msra.mxu1 %v11400_v19 }
 0x993   : > { %8985 = vmatprep.subr.bf16.mxu1 %v11101_v55 }
 0xa64   : > { %v6052_v23 = vpop.f32.mrb[64].mxu1 }
 0xa65   : > { %v11392_v18 = vadd.f32 %v7618_v47, %v6052_v23  ;;  %v8965_v42 = vpop.f32.mrb[65].mxu1 }
 0xa66   : > { %v6055_v50 = vpop.f32.mrb[66].mxu1 }
 0xa67   : > { %v8966_v11 = vpop.f32.mrb[67].mxu1  ;;  %v6109_v51 = vadd.f32 %v6104_v61, %v11392_v18  ;;  %v11431_v61 = vld [vmem:[#allocation2] sm:$0xff] }
 0xa68   : > { %6747 = vst [vmem:[%s11485_s14] sm:$0xff] %v11431_v61 }
 0xa69   : > { %v6110_v6 = vmul.f32 0.5, %v6109_v51 }
 0xa6b   : > { %9624 = vtanh.f32 %v6110_v6 }
 0xa75   : > { %v9625_v46 = vpop.eup %9624 }
 0xa76   : > { %v6112_v12 = vadd.f32 1.0, %v9625_v46 }
 0xa78   : > { %v6113_v33 = vmul.f32 0.5, %v6112_v12 }
 0xa7a   : > { %v6118_v31 = vmul.f32 %v6116_v58, %v6113_v33  ;;  %v6125_v22 = vsub.f32 1.0, %v6113_v33  ;;  %v6131_v59 = vmul.f32 0.0, %v6113_v33 }
 0xa7c   : > { %6120 = vrot.lane.b32.xlu1 %v6118_v31, %s9670_s28 }
 0xaee   : > { %v6121_v39 = vpop.permute.xlu1 %6120 }
 0xaef   : > { %v6123_v28 = vadd.f32 %v6121_v39, %v11392_v18 }
 0xaf1   : > { %9626 = vtanh.f32 %v6123_v28 }
 0xafb   : > { %v9627_v3 = vpop.eup %9626 }
 0xafc   : > { %6127 = vrot.lane.b32.xlu0 %v9627_v3, %s9666_s22 }
 0xb6e   : > { %v6128_v34 = vpop.permute.xlu0 %6127 }
 0xb6f   : > { %v6130_v30 = vmul.f32 %v6128_v34, %v6125_v22 }
 0xb71   : > { %v6132_v41 = vadd.f32 %v6131_v59, %v6130_v30 }
 0xb73   : > { %v6133_v16 = vpack.c.bf16 %v6132_v41, %v6132_v41  ;;  %v6256_v1 = vrot.slane %v6132_v41, 7 }
 0xb75   : > { %6135 = vrot.lane.b32.xlu1 %v6133_v16, %s9666_s22 }
 0xbe7   : > { %v6136_v57 = vpop.permute.xlu1 %6135 }
 0xbe8   : > { %8976 = vmatmul.mubr.msk.bf16.vlgmr.msra.gmra.mrb[68].mxu1 %vm5943_vm5, %v6136_v57  ;;  %8982 = vmatmul.mubr.msk.bf16.vlgmr.msra.gmra.mrb[40].mxu0 %vm5943_vm5, %v6136_v57  ;;  %v5988_v57 = vsel %vm5987_vm6, %v11382_v48, 0.0 }
 0xbe9   : > { %8986 = vmatpush3.bf16.msra.mxu1 %v11400_v19  ;;  %8992 = vmatpush3.bf16.msra.mxu0 %v11351_v45 }
 0xbea   : > { %8993 = vmatprep.mubr.msk.bf16.mxu0 %vm9667_vm1, %v11101_v55  ;;  %8987 = vmatprep.mubr.msk.bf16.mxu1 %vm9667_vm1, %v11101_v55 }
 0xbeb   : > { %8997 = vmatprep.subr.bf16.mxu1 %v11101_v55  ;;  %9003 = vmatprep.subr.bf16.mxu0 %v11101_v55 }
 0xcbb   : > { %v6180_v53 = vpop.f32.mrb[68].mxu1  ;;  %v6225_v62 = vpop.f32.mrb[40].mxu0 }
 0xcbc   : > { %v6226_v40 = vadd.f32 %v6225_v62, %v11377_v54  ;;  %v8977_v8 = vpop.f32.mrb[69].mxu1  ;;  %v8983_v43 = vpop.f32.mrb[41].mxu0  ;;  %v6181_v21 = vadd.f32 %v6180_v53, %v11442_v2  ;;  %v5989_v53 = vrot.slane %v5988_v57, 4 }
 0xcbd   : > { %v6183_v44 = vpop.f32.mrb[70].mxu1  ;;  %v6228_v29 = vpop.f32.mrb[42].mxu0 }
 0xcbe   : > { %v6232_v52 = vrot.slane %v6226_v40, 7  ;;  %v8978_v56 = vpop.f32.mrb[71].mxu1  ;;  %v8984_v63 = vpop.f32.mrb[43].mxu0  ;;  %v5990_v62 = vadd.f32 %v5989_v53, %v5988_v57  ;;  %v6569_v57 = vld [vmem:[%s11525_s4 + $0x6] sm:$0x1] }
 0xcbf   : > { %v9622_v53 = vld [vmem:[%s11524_s3 + $0x20] sm:$0xff]  }
 0xcc0   : > { %6239 = vrot.lane.b32.xlu0 %v6232_v52, %s9669_s25  ;;  %v6234_v26 = vadd.f32 %v6232_v52, %v11392_v18  ;;  %v5991_v40 = vrot.slane %v5990_v62, 2 }
 0xcc2   : > { %v6235_v27 = vmul.f32 0.5, %v6234_v26  ;;  %v5992_v8 = vadd.f32 %v5991_v40, %v5990_v62 }
 0xcc4   : > { %9628 = vtanh.f32 %v6235_v27  ;;  %v5993_v29 = vrot.slane %v5992_v8, 1 }
 0xcc6   : > { %v5994_v52 = vadd.f32 %v5993_v29, %v5992_v8  ;;  %v9623_v8 = vld [vmem:[%s11524_s3 + $0x28] sm:$0xff]  }
 0xcc8   : > { %v5996_v56 = vmul.f32 0.25, %v5994_v52 }
 0xcca   : > { %v6568_v26 = vpack.c.bf16 %v5996_v56, %v5996_v56 }
 0xcce   : > { %v9629_v5 = vpop.eup %9628 }
 0xccf   : > { %v6237_v17 = vadd.f32 1.0, %v9629_v5 }
 0xcd1   : > { %v6238_v55 = vmul.f32 0.5, %v6237_v17 }
 0xcd3   : > { %v6249_v4 = vsub.f32 1.0, %v6238_v55  ;;  %v6258_v37 = vmul.f32 %v6256_v1, %v6238_v55 }
 0xd32   : > { %v6240_v7 = vpop.permute.xlu0 %6239 }
 0xd33   : > { %v6242_v13 = vmul.f32 %v6240_v7, %v6238_v55 }
 0xd35   : > { %6244 = vrot.lane.b32.xlu1 %v6242_v13, %s9670_s28 }
 0xda7   : > { %v6245_v0 = vpop.permute.xlu1 %6244 }
 0xda8   : > { %v6247_v14 = vadd.f32 %v6245_v0, %v11392_v18 }
 0xdaa   : > { %9630 = vtanh.f32 %v6247_v14  ;;  %v9621_v14 = vld [vmem:[%s11524_s3 + $0x18] sm:$0xff]  }
 0xdb4   : > { %v9631_v15 = vpop.eup %9630 }
 0xdb5   : > { %6251 = vrot.lane.b32.xlu0 %v9631_v15, %s9666_s22 }
 0xe27   : > { %v6252_v10 = vpop.permute.xlu0 %6251 }
 0xe28   : > { %v6254_v24 = vmul.f32 %v6252_v10, %v6249_v4 }
 0xe2a   : > { %v11422_v25 = vadd.f32 %v6258_v37, %v6254_v24 }
 0xe2c   : > { %v6260_v49 = vpack.c.bf16 %v11422_v25, %v11422_v25  ;;  %v6379_v27 = vrot.slane %v11422_v25, 7 }
 0xe2e   : > { %v6262_v32 = vshrl.u32 %v6260_v49, 16 }
 0xe30   : > { %6264 = vrot.lane.b32.xlu1 %v6262_v32, %s9666_s22 }
 0xea2   : > { %v6265_v60 = vpop.permute.xlu1 %6264 }
 0xea3   : > { %8988 = vmatmul.mubr.msk.bf16.vlgmr.msra.gmra.mrb[72].mxu1 %vm5943_vm5, %v6265_v60  ;;  %8994 = vmatmul.mubr.msk.bf16.vlgmr.msra.gmra.mrb[44].mxu0 %vm5943_vm5, %v6265_v60 }
 0xea4   : > { %8998 = vmatpush3.bf16.msra.mxu1 %v11400_v19  ;;  %9004 = vmatpush3.bf16.msra.mxu0 %v11351_v45  ;;  %v6186_v45 = vmul.f32 0.5, %v6181_v21 }
 0xea5   : > { %9005 = vmatprep.mubr.msk.bf16.mxu0 %vm9667_vm1, %v11431_v61  ;;  %8999 = vmatprep.mubr.msk.bf16.mxu1 %vm9667_vm1, %v11431_v61 }
 0xea6   : > { %9015 = vmatprep.subr.bf16.mxu0 %v11431_v61  ;;  %9009 = vmatprep.subr.bf16.mxu1 %v11431_v61  ;;  %9632 = vtanh.f32 %v6186_v45 }
 0xeb0   : > { %v9633_v46 = vpop.eup %9632 }
 0xeb1   : > { %v6188_v12 = vadd.f32 1.0, %v9633_v46 }
 0xeb3   : > { %v6189_v31 = vmul.f32 0.5, %v6188_v12 }
 0xf76   : > { %v6303_v20 = vpop.f32.mrb[72].mxu1  ;;  %v6348_v35 = vpop.f32.mrb[44].mxu0 }
 0xf77   : > { %v6304_v36 = vadd.f32 %v6303_v20, %v11442_v2  ;;  %v6349_v9 = vadd.f32 %v6348_v35, %v11377_v54  ;;  %v8989_v38 = vpop.f32.mrb[73].mxu1  ;;  %v8995_v47 = vpop.f32.mrb[45].mxu0 }
 0xf78   : > { %v6306_v23 = vpop.f32.mrb[74].mxu1  ;;  %v6351_v42 = vpop.f32.mrb[46].mxu0 }
 0xf79   : > { %v6309_v50 = vmul.f32 0.5, %v6304_v36  ;;  %v6355_v11 = vrot.slane %v6349_v9, 6  ;;  %v8990_v51 = vpop.f32.mrb[75].mxu1  ;;  %v8996_v6 = vpop.f32.mrb[47].mxu0 }
 0xf7b   : > { %9634 = vtanh.f32 %v6309_v50  ;;  %6362 = vrot.lane.b32.xlu0 %v6355_v11, %s9669_s25  ;;  %v6357_v3 = vadd.f32 %v6355_v11, %v11392_v18 }
 0xf7d   : > { %v6358_v22 = vmul.f32 0.5, %v6357_v3 }
 0xf7f   : > { %9636 = vtanh.f32 %v6358_v22 }
 0xf85   : > { %v9635_v58 = vpop.eup %9634 }
 0xf86   : > { %v6311_v33 = vadd.f32 1.0, %v9635_v58 }
 0xf88   : > { %v6312_v39 = vmul.f32 0.5, %v6311_v33 }
 0xf89   : > { %v9637_v34 = vpop.eup %9636 }
 0xf8a   : > { %v11448_v28 = vadd.f32 %v6312_v39, %v6189_v31  ;;  %v6360_v59 = vadd.f32 1.0, %v9637_v34 }
 0xf8c   : > { %v6361_v30 = vmul.f32 0.5, %v6360_v59 }
 0xf8e   : > { %v6372_v48 = vsub.f32 1.0, %v6361_v30  ;;  %v6381_v17 = vmul.f32 %v6379_v27, %v6361_v30 }
 0xfed   : > { %v6363_v41 = vpop.permute.xlu0 %6362 }
 0xfee   : > { %v6365_v16 = vmul.f32 %v6363_v41, %v6361_v30 }
 0xff0   : > { %6367 = vrot.lane.b32.xlu1 %v6365_v16, %s9670_s28 }
0x1062   : > { %v6368_v43 = vpop.permute.xlu1 %6367 }
0x1063   : > { %v6370_v44 = vadd.f32 %v6368_v43, %v11392_v18 }
0x1065   : > { %9638 = vtanh.f32 %v6370_v44 }
0x106f   : > { %v9639_v63 = vpop.eup %9638 }
0x1070   : > { %6374 = vrot.lane.b32.xlu0 %v9639_v63, %s9666_s22 }
0x1074   : > { %6571 = vrot.lane.b32.xlu0 %v6568_v26, %s9666_s22 }
0x10e2   : > { %v6375_v5 = vpop.permute.xlu0 %6374 }
0x10e3   : > { %v6377_v55 = vmul.f32 %v6375_v5, %v6372_v48  ;;  %v6624_v48 = vld [vmem:[%s11525_s4 + $0x7] sm:$0x1] }
0x10e5   : > { %v6382_v7 = vadd.f32 %v6381_v17, %v6377_v55 }
0x10e6   : > { %v6572_v1 = vpop.permute.xlu0 %6571 }
0x10e7   : > { %v6383_v13 = vpack.c.bf16 %v6382_v7, %v6382_v7 }
0x10e9   : > { %v6385_v0 = vrot.slane %v6383_v13, 1 }
0x10eb   : > { %6386 = vrot.lane.b32.xlu1 %v6385_v0, %s9666_s22 }
0x115d   : > { %v6387_v15 = vpop.permute.xlu1 %6386 }
0x115e   : > { %9000 = vmatmul.mubr.msk.bf16.vlgmr.msra.gmra.mrb[76].mxu1 %vm5943_vm5, %v6387_v15  ;;  %9006 = vmatmul.mubr.msk.bf16.vlgmr.msra.gmra.mrb[48].mxu0 %vm5943_vm5, %v6387_v15 }
0x115f   : > { %9016 = vmatpush3.bf16.msra.mxu0 %v9621_v14  ;;  %9017 = vmatprep.mubr.msk.bf16.mxu0 %vm9667_vm1, %v11431_v61 }
0x1160   : > { %9010 = vmatpush3.bf16.msra.mxu1 %v11400_v19  ;;  %9011 = vmatprep.mubr.msk.bf16.mxu1 %vm9667_vm1, %v11431_v61 }
0x1161   : > { %9021 = vmatprep.subr.bf16.mxu1 %v11431_v61  ;;  %9029 = vmatprep.subr.bf16.mxu0 %v11431_v61 }
0x1166   : > { %9018 = vmatmul.mubr.msk.bf16.vlgmr.msra.gmra.mrb[52].mxu0 %vm5943_vm5, %v6572_v1 }
0x1167   : > { %9031 = vmatprep.mubr.msk.bf16.mxu0 %vm9667_vm1, %v11431_v61 }
0x1231   : > { %v6425_v4 = vpop.f32.mrb[76].mxu1  ;;  %v6470_v10 = vpop.f32.mrb[48].mxu0 }
0x1232   : > { %v6426_v37 = vadd.f32 %v6425_v4, %v11442_v2  ;;  %v6471_v24 = vadd.f32 %v6470_v10, %v11377_v54  ;;  %v9001_v19 = vpop.f32.mrb[77].mxu1  ;;  %v9007_v25 = vpop.f32.mrb[49].mxu0 }
0x1233   : > { %v6428_v49 = vpop.f32.mrb[78].mxu1  ;;  %v6473_v32 = vpop.f32.mrb[50].mxu0  ;;  %v6567_v25 = vld [vmem:[%s11524_s3 + $0x30] sm:$0x3] }
0x1234   : > { %v6431_v60 = vmul.f32 0.5, %v6426_v37  ;;  %v6477_v21 = vrot.slane %v6471_v24, 5  ;;  %v9002_v45 = vpop.f32.mrb[79].mxu1  ;;  %v9008_v20 = vpop.f32.mrb[51].mxu0  ;;  %v6700_v49 = vsel %vm6698_vm10, %v6567_v25, 0 }
0x1235   : > { %9030 = vmatpush3.bf16.msra.mxu0 %v6700_v49 }
0x1236   : > { %9640 = vtanh.f32 %v6431_v60  ;;  %6484 = vrot.lane.b32.xlu1 %v6477_v21, %s9669_s25  ;;  %v6479_v50 = vadd.f32 %v6477_v21, %v11392_v18 }
0x1238   : > { %v6480_v11 = vmul.f32 0.5, %v6479_v50 }
0x1239   : > { %v6616_v35 = vpop.f32.mrb[52].mxu0 }
0x123a   : > { %v9019_v36 = vpop.f32.mrb[53].mxu0  ;;  %9642 = vtanh.f32 %v6480_v11  ;;  %v6617_v62 = vadd.f32 %v6616_v35, %v6569_v57 }
0x123b   : > { %v6619_v9 = vpop.f32.mrb[54].mxu0 }
0x123c   : > { %v9020_v38 = vpop.f32.mrb[55].mxu0  ;;  %v6622_v43 = vmax.f32 %v6617_v62, 0.0 }
0x123e   : > { %v6623_v44 = vpack.c.bf16 %v6622_v43, %v6622_v43 }
0x1240   : > { %v9641_v47 = vpop.eup %9640 }
0x1241   : > { %v6433_v23 = vadd.f32 1.0, %v9641_v47 }
0x1243   : > { %v6434_v42 = vmul.f32 0.5, %v6433_v23 }
0x1244   : > { %v9643_v51 = vpop.eup %9642 }
0x1245   : > { %v6435_v54 = vadd.f32 %v6434_v42, %v11448_v28  ;;  %v6482_v6 = vadd.f32 1.0, %v9643_v51  ;;  %v6501_v28 = vrot.slane %v6382_v7, 7 }
0x1247   : > { %v6483_v46 = vmul.f32 0.5, %v6482_v6 }
0x1249   : > { %v6494_v3 = vsub.f32 1.0, %v6483_v46  ;;  %v6503_v34 = vmul.f32 %v6501_v28, %v6483_v46 }
0x12a8   : > { %v6485_v12 = vpop.permute.xlu1 %6484 }
0x12a9   : > { %v6487_v58 = vmul.f32 %v6485_v12, %v6483_v46 }
0x12ab   : > { %6489 = vrot.lane.b32.xlu0 %v6487_v58, %s9670_s28 }
0x131d   : > { %v6490_v33 = vpop.permute.xlu0 %6489 }
0x131e   : > { %v6492_v31 = vadd.f32 %v6490_v33, %v11392_v18 }
0x1320   : > { %9644 = vtanh.f32 %v6492_v31 }
0x132a   : > { %v9645_v39 = vpop.eup %9644 }
0x132b   : > { %6496 = vrot.lane.b32.xlu1 %v9645_v39, %s9666_s22 }
0x139d   : > { %v6497_v22 = vpop.permute.xlu1 %6496 }
0x139e   : > { %v6499_v59 = vmul.f32 %v6497_v22, %v6494_v3 }
0x13a0   : > { %v6504_v30 = vadd.f32 %v6503_v34, %v6499_v59 }
0x13a2   : > { %v6505_v41 = vpack.c.bf16 %v6504_v30, %v6504_v30 }
0x13a4   : > { %v6507_v16 = vshrl.u32 %v6505_v41, 16 }
0x13a6   : > { %v6509_v18 = vrot.slane %v6507_v16, 1 }
0x13a8   : > { %6510 = vrot.lane.b32.xlu0 %v6509_v18, %s9666_s22 }
0x141a   : > { %v6511_v40 = vpop.permute.xlu0 %6510 }
0x141b   : > { %9012 = vmatmul.mubr.msk.bf16.vlgmr.msra.gmra.mrb[80].mxu1 %vm5943_vm5, %v6511_v40 }
0x141c   : > { %9022 = vmatpush3.bf16.msra.mxu1 %v9622_v53  ;;  %9025 = vmatprep.mubr.msk.bf16.mxu1 %vm9667_vm1, %v11431_v61 }
0x141d   : > { %9023 = vmatprep.subr.bf16.mxu1 %v11431_v61 }
0x1420   : > { %9024 = vmatpush3.bf16.msra.mxu1 %v9623_v8 }
0x1423   : > { %9026 = vmatmul.mubr.msk.bf16.vlgmr.msra.gmra.mrb[84].mxu1 %vm6637_vm7, %v6623_v44 }
0x14ee   : > { %v6549_v29 = vpop.f32.mrb[80].mxu1 }
0x14ef   : > { %v6550_v52 = vadd.f32 %v6549_v29, %v11442_v2  ;;  %v9013_v56 = vpop.f32.mrb[81].mxu1 }
0x14f0   : > { %v6552_v63 = vpop.f32.mrb[82].mxu1 }
0x14f1   : > { %v6555_v26 = vmul.f32 0.5, %v6550_v52  ;;  %v9014_v27 = vpop.f32.mrb[83].mxu1 }
0x14f3   : > { %9646 = vtanh.f32 %v6555_v26 }
0x14f6   : > { %v6675_v5 = vpop.f32.mrb[84].mxu1 }
0x14f7   : > { %v6676_v61 = vadd.f32 %v6675_v5, %v6624_v48  ;;  %v9027_v17 = vpop.f32.mrb[85].mxu1 }
0x14f8   : > { %v6678_v55 = vpop.f32.mrb[86].mxu1 }
0x14f9   : > { %v9028_v7 = vpop.f32.mrb[87].mxu1  ;;  %v6682_v13 = vsel %vm6681_vm8, %v6676_v61, -inf }
0x14fa   : > { %6683 = vmax.xlane.f32.xlu1 %v6682_v13 }
0x14fd   : > { %v9647_v2 = vpop.eup %9646 }
0x14fe   : > { %v6557_v0 = vadd.f32 1.0, %v9647_v2 }
0x1500   : > { %v6558_v14 = vmul.f32 0.5, %v6557_v0 }
0x1502   : > { %v6559_v15 = vadd.f32 %v6558_v14, %v6435_v54 }
0x1504   : > { %v6560_v1 = vmul.f32 0.25, %v6559_v15 }
0x1506   : > { %6751 = vst.msk [vmem:[%s11485_s14 + $0x2] sm:$0x1] %vm6748_vm9, %v6560_v1 }
0x1587   : > { %v6684_v4 = vpop.xlane.xlu1 %6683 }
0x1588   : > { %v6685_v10 = vsub.f32 %v6676_v61, %v6684_v4 }
0x158a   : > { %v6686_v37 = vmul.f32 1.442695, %v6685_v10 }
0x158c   : > { %9648 = vpow2.f32 %v6686_v37 }
0x1596   : > { %v9649_v24 = vpop.eup %9648 }
0x1597   : > { %v6688_v19 = vsel %vm6681_vm8, %v9649_v24, 0.0 }
0x1598   : > { %6689 = vadd.xlane.f32.xlu0 %v6688_v19 }
0x1625   : > { %v6690_v32 = vpop.xlane.xlu0 %6689 }
0x1626   : > { %9650 = vrcp.f32 %v6690_v32 }
0x1630   : > { %v9651_v60 = vpop.eup %9650 }
0x1631   : > { %v6692_v21 = vmul.f32 %v9651_v60, %v9649_v24 }
0x1633   : > { %6750 = vst.msk [vmem:[%s11485_s14 + $0x1] sm:$0x1] %vm6681_vm8, %v6692_v21  ;;  %v6693_v45 = vpack.c.bf16 %v6692_v21, %v6692_v21 }
0x1635   : > { %9032 = vmatmul.mubr.msk.bf16.vlgmr.msra.gmra.mrb[56].mxu0 %vm6694_vm11, %v6693_v45 }
0x1708   : > { %v6736_v20 = vpop.f32.mrb[56].mxu0 }
0x1709   : > { %v6742_v35 = vmul.f32 0.5, %v6736_v20  ;;  %v9033_v36 = vpop.f32.mrb[57].mxu0 }
0x170a   : > { %v6739_v9 = vpop.f32.mrb[58].mxu0 }
0x170b   : > { %9652 = vtanh.f32 %v6742_v35  ;;  %v9034_v38 = vpop.f32.mrb[59].mxu0 }
0x1715   : > { %v9653_v47 = vpop.eup %9652 }
0x1716   : > { %v6744_v23 = vadd.f32 1.0, %v9653_v47 }
0x1718   : > { %v6745_v42 = vmul.f32 0.5, %v6744_v23 }
0x171a   : > { %v6746_v54 = vmul.f32 %v6745_v42, %v6560_v1 }
0x171c   : > { %6749 = vst.msk [vmem:[%s11485_s14] sm:$0x1] %vm6748_vm9, %v6746_v54 }
0x171d PF: > { %s15_s18 = sadd.s32 1, %s9662_s18  }
0x171e   : > { %p12_p4 = scmp.ge.s32.totalorder %s15_s18, 4  }
0x1720   :  { %14 = sbr.rel (!%p12_p4) target bundleno = 1 (0x1), region = 92 }

</bundles_post_ra>
